<compile_context>
chip_gen: v5e
topology: v5e:2x2
jax: 0.10.0
libtpu: 0.0.40
codegen_flags: <defaults>
</compile_context>

<pallas_src>
import jax
import jax.numpy as jnp
from jax.experimental import pallas as pl
from jax.experimental.pallas import tpu as pltpu

EPS = 1e-5  # nn.BatchNorm1d default eps


# ----------------------------------------------------------------------------
# Small helpers
# ----------------------------------------------------------------------------
def _full_spec(shape):
    """Whole-array block (weights): same block every grid step -> stays resident."""
    return pl.BlockSpec(shape, lambda b, n=len(shape): (0,) * n)


def _vmem_limit_bytes():
    # Generation-aware: ~100 MiB on 128 MiB parts (v5e/v6e), ~54 MiB on 64 MiB
    # parts (v7x).  Conservative fallback if the query is unavailable.
    try:
        cap = int(pltpu.get_tpu_info().vmem_capacity_bytes)
        return min(int(cap * 0.85), 100 * 1024 * 1024)
    except Exception:
        return 48 * 1024 * 1024


def _round_lanes(c):
    return -(-c // 128) * 128


def _pick_batch_tile(B, L, Cin, H, vmem_limit):
    """Largest batch tile that fits VMEM, targets MXU M, keeps >=2 grid steps."""
    T = L // 16
    # Rough per-sample f32 working set (lane-padded): input block (x2 buffers),
    # per-layer padded inputs + pre/post-pool activations, GRU scratches.
    per_sample = 2 * L * _round_lanes(Cin) + (L + 4) * _round_lanes(Cin)
    Li, ci = L, Cin
    for co in (32, 32, 64, 128):
        per_sample += Li * _round_lanes(co) + (Li // 2) * _round_lanes(co)
        per_sample += (Li + 4) * _round_lanes(ci)
        Li //= 2
        ci = co
    per_sample += T * (_round_lanes(6 * H) + _round_lanes(2 * H))
    per_sample *= 4  # f32 bytes
    budget = vmem_limit // 2  # headroom for weights / compiler temporaries
    cap = min(max(1, budget // per_sample), 256)  # 256 ~ MXU M on v6e/v7x

    aligned = [d for d in range(8, B + 1, 8) if B % d == 0 and d <= cap]
    if aligned:
        two_step = [d for d in aligned if B // d >= 2]  # keep pipeline/megacore
        return max(two_step) if two_step else max(aligned)
    if B <= cap:
        return B
    # TODO(synk): awkward batch sizes (prime / larger than cap with no aligned
    # divisor): pad the batch to a multiple of 8 instead of running bt=B.
    return B


def _cost_estimate(B, L, Cin, H, out_features, param_bytes):
    T = L // 16
    flops = 0
    Li, ci = L, Cin
    for co in (32, 32, 64, 128):
        flops += 2 * B * Li * (5 * ci) * co
        Li //= 2
        ci = co
    flops += 2 * B * T * 128 * (6 * H)          # GRU input projection
    flops += 2 * 2 * B * T * H * (3 * H)        # GRU recurrent, both directions
    flops += 2 * B * T * (2 * H) * 64           # attention projection
    fi = 2 * H
    for fo in (256, 128, 64, out_features):
        flops += 2 * B * fi * fo
        fi = fo
    transcendentals = B * T * (6 * H + 64 + 1)  # gru sig/tanh + attn tanh + exp
    bytes_accessed = 4 * B * (L * Cin + out_features) + param_bytes
    return pl.CostEstimate(flops=int(flops), transcendentals=int(transcendentals),
                           bytes_accessed=int(bytes_accessed))


# ----------------------------------------------------------------------------
# In-kernel conv block: Conv1d(k=5, pad=2) + BN(eval) + ReLU + MaxPool1d(2,2)
# on time-major activations (L, bt, Cin).  Dropout(0.2) is identity in eval.
# ----------------------------------------------------------------------------
def _conv_block_tm(h, w_ref, scale_ref, shift_ref):
    L, bt, Cin = h.shape
    Cout = w_ref.shape[1]
    halo = jnp.zeros((2, bt, Cin), h.dtype)
    hp = jnp.concatenate([halo, h, halo], axis=0)          # 'same' pad, in VMEM

    if Cin >= 32:
        # Wide-K im2col matmul (K = 5*Cin >= 160): one MXU pass.
        cols = jnp.concatenate(
            [hp[k:k + L].reshape(L * bt, Cin) for k in range(5)], axis=-1)
        acc = jnp.dot(cols.astype(jnp.bfloat16), w_ref[...],
                      preferred_element_type=jnp.float32)
    else:
        # Skinny channels: accumulate 5 taps, skip the lane-concat copies.
        acc = jnp.zeros((L * bt, Cout), jnp.float32)
        for k in range(5):
            tap = hp[k:k + L].reshape(L * bt, Cin).astype(jnp.bfloat16)
            acc = acc + jnp.dot(tap, w_ref[k * Cin:(k + 1) * Cin, :],
                                preferred_element_type=jnp.float32)

    acc = acc * scale_ref[...] + shift_ref[...]             # conv bias + BN folded
    acc = jnp.maximum(acc, 0.0)                             # ReLU
    acc = acc.reshape(L // 2, 2, bt, Cout)                  # MaxPool1d(2, 2)
    return jnp.maximum(acc[:, 0], acc[:, 1])                # (L//2, bt, Cout)


# ----------------------------------------------------------------------------
# Fused kernel: conv stack -> bidirectional GRU -> attention -> FC head
# ----------------------------------------------------------------------------
def fused_kernel(x_ref,
                 c1w, c1s, c1t, c2w, c2s, c2t, c3w, c3s, c3t, c4w, c4s, c4t,
                 wih_ref, bih_ref, whf_ref, bhf_ref, whb_ref, bhb_ref,
                 aw1_ref, ab1_ref, aw2_ref,
                 f1w, f1s, f1t, f2w, f2s, f2t, f3w, f3s, f3t, f4w, f4b,
                 out_ref, gates_scr, gru_scr):
    # ---- conv stack, time-major (L, bt, C) -------------------------------
    h = x_ref[...]
    for cw, cs, ct in ((c1w, c1s, c1t), (c2w, c2s, c2t),
                       (c3w, c3s, c3t), (c4w, c4s, c4t)):
        h = _conv_block_tm(h, cw, cs, ct)
    T, bt, C = h.shape
    H = whf_ref.shape[0]

    # ---- GRU input projection: all steps, both directions, one matmul ----
    g = jnp.dot(h.reshape(T * bt, C).astype(jnp.bfloat16), wih_ref[...],
                preferred_element_type=jnp.float32) + bih_ref[...]
    gates_scr[...] = g.reshape(T, bt, 6 * H)            # time-major gate cache

    whf = whf_ref[...]
    whb = whb_ref[...]
    bhf = bhf_ref[...]
    bhb = bhb_ref[...]

    # ---- recurrent time loop (PyTorch GRU equations, gate order [r|z|n]) --
    def step(t, carry):
        h_f, h_b = carry
        tb = T - 1 - t
        gi_f = gates_scr[t]                              # (bt, 6H), fwd lanes [0,3H)
        gi_b = gates_scr[tb]                             # bwd lanes [3H,6H)
        hg_f = jnp.dot(h_f.astype(jnp.bfloat16), whf,
                       preferred_element_type=jnp.float32) + bhf
        hg_b = jnp.dot(h_b.astype(jnp.bfloat16), whb,
                       preferred_element_type=jnp.float32) + bhb

        r_f = jax.nn.sigmoid(gi_f[:, 0 * H:1 * H] + hg_f[:, 0 * H:1 * H])
        z_f = jax.nn.sigmoid(gi_f[:, 1 * H:2 * H] + hg_f[:, 1 * H:2 * H])
        n_f = jnp.tanh(gi_f[:, 2 * H:3 * H] + r_f * hg_f[:, 2 * H:3 * H])
        h_f = (1.0 - z_f) * n_f + z_f * h_f

        r_b = jax.nn.sigmoid(gi_b[:, 3 * H:4 * H] + hg_b[:, 0 * H:1 * H])
        z_b = jax.nn.sigmoid(gi_b[:, 4 * H:5 * H] + hg_b[:, 1 * H:2 * H])
        n_b = jnp.tanh(gi_b[:, 5 * H:6 * H] + r_b * hg_b[:, 2 * H:3 * H])
        h_b = (1.0 - z_b) * n_b + z_b * h_b

        gru_scr[t, :, 0:H] = h_f                         # fwd half-lanes
        gru_scr[tb, :, H:2 * H] = h_b                    # bwd half-lanes
        return h_f, h_b

    h0 = jnp.zeros((bt, H), jnp.float32)
    jax.lax.fori_loop(0, T, step, (h0, h0), unroll=True if T <= 16 else 2)

    # ---- attention (Linear -> Tanh -> Linear -> Softmax over time) --------
    gru_out = gru_scr[...]                               # (T, bt, 2H)
    a = jnp.tanh(jnp.dot(gru_out.reshape(T * bt, 2 * H).astype(jnp.bfloat16),
                         aw1_ref[...], preferred_element_type=jnp.float32)
                 + ab1_ref[...])                         # (T*bt, 64)
    s = jnp.sum(a * aw2_ref[...], axis=-1, keepdims=True).reshape(T, bt, 1)
    # (Linear(64,1) bias omitted: softmax over dim=1 is shift-invariant.)
    s = s - jnp.max(s, axis=0, keepdims=True)
    e = jnp.exp(s)
    attn = e / jnp.sum(e, axis=0, keepdims=True)         # (T, bt, 1)
    ctx = jnp.sum(attn * gru_out, axis=0)                # (bt, 2H)

    # ---- FC head: 3 x [Linear + BN(eval) + ReLU] + Linear (Dropout = id) --
    hh = ctx
    for fw, fsc, fsh in ((f1w, f1s, f1t), (f2w, f2s, f2t), (f3w, f3s, f3t)):
        hh = jnp.dot(hh.astype(jnp.bfloat16), fw[...],
                     preferred_element_type=jnp.float32)
        hh = jnp.maximum(hh * fsc[...] + fsh[...], 0.0)
    out_ref[...] = jnp.dot(hh.astype(jnp.bfloat16), f4w[...],
                           preferred_element_type=jnp.float32) + f4b[...]


# ----------------------------------------------------------------------------
# Full forward pass: one pallas_call over batch tiles
# ----------------------------------------------------------------------------
def deep_pulse_detector(x, params):
    B, L, Cin = x.shape
    # TODO(synk): PyTorch MaxPool1d truncates odd lengths; here we require L
    # divisible by 16 (and by 64 for cheapest reshapes).  Also for very long L,
    # tile the time axis with a 4-sample halo via manual DMA.
    assert L % 16 == 0, "require L divisible by 2**4 for the four MaxPool1d(2,2)"
    H = params["gru"]["whh_f"].shape[0]
    T = L // 16
    out_features = params["fc"][3]["w"].shape[1]

    vmem_limit = _vmem_limit_bytes()
    bt = _pick_batch_tile(B, L, Cin, H, vmem_limit)
    grid = (B // bt,)

    x_t = jnp.transpose(x, (1, 0, 2))                    # time-major (L, B, Cin)

    flat = []
    for p in params["conv"]:
        flat += [p["w"], p["scale"], p["shift"]]
    gp = params["gru"]
    flat += [gp["wih"], gp["bih"], gp["whh_f"], gp["bhh_f"], gp["whh_b"], gp["bhh_b"]]
    ap = params["attn"]
    flat += [ap["w1"], ap["b1"], ap["w2"]]
    for p in params["fc"][:3]:
        flat += [p["w"], p["scale"], p["shift"]]
    flat += [params["fc"][3]["w"], params["fc"][3]["b"]]

    param_bytes = sum(int(a.size) * a.dtype.itemsize for a in flat)
    in_specs = [pl.BlockSpec((L, bt, Cin), lambda b: (0, b, 0))]
    in_specs += [_full_spec(a.shape) for a in flat]

    return pl.pallas_call(
        fused_kernel,
        out_shape=jax.ShapeDtypeStruct((B, out_features), jnp.float32),
        grid=grid,
        in_specs=in_specs,
        out_specs=pl.BlockSpec((bt, out_features), lambda b: (b, 0)),
        scratch_shapes=[
            pltpu.VMEM((T, bt, 6 * H), jnp.float32),     # input-projected gates
            pltpu.VMEM((T, bt, 2 * H), jnp.float32),     # fwd|bwd hidden states
        ],
        compiler_params=pltpu.CompilerParams(
            dimension_semantics=("parallel",),           # batch axis -> megacore
            vmem_limit_bytes=vmem_limit),
        cost_estimate=_cost_estimate(B, L, Cin, H, out_features, param_bytes),
    )(x_t, *flat)


# ----------------------------------------------------------------------------
# Synthetic parameters (PyTorch-shaped) + preparation (transpose / fold / cast)
# ----------------------------------------------------------------------------
def init_raw_params(key, input_size, gru_hidden, output_size):
    keys = iter(jax.random.split(key, 128))

    def rnd(shape, scale=0.1):
        return (scale * jax.random.normal(next(keys), shape)).astype(jnp.float32)

    def bn(c):
        # PyTorch BatchNorm1d defaults: weight=1, bias=0, mean=0, var=1
        return dict(gamma=jnp.ones((c,), jnp.float32), beta=jnp.zeros((c,), jnp.float32),
                    mean=jnp.zeros((c,), jnp.float32), var=jnp.ones((c,), jnp.float32))

    conv, cin = [], input_size
    for cout in (32, 32, 64, 128):
        conv.append(dict(w=rnd((cout, cin, 5)), b=rnd((cout,)), bn=bn(cout)))  # nn.Conv1d layout
        cin = cout

    H = gru_hidden

    def gru_dir():
        return dict(w_ih=rnd((3 * H, cin)), w_hh=rnd((3 * H, H)),
                    b_ih=rnd((3 * H,)), b_hh=rnd((3 * H,)))

    gru = dict(fwd=gru_dir(), bwd=gru_dir())
    attn = dict(w1=rnd((64, 2 * H)), b1=rnd((64,)), w2=rnd((1, 64)), b2=rnd((1,)))

    fc, fin = [], 2 * H
    for fout in (256, 128, 64):
        fc.append(dict(w=rnd((fout, fin)), b=rnd((fout,)), bn=bn(fout)))
        fin = fout
    fc.append(dict(w=rnd((output_size, fin)), b=rnd((output_size,))))
    return dict(conv=conv, gru=gru, attn=attn, fc=fc)


def _fold_bn(bn, bias, eps=EPS):
    # eval-mode BN + preceding bias: (x*W + b) -> scale*(x*W) + (b*scale + beta - mean*scale)
    scale = bn["gamma"] / jnp.sqrt(bn["var"] + eps)
    shift = bn["beta"] - bn["mean"] * scale + bias * scale
    return scale[None, :].astype(jnp.float32), shift[None, :].astype(jnp.float32)


def prepare_params(raw, gru_hidden):
    H = gru_hidden

    conv = []
    for layer in raw["conv"]:
        w = layer["w"]                                           # (Cout, Cin, 5)
        cout, cin, k = w.shape
        w2d = jnp.transpose(w, (2, 1, 0)).reshape(k * cin, cout)  # tap-major (5*Cin, Cout)
        scale, shift = _fold_bn(layer["bn"], layer["b"])
        conv.append(dict(w=w2d.astype(jnp.bfloat16), scale=scale, shift=shift))

    def direction(d):
        return d["w_ih"].T, d["w_hh"].T, d["b_ih"], d["b_hh"]    # (C,3H), (H,3H), order [r|z|n]

    wih_f, whh_f, bih_f, bhh_f = direction(raw["gru"]["fwd"])
    wih_b, whh_b, bih_b, bhh_b = direction(raw["gru"]["bwd"])
    gru = dict(
        wih=jnp.concatenate([wih_f, wih_b], axis=1).astype(jnp.bfloat16),  # (C, 6H)
        bih=jnp.concatenate([bih_f, bih_b])[None, :].astype(jnp.float32),  # (1, 6H)
        whh_f=whh_f.astype(jnp.bfloat16),                                  # (H, 3H) bf16
        bhh_f=bhh_f[None, :].astype(jnp.float32),
        whh_b=whh_b.astype(jnp.bfloat16),
        bhh_b=bhh_b[None, :].astype(jnp.float32),
    )

    attn = dict(w1=raw["attn"]["w1"].T.astype(jnp.bfloat16),     # (2H, 64)
                b1=raw["attn"]["b1"][None, :].astype(jnp.float32),
                w2=raw["attn"]["w2"].astype(jnp.float32))        # (1, 64); b2 dropped

    fc = []
    for layer in raw["fc"][:3]:
        scale, shift = _fold_bn(layer["bn"], layer["b"])
        fc.append(dict(w=layer["w"].T.astype(jnp.bfloat16), scale=scale, shift=shift))
    last = raw["fc"][3]
    fc.append(dict(w=last["w"].T.astype(jnp.bfloat16), b=last["b"][None, :].astype(jnp.float32)))

    return dict(conv=conv, gru=gru, attn=attn, fc=fc)


if __name__ == "__main__":
    B, L = 2, 64                            # L divisible by 2^4 for the 4 maxpools
    INPUT_SIZE, GRU_HIDDEN, OUTPUT_SIZE = 4, 32, 2

    key = jax.random.PRNGKey(0)
    kx, kp = jax.random.split(key)
    x = jax.random.normal(kx, (B, L, INPUT_SIZE), dtype=jnp.float32)
    raw = init_raw_params(kp, INPUT_SIZE, GRU_HIDDEN, OUTPUT_SIZE)
    params = prepare_params(raw, GRU_HIDDEN)

    fwd = jax.jit(deep_pulse_detector)
    out = jax.block_until_ready(fwd(x, params))

    assert out.shape == (B, OUTPUT_SIZE), out.shape
    assert bool(jnp.all(jnp.isfinite(out)))
    print("KERNEL_OK")
</pallas_src>

<mosaic_0001>
module attributes {stable_mosaic.version = 11 : i64} {
  func.func @fused_kernel(%arg0: i32, %arg1: memref<64x2x4xf32, #tpu.memory_space<vmem>>, %arg2: memref<20x32xbf16, #tpu.memory_space<vmem>>, %arg3: memref<1x32xf32, #tpu.memory_space<vmem>>, %arg4: memref<1x32xf32, #tpu.memory_space<vmem>>, %arg5: memref<160x32xbf16, #tpu.memory_space<vmem>>, %arg6: memref<1x32xf32, #tpu.memory_space<vmem>>, %arg7: memref<1x32xf32, #tpu.memory_space<vmem>>, %arg8: memref<160x64xbf16, #tpu.memory_space<vmem>>, %arg9: memref<1x64xf32, #tpu.memory_space<vmem>>, %arg10: memref<1x64xf32, #tpu.memory_space<vmem>>, %arg11: memref<320x128xbf16, #tpu.memory_space<vmem>>, %arg12: memref<1x128xf32, #tpu.memory_space<vmem>>, %arg13: memref<1x128xf32, #tpu.memory_space<vmem>>, %arg14: memref<128x192xbf16, #tpu.memory_space<vmem>>, %arg15: memref<1x192xf32, #tpu.memory_space<vmem>>, %arg16: memref<32x96xbf16, #tpu.memory_space<vmem>>, %arg17: memref<1x96xf32, #tpu.memory_space<vmem>>, %arg18: memref<32x96xbf16, #tpu.memory_space<vmem>>, %arg19: memref<1x96xf32, #tpu.memory_space<vmem>>, %arg20: memref<64x64xbf16, #tpu.memory_space<vmem>>, %arg21: memref<1x64xf32, #tpu.memory_space<vmem>>, %arg22: memref<1x64xf32, #tpu.memory_space<vmem>>, %arg23: memref<64x256xbf16, #tpu.memory_space<vmem>>, %arg24: memref<1x256xf32, #tpu.memory_space<vmem>>, %arg25: memref<1x256xf32, #tpu.memory_space<vmem>>, %arg26: memref<256x128xbf16, #tpu.memory_space<vmem>>, %arg27: memref<1x128xf32, #tpu.memory_space<vmem>>, %arg28: memref<1x128xf32, #tpu.memory_space<vmem>>, %arg29: memref<128x64xbf16, #tpu.memory_space<vmem>>, %arg30: memref<1x64xf32, #tpu.memory_space<vmem>>, %arg31: memref<1x64xf32, #tpu.memory_space<vmem>>, %arg32: memref<64x2xbf16, #tpu.memory_space<vmem>>, %arg33: memref<1x2xf32, #tpu.memory_space<vmem>>, %arg34: memref<2x2xf32, #tpu.memory_space<vmem>>, %arg35: memref<4x2x192xf32, #tpu.memory_space<vmem>>, %arg36: memref<4x2x64xf32, #tpu.memory_space<vmem>>) attributes {dimension_semantics = [#tpu.dimension_semantics<parallel>], iteration_bounds = array<i64: 1>, scalar_prefetch = 0 : i64, scratch_operands = 2 : i64, tpu.core_type = #tpu.core_type<tc>, window_params = [{transform_indices = @transform_0, window_bounds = array<i64: 64, 2, 4>}, {pipeline_mode = #tpu.pipeline_mode<synchronous>, transform_indices = @transform_1, window_bounds = array<i64: 20, 32>}, {pipeline_mode = #tpu.pipeline_mode<synchronous>, transform_indices = @transform_2, window_bounds = array<i64: 1, 32>}, {pipeline_mode = #tpu.pipeline_mode<synchronous>, transform_indices = @transform_3, window_bounds = array<i64: 1, 32>}, {pipeline_mode = #tpu.pipeline_mode<synchronous>, transform_indices = @transform_4, window_bounds = array<i64: 160, 32>}, {pipeline_mode = #tpu.pipeline_mode<synchronous>, transform_indices = @transform_5, window_bounds = array<i64: 1, 32>}, {pipeline_mode = #tpu.pipeline_mode<synchronous>, transform_indices = @transform_6, window_bounds = array<i64: 1, 32>}, {pipeline_mode = #tpu.pipeline_mode<synchronous>, transform_indices = @transform_7, window_bounds = array<i64: 160, 64>}, {pipeline_mode = #tpu.pipeline_mode<synchronous>, transform_indices = @transform_8, window_bounds = array<i64: 1, 64>}, {pipeline_mode = #tpu.pipeline_mode<synchronous>, transform_indices = @transform_9, window_bounds = array<i64: 1, 64>}, {pipeline_mode = #tpu.pipeline_mode<synchronous>, transform_indices = @transform_10, window_bounds = array<i64: 320, 128>}, {pipeline_mode = #tpu.pipeline_mode<synchronous>, transform_indices = @transform_11, window_bounds = array<i64: 1, 128>}, {pipeline_mode = #tpu.pipeline_mode<synchronous>, transform_indices = @transform_12, window_bounds = array<i64: 1, 128>}, {pipeline_mode = #tpu.pipeline_mode<synchronous>, transform_indices = @transform_13, window_bounds = array<i64: 128, 192>}, {pipeline_mode = #tpu.pipeline_mode<synchronous>, transform_indices = @transform_14, window_bounds = array<i64: 1, 192>}, {pipeline_mode = #tpu.pipeline_mode<synchronous>, transform_indices = @transform_15, window_bounds = array<i64: 32, 96>}, {pipeline_mode = #tpu.pipeline_mode<synchronous>, transform_indices = @transform_16, window_bounds = array<i64: 1, 96>}, {pipeline_mode = #tpu.pipeline_mode<synchronous>, transform_indices = @transform_17, window_bounds = array<i64: 32, 96>}, {pipeline_mode = #tpu.pipeline_mode<synchronous>, transform_indices = @transform_18, window_bounds = array<i64: 1, 96>}, {pipeline_mode = #tpu.pipeline_mode<synchronous>, transform_indices = @transform_19, window_bounds = array<i64: 64, 64>}, {pipeline_mode = #tpu.pipeline_mode<synchronous>, transform_indices = @transform_20, window_bounds = array<i64: 1, 64>}, {pipeline_mode = #tpu.pipeline_mode<synchronous>, transform_indices = @transform_21, window_bounds = array<i64: 1, 64>}, {pipeline_mode = #tpu.pipeline_mode<synchronous>, transform_indices = @transform_22, window_bounds = array<i64: 64, 256>}, {pipeline_mode = #tpu.pipeline_mode<synchronous>, transform_indices = @transform_23, window_bounds = array<i64: 1, 256>}, {pipeline_mode = #tpu.pipeline_mode<synchronous>, transform_indices = @transform_24, window_bounds = array<i64: 1, 256>}, {pipeline_mode = #tpu.pipeline_mode<synchronous>, transform_indices = @transform_25, window_bounds = array<i64: 256, 128>}, {pipeline_mode = #tpu.pipeline_mode<synchronous>, transform_indices = @transform_26, window_bounds = array<i64: 1, 128>}, {pipeline_mode = #tpu.pipeline_mode<synchronous>, transform_indices = @transform_27, window_bounds = array<i64: 1, 128>}, {pipeline_mode = #tpu.pipeline_mode<synchronous>, transform_indices = @transform_28, window_bounds = array<i64: 128, 64>}, {pipeline_mode = #tpu.pipeline_mode<synchronous>, transform_indices = @transform_29, window_bounds = array<i64: 1, 64>}, {pipeline_mode = #tpu.pipeline_mode<synchronous>, transform_indices = @transform_30, window_bounds = array<i64: 1, 64>}, {pipeline_mode = #tpu.pipeline_mode<synchronous>, transform_indices = @transform_31, window_bounds = array<i64: 64, 2>}, {pipeline_mode = #tpu.pipeline_mode<synchronous>, transform_indices = @transform_32, window_bounds = array<i64: 1, 2>}, {transform_indices = @transform_33, window_bounds = array<i64: 2, 2>}]} {
    %c0 = arith.constant 0 : index
    %c0_0 = arith.constant 0 : index
    %c0_1 = arith.constant 0 : index
    %0 = vector.load %arg1[%c0, %c0_0, %c0_1] : memref<64x2x4xf32, #tpu.memory_space<vmem>>, vector<64x2x4xf32>
    %cst = arith.constant 0.000000e+00 : f32
    %1 = vector.broadcast %cst : f32 to vector<2x2x4xf32>
    %2 = tpu.concatenate %1, %0, %1 in 0 : vector<2x2x4xf32>, vector<64x2x4xf32>, vector<2x2x4xf32> -> vector<68x2x4xf32>
    %cst_2 = arith.constant 0.000000e+00 : f32
    %3 = vector.broadcast %cst_2 : f32 to vector<128x32xf32>
    %4 = vector.extract_strided_slice %2 {offsets = [0, 0, 0], sizes = [64, 2, 4], strides = [1, 1, 1]} : vector<68x2x4xf32> to vector<64x2x4xf32>
    %5 = vector.shape_cast %4 : vector<64x2x4xf32> to vector<128x4xf32>
    %6 = arith.truncf %5 : vector<128x4xf32> to vector<128x4xbf16>
    %c0_3 = arith.constant 0 : index
    %c0_4 = arith.constant 0 : index
    %7 = vector.load %arg2[%c0_3, %c0_4] : memref<20x32xbf16, #tpu.memory_space<vmem>>, vector<4x32xbf16>
    %cst_5 = arith.constant dense<0.000000e+00> : vector<128x32xf32>
    %8 = tpu.matmul %6, %7, %cst_5 {dimension_numbers = #tpu.dot_dimension_numbers<[1], [0], [0], [1], [0, 0, 1, 1], [], []>} : vector<128x4xbf16>, vector<4x32xbf16>, vector<128x32xf32> -> vector<128x32xf32>
    %9 = arith.addf %3, %8 : vector<128x32xf32>
    %10 = vector.extract_strided_slice %2 {offsets = [1, 0, 0], sizes = [64, 2, 4], strides = [1, 1, 1]} : vector<68x2x4xf32> to vector<64x2x4xf32>
    %11 = vector.shape_cast %10 : vector<64x2x4xf32> to vector<128x4xf32>
    %12 = arith.truncf %11 : vector<128x4xf32> to vector<128x4xbf16>
    %c4 = arith.constant 4 : index
    %c0_6 = arith.constant 0 : index
    %13 = vector.load %arg2[%c4, %c0_6] : memref<20x32xbf16, #tpu.memory_space<vmem>>, vector<4x32xbf16>
    %cst_7 = arith.constant dense<0.000000e+00> : vector<128x32xf32>
    %14 = tpu.matmul %12, %13, %cst_7 {dimension_numbers = #tpu.dot_dimension_numbers<[1], [0], [0], [1], [0, 0, 1, 1], [], []>} : vector<128x4xbf16>, vector<4x32xbf16>, vector<128x32xf32> -> vector<128x32xf32>
    %15 = arith.addf %9, %14 : vector<128x32xf32>
    %16 = vector.extract_strided_slice %2 {offsets = [2, 0, 0], sizes = [64, 2, 4], strides = [1, 1, 1]} : vector<68x2x4xf32> to vector<64x2x4xf32>
    %17 = vector.shape_cast %16 : vector<64x2x4xf32> to vector<128x4xf32>
    %18 = arith.truncf %17 : vector<128x4xf32> to vector<128x4xbf16>
    %c8 = arith.constant 8 : index
    %c0_8 = arith.constant 0 : index
    %19 = vector.load %arg2[%c8, %c0_8] : memref<20x32xbf16, #tpu.memory_space<vmem>>, vector<4x32xbf16>
    %cst_9 = arith.constant dense<0.000000e+00> : vector<128x32xf32>
    %20 = tpu.matmul %18, %19, %cst_9 {dimension_numbers = #tpu.dot_dimension_numbers<[1], [0], [0], [1], [0, 0, 1, 1], [], []>} : vector<128x4xbf16>, vector<4x32xbf16>, vector<128x32xf32> -> vector<128x32xf32>
    %21 = arith.addf %15, %20 : vector<128x32xf32>
    %22 = vector.extract_strided_slice %2 {offsets = [3, 0, 0], sizes = [64, 2, 4], strides = [1, 1, 1]} : vector<68x2x4xf32> to vector<64x2x4xf32>
    %23 = vector.shape_cast %22 : vector<64x2x4xf32> to vector<128x4xf32>
    %24 = arith.truncf %23 : vector<128x4xf32> to vector<128x4xbf16>
    %c12 = arith.constant 12 : index
    %c0_10 = arith.constant 0 : index
    %25 = vector.load %arg2[%c12, %c0_10] : memref<20x32xbf16, #tpu.memory_space<vmem>>, vector<4x32xbf16>
    %cst_11 = arith.constant dense<0.000000e+00> : vector<128x32xf32>
    %26 = tpu.matmul %24, %25, %cst_11 {dimension_numbers = #tpu.dot_dimension_numbers<[1], [0], [0], [1], [0, 0, 1, 1], [], []>} : vector<128x4xbf16>, vector<4x32xbf16>, vector<128x32xf32> -> vector<128x32xf32>
    %27 = arith.addf %21, %26 : vector<128x32xf32>
    %28 = vector.extract_strided_slice %2 {offsets = [4, 0, 0], sizes = [64, 2, 4], strides = [1, 1, 1]} : vector<68x2x4xf32> to vector<64x2x4xf32>
    %29 = vector.shape_cast %28 : vector<64x2x4xf32> to vector<128x4xf32>
    %30 = arith.truncf %29 : vector<128x4xf32> to vector<128x4xbf16>
    %c16 = arith.constant 16 : index
    %c0_12 = arith.constant 0 : index
    %31 = vector.load %arg2[%c16, %c0_12] : memref<20x32xbf16, #tpu.memory_space<vmem>>, vector<4x32xbf16>
    %cst_13 = arith.constant dense<0.000000e+00> : vector<128x32xf32>
    %32 = tpu.matmul %30, %31, %cst_13 {dimension_numbers = #tpu.dot_dimension_numbers<[1], [0], [0], [1], [0, 0, 1, 1], [], []>} : vector<128x4xbf16>, vector<4x32xbf16>, vector<128x32xf32> -> vector<128x32xf32>
    %33 = arith.addf %27, %32 : vector<128x32xf32>
    %c0_14 = arith.constant 0 : index
    %c0_15 = arith.constant 0 : index
    %34 = vector.load %arg3[%c0_14, %c0_15] : memref<1x32xf32, #tpu.memory_space<vmem>>, vector<1x32xf32>
    %35 = vector.broadcast %34 : vector<1x32xf32> to vector<128x32xf32>
    %36 = arith.mulf %33, %35 : vector<128x32xf32>
    %c0_16 = arith.constant 0 : index
    %c0_17 = arith.constant 0 : index
    %37 = vector.load %arg4[%c0_16, %c0_17] : memref<1x32xf32, #tpu.memory_space<vmem>>, vector<1x32xf32>
    %38 = vector.broadcast %37 : vector<1x32xf32> to vector<128x32xf32>
    %39 = arith.addf %36, %38 : vector<128x32xf32>
    %cst_18 = arith.constant 0.000000e+00 : f32
    %40 = vector.broadcast %cst_18 : f32 to vector<128x32xf32>
    %41 = arith.maximumf %39, %40 : vector<128x32xf32>
    %42 = vector.shape_cast %41 : vector<128x32xf32> to vector<32x2x2x32xf32>
    %43 = vector.extract_strided_slice %42 {offsets = [0, 0, 0, 0], sizes = [32, 1, 2, 32], strides = [1, 1, 1, 1]} : vector<32x2x2x32xf32> to vector<32x1x2x32xf32>
    %44 = vector.shape_cast %43 : vector<32x1x2x32xf32> to vector<32x2x32xf32>
    %45 = vector.extract_strided_slice %42 {offsets = [0, 1, 0, 0], sizes = [32, 1, 2, 32], strides = [1, 1, 1, 1]} : vector<32x2x2x32xf32> to vector<32x1x2x32xf32>
    %46 = vector.shape_cast %45 : vector<32x1x2x32xf32> to vector<32x2x32xf32>
    %47 = arith.maximumf %44, %46 : vector<32x2x32xf32>
    %cst_19 = arith.constant 0.000000e+00 : f32
    %48 = vector.broadcast %cst_19 : f32 to vector<2x2x32xf32>
    %49 = tpu.concatenate %48, %47, %48 in 0 : vector<2x2x32xf32>, vector<32x2x32xf32>, vector<2x2x32xf32> -> vector<36x2x32xf32>
    %50 = vector.extract_strided_slice %49 {offsets = [0, 0, 0], sizes = [32, 2, 32], strides = [1, 1, 1]} : vector<36x2x32xf32> to vector<32x2x32xf32>
    %51 = vector.shape_cast %50 : vector<32x2x32xf32> to vector<64x32xf32>
    %52 = vector.extract_strided_slice %49 {offsets = [1, 0, 0], sizes = [32, 2, 32], strides = [1, 1, 1]} : vector<36x2x32xf32> to vector<32x2x32xf32>
    %53 = vector.shape_cast %52 : vector<32x2x32xf32> to vector<64x32xf32>
    %54 = vector.extract_strided_slice %49 {offsets = [2, 0, 0], sizes = [32, 2, 32], strides = [1, 1, 1]} : vector<36x2x32xf32> to vector<32x2x32xf32>
    %55 = vector.shape_cast %54 : vector<32x2x32xf32> to vector<64x32xf32>
    %56 = vector.extract_strided_slice %49 {offsets = [3, 0, 0], sizes = [32, 2, 32], strides = [1, 1, 1]} : vector<36x2x32xf32> to vector<32x2x32xf32>
    %57 = vector.shape_cast %56 : vector<32x2x32xf32> to vector<64x32xf32>
    %58 = vector.extract_strided_slice %49 {offsets = [4, 0, 0], sizes = [32, 2, 32], strides = [1, 1, 1]} : vector<36x2x32xf32> to vector<32x2x32xf32>
    %59 = vector.shape_cast %58 : vector<32x2x32xf32> to vector<64x32xf32>
    %60 = tpu.concatenate %51, %53, %55, %57, %59 in 1 : vector<64x32xf32>, vector<64x32xf32>, vector<64x32xf32>, vector<64x32xf32>, vector<64x32xf32> -> vector<64x160xf32>
    %61 = arith.truncf %60 : vector<64x160xf32> to vector<64x160xbf16>
    %c0_20 = arith.constant 0 : index
    %c0_21 = arith.constant 0 : index
    %62 = vector.load %arg5[%c0_20, %c0_21] : memref<160x32xbf16, #tpu.memory_space<vmem>>, vector<160x32xbf16>
    %cst_22 = arith.constant dense<0.000000e+00> : vector<64x32xf32>
    %63 = tpu.matmul %61, %62, %cst_22 {dimension_numbers = #tpu.dot_dimension_numbers<[1], [0], [0], [1], [0, 0, 1, 1], [], []>} : vector<64x160xbf16>, vector<160x32xbf16>, vector<64x32xf32> -> vector<64x32xf32>
    %c0_23 = arith.constant 0 : index
    %c0_24 = arith.constant 0 : index
    %64 = vector.load %arg6[%c0_23, %c0_24] : memref<1x32xf32, #tpu.memory_space<vmem>>, vector<1x32xf32>
    %65 = vector.broadcast %64 : vector<1x32xf32> to vector<64x32xf32>
    %66 = arith.mulf %63, %65 : vector<64x32xf32>
    %c0_25 = arith.constant 0 : index
    %c0_26 = arith.constant 0 : index
    %67 = vector.load %arg7[%c0_25, %c0_26] : memref<1x32xf32, #tpu.memory_space<vmem>>, vector<1x32xf32>
    %68 = vector.broadcast %67 : vector<1x32xf32> to vector<64x32xf32>
    %69 = arith.addf %66, %68 : vector<64x32xf32>
    %cst_27 = arith.constant 0.000000e+00 : f32
    %70 = vector.broadcast %cst_27 : f32 to vector<64x32xf32>
    %71 = arith.maximumf %69, %70 : vector<64x32xf32>
    %72 = vector.shape_cast %71 : vector<64x32xf32> to vector<16x2x2x32xf32>
    %73 = vector.extract_strided_slice %72 {offsets = [0, 0, 0, 0], sizes = [16, 1, 2, 32], strides = [1, 1, 1, 1]} : vector<16x2x2x32xf32> to vector<16x1x2x32xf32>
    %74 = vector.shape_cast %73 : vector<16x1x2x32xf32> to vector<16x2x32xf32>
    %75 = vector.extract_strided_slice %72 {offsets = [0, 1, 0, 0], sizes = [16, 1, 2, 32], strides = [1, 1, 1, 1]} : vector<16x2x2x32xf32> to vector<16x1x2x32xf32>
    %76 = vector.shape_cast %75 : vector<16x1x2x32xf32> to vector<16x2x32xf32>
    %77 = arith.maximumf %74, %76 : vector<16x2x32xf32>
    %cst_28 = arith.constant 0.000000e+00 : f32
    %78 = vector.broadcast %cst_28 : f32 to vector<2x2x32xf32>
    %79 = tpu.concatenate %78, %77, %78 in 0 : vector<2x2x32xf32>, vector<16x2x32xf32>, vector<2x2x32xf32> -> vector<20x2x32xf32>
    %80 = vector.extract_strided_slice %79 {offsets = [0, 0, 0], sizes = [16, 2, 32], strides = [1, 1, 1]} : vector<20x2x32xf32> to vector<16x2x32xf32>
    %81 = vector.shape_cast %80 : vector<16x2x32xf32> to vector<32x32xf32>
    %82 = vector.extract_strided_slice %79 {offsets = [1, 0, 0], sizes = [16, 2, 32], strides = [1, 1, 1]} : vector<20x2x32xf32> to vector<16x2x32xf32>
    %83 = vector.shape_cast %82 : vector<16x2x32xf32> to vector<32x32xf32>
    %84 = vector.extract_strided_slice %79 {offsets = [2, 0, 0], sizes = [16, 2, 32], strides = [1, 1, 1]} : vector<20x2x32xf32> to vector<16x2x32xf32>
    %85 = vector.shape_cast %84 : vector<16x2x32xf32> to vector<32x32xf32>
    %86 = vector.extract_strided_slice %79 {offsets = [3, 0, 0], sizes = [16, 2, 32], strides = [1, 1, 1]} : vector<20x2x32xf32> to vector<16x2x32xf32>
    %87 = vector.shape_cast %86 : vector<16x2x32xf32> to vector<32x32xf32>
    %88 = vector.extract_strided_slice %79 {offsets = [4, 0, 0], sizes = [16, 2, 32], strides = [1, 1, 1]} : vector<20x2x32xf32> to vector<16x2x32xf32>
    %89 = vector.shape_cast %88 : vector<16x2x32xf32> to vector<32x32xf32>
    %90 = tpu.concatenate %81, %83, %85, %87, %89 in 1 : vector<32x32xf32>, vector<32x32xf32>, vector<32x32xf32>, vector<32x32xf32>, vector<32x32xf32> -> vector<32x160xf32>
    %91 = arith.truncf %90 : vector<32x160xf32> to vector<32x160xbf16>
    %c0_29 = arith.constant 0 : index
    %c0_30 = arith.constant 0 : index
    %92 = vector.load %arg8[%c0_29, %c0_30] : memref<160x64xbf16, #tpu.memory_space<vmem>>, vector<160x64xbf16>
    %cst_31 = arith.constant dense<0.000000e+00> : vector<32x64xf32>
    %93 = tpu.matmul %91, %92, %cst_31 {dimension_numbers = #tpu.dot_dimension_numbers<[1], [0], [0], [1], [0, 0, 1, 1], [], []>} : vector<32x160xbf16>, vector<160x64xbf16>, vector<32x64xf32> -> vector<32x64xf32>
    %c0_32 = arith.constant 0 : index
    %c0_33 = arith.constant 0 : index
    %94 = vector.load %arg9[%c0_32, %c0_33] : memref<1x64xf32, #tpu.memory_space<vmem>>, vector<1x64xf32>
    %95 = vector.broadcast %94 : vector<1x64xf32> to vector<32x64xf32>
    %96 = arith.mulf %93, %95 : vector<32x64xf32>
    %c0_34 = arith.constant 0 : index
    %c0_35 = arith.constant 0 : index
    %97 = vector.load %arg10[%c0_34, %c0_35] : memref<1x64xf32, #tpu.memory_space<vmem>>, vector<1x64xf32>
    %98 = vector.broadcast %97 : vector<1x64xf32> to vector<32x64xf32>
    %99 = arith.addf %96, %98 : vector<32x64xf32>
    %cst_36 = arith.constant 0.000000e+00 : f32
    %100 = vector.broadcast %cst_36 : f32 to vector<32x64xf32>
    %101 = arith.maximumf %99, %100 : vector<32x64xf32>
    %102 = vector.shape_cast %101 : vector<32x64xf32> to vector<8x2x2x64xf32>
    %103 = vector.extract_strided_slice %102 {offsets = [0, 0, 0, 0], sizes = [8, 1, 2, 64], strides = [1, 1, 1, 1]} : vector<8x2x2x64xf32> to vector<8x1x2x64xf32>
    %104 = vector.shape_cast %103 : vector<8x1x2x64xf32> to vector<8x2x64xf32>
    %105 = vector.extract_strided_slice %102 {offsets = [0, 1, 0, 0], sizes = [8, 1, 2, 64], strides = [1, 1, 1, 1]} : vector<8x2x2x64xf32> to vector<8x1x2x64xf32>
    %106 = vector.shape_cast %105 : vector<8x1x2x64xf32> to vector<8x2x64xf32>
    %107 = arith.maximumf %104, %106 : vector<8x2x64xf32>
    %cst_37 = arith.constant 0.000000e+00 : f32
    %108 = vector.broadcast %cst_37 : f32 to vector<2x2x64xf32>
    %109 = tpu.concatenate %108, %107, %108 in 0 : vector<2x2x64xf32>, vector<8x2x64xf32>, vector<2x2x64xf32> -> vector<12x2x64xf32>
    %110 = vector.extract_strided_slice %109 {offsets = [0, 0, 0], sizes = [8, 2, 64], strides = [1, 1, 1]} : vector<12x2x64xf32> to vector<8x2x64xf32>
    %111 = vector.shape_cast %110 : vector<8x2x64xf32> to vector<16x64xf32>
    %112 = vector.extract_strided_slice %109 {offsets = [1, 0, 0], sizes = [8, 2, 64], strides = [1, 1, 1]} : vector<12x2x64xf32> to vector<8x2x64xf32>
    %113 = vector.shape_cast %112 : vector<8x2x64xf32> to vector<16x64xf32>
    %114 = vector.extract_strided_slice %109 {offsets = [2, 0, 0], sizes = [8, 2, 64], strides = [1, 1, 1]} : vector<12x2x64xf32> to vector<8x2x64xf32>
    %115 = vector.shape_cast %114 : vector<8x2x64xf32> to vector<16x64xf32>
    %116 = vector.extract_strided_slice %109 {offsets = [3, 0, 0], sizes = [8, 2, 64], strides = [1, 1, 1]} : vector<12x2x64xf32> to vector<8x2x64xf32>
    %117 = vector.shape_cast %116 : vector<8x2x64xf32> to vector<16x64xf32>
    %118 = vector.extract_strided_slice %109 {offsets = [4, 0, 0], sizes = [8, 2, 64], strides = [1, 1, 1]} : vector<12x2x64xf32> to vector<8x2x64xf32>
    %119 = vector.shape_cast %118 : vector<8x2x64xf32> to vector<16x64xf32>
    %120 = tpu.concatenate %111, %113, %115, %117, %119 in 1 : vector<16x64xf32>, vector<16x64xf32>, vector<16x64xf32>, vector<16x64xf32>, vector<16x64xf32> -> vector<16x320xf32>
    %121 = arith.truncf %120 : vector<16x320xf32> to vector<16x320xbf16>
    %c0_38 = arith.constant 0 : index
    %c0_39 = arith.constant 0 : index
    %122 = vector.load %arg11[%c0_38, %c0_39] : memref<320x128xbf16, #tpu.memory_space<vmem>>, vector<320x128xbf16>
    %cst_40 = arith.constant dense<0.000000e+00> : vector<16x128xf32>
    %123 = tpu.matmul %121, %122, %cst_40 {dimension_numbers = #tpu.dot_dimension_numbers<[1], [0], [0], [1], [0, 0, 1, 1], [], []>} : vector<16x320xbf16>, vector<320x128xbf16>, vector<16x128xf32> -> vector<16x128xf32>
    %c0_41 = arith.constant 0 : index
    %c0_42 = arith.constant 0 : index
    %124 = vector.load %arg12[%c0_41, %c0_42] : memref<1x128xf32, #tpu.memory_space<vmem>>, vector<1x128xf32>
    %125 = vector.broadcast %124 : vector<1x128xf32> to vector<16x128xf32>
    %126 = arith.mulf %123, %125 : vector<16x128xf32>
    %c0_43 = arith.constant 0 : index
    %c0_44 = arith.constant 0 : index
    %127 = vector.load %arg13[%c0_43, %c0_44] : memref<1x128xf32, #tpu.memory_space<vmem>>, vector<1x128xf32>
    %128 = vector.broadcast %127 : vector<1x128xf32> to vector<16x128xf32>
    %129 = arith.addf %126, %128 : vector<16x128xf32>
    %cst_45 = arith.constant 0.000000e+00 : f32
    %130 = vector.broadcast %cst_45 : f32 to vector<16x128xf32>
    %131 = arith.maximumf %129, %130 : vector<16x128xf32>
    %132 = vector.shape_cast %131 : vector<16x128xf32> to vector<4x2x2x128xf32>
    %133 = vector.extract_strided_slice %132 {offsets = [0, 0, 0, 0], sizes = [4, 1, 2, 128], strides = [1, 1, 1, 1]} : vector<4x2x2x128xf32> to vector<4x1x2x128xf32>
    %134 = vector.shape_cast %133 : vector<4x1x2x128xf32> to vector<4x2x128xf32>
    %135 = vector.extract_strided_slice %132 {offsets = [0, 1, 0, 0], sizes = [4, 1, 2, 128], strides = [1, 1, 1, 1]} : vector<4x2x2x128xf32> to vector<4x1x2x128xf32>
    %136 = vector.shape_cast %135 : vector<4x1x2x128xf32> to vector<4x2x128xf32>
    %137 = arith.maximumf %134, %136 : vector<4x2x128xf32>
    %138 = vector.shape_cast %137 : vector<4x2x128xf32> to vector<8x128xf32>
    %139 = arith.truncf %138 : vector<8x128xf32> to vector<8x128xbf16>
    %c0_46 = arith.constant 0 : index
    %c0_47 = arith.constant 0 : index
    %140 = vector.load %arg14[%c0_46, %c0_47] : memref<128x192xbf16, #tpu.memory_space<vmem>>, vector<128x192xbf16>
    %cst_48 = arith.constant dense<0.000000e+00> : vector<8x192xf32>
    %141 = tpu.matmul %139, %140, %cst_48 {dimension_numbers = #tpu.dot_dimension_numbers<[1], [0], [0], [1], [0, 0, 1, 1], [], []>} : vector<8x128xbf16>, vector<128x192xbf16>, vector<8x192xf32> -> vector<8x192xf32>
    %c0_49 = arith.constant 0 : index
    %c0_50 = arith.constant 0 : index
    %142 = vector.load %arg15[%c0_49, %c0_50] : memref<1x192xf32, #tpu.memory_space<vmem>>, vector<1x192xf32>
    %143 = vector.broadcast %142 : vector<1x192xf32> to vector<8x192xf32>
    %144 = arith.addf %141, %143 : vector<8x192xf32>
    %145 = vector.shape_cast %144 : vector<8x192xf32> to vector<4x2x192xf32>
    %c0_51 = arith.constant 0 : index
    %c0_52 = arith.constant 0 : index
    %c0_53 = arith.constant 0 : index
    %146 = vector.load %arg35[%c0_51, %c0_52, %c0_53] : memref<4x2x192xf32, #tpu.memory_space<vmem>>, vector<4x2x192xf32>
    tpu.vector_store %arg35[%c0_51, %c0_52, %c0_53], %145 {strides = array<i32>} : memref<4x2x192xf32, #tpu.memory_space<vmem>>, vector<4x2x192xf32>,
    %c0_54 = arith.constant 0 : index
    %c0_55 = arith.constant 0 : index
    %147 = vector.load %arg16[%c0_54, %c0_55] : memref<32x96xbf16, #tpu.memory_space<vmem>>, vector<32x96xbf16>
    %c0_56 = arith.constant 0 : index
    %c0_57 = arith.constant 0 : index
    %148 = vector.load %arg18[%c0_56, %c0_57] : memref<32x96xbf16, #tpu.memory_space<vmem>>, vector<32x96xbf16>
    %c0_58 = arith.constant 0 : index
    %c0_59 = arith.constant 0 : index
    %149 = vector.load %arg17[%c0_58, %c0_59] : memref<1x96xf32, #tpu.memory_space<vmem>>, vector<1x96xf32>
    %c0_60 = arith.constant 0 : index
    %c0_61 = arith.constant 0 : index
    %150 = vector.load %arg19[%c0_60, %c0_61] : memref<1x96xf32, #tpu.memory_space<vmem>>, vector<1x96xf32>
    %cst_62 = arith.constant 0.000000e+00 : f32
    %151 = vector.broadcast %cst_62 : f32 to vector<2x32xf32>
    %c0_i32 = arith.constant 0 : i32
    %c3_i32 = arith.constant 3 : i32
    %152 = arith.subi %c3_i32, %c0_i32 : i32
    %153 = arith.index_cast %c0_i32 : i32 to index
    %c0_63 = arith.constant 0 : index
    %c0_64 = arith.constant 0 : index
    %154 = vector.load %arg35[%153, %c0_63, %c0_64] : memref<4x2x192xf32, #tpu.memory_space<vmem>>, vector<1x2x192xf32>
    %155 = vector.shape_cast %154 : vector<1x2x192xf32> to vector<2x192xf32>
    %156 = arith.index_cast %152 : i32 to index
    %c0_65 = arith.constant 0 : index
    %c0_66 = arith.constant 0 : index
    %157 = vector.load %arg35[%156, %c0_65, %c0_66] : memref<4x2x192xf32, #tpu.memory_space<vmem>>, vector<1x2x192xf32>
    %158 = vector.shape_cast %157 : vector<1x2x192xf32> to vector<2x192xf32>
    %159 = arith.truncf %151 : vector<2x32xf32> to vector<2x32xbf16>
    %cst_67 = arith.constant dense<0.000000e+00> : vector<2x96xf32>
    %160 = tpu.matmul %159, %147, %cst_67 {dimension_numbers = #tpu.dot_dimension_numbers<[1], [0], [0], [1], [0, 0, 1, 1], [], []>} : vector<2x32xbf16>, vector<32x96xbf16>, vector<2x96xf32> -> vector<2x96xf32>
    %161 = vector.broadcast %149 : vector<1x96xf32> to vector<2x96xf32>
    %162 = arith.addf %160, %161 : vector<2x96xf32>
    %163 = arith.truncf %151 : vector<2x32xf32> to vector<2x32xbf16>
    %cst_68 = arith.constant dense<0.000000e+00> : vector<2x96xf32>
    %164 = tpu.matmul %163, %148, %cst_68 {dimension_numbers = #tpu.dot_dimension_numbers<[1], [0], [0], [1], [0, 0, 1, 1], [], []>} : vector<2x32xbf16>, vector<32x96xbf16>, vector<2x96xf32> -> vector<2x96xf32>
    %165 = vector.broadcast %150 : vector<1x96xf32> to vector<2x96xf32>
    %166 = arith.addf %164, %165 : vector<2x96xf32>
    %167 = vector.extract_strided_slice %155 {offsets = [0, 0], sizes = [2, 32], strides = [1, 1]} : vector<2x192xf32> to vector<2x32xf32>
    %168 = vector.extract_strided_slice %162 {offsets = [0, 0], sizes = [2, 32], strides = [1, 1]} : vector<2x96xf32> to vector<2x32xf32>
    %169 = arith.addf %167, %168 : vector<2x32xf32>
    %170 = arith.negf %169 : vector<2x32xf32>
    %171 = math.exp %170 : vector<2x32xf32>
    %cst_69 = arith.constant 1.000000e+00 : f32
    %172 = vector.broadcast %cst_69 : f32 to vector<2x32xf32>
    %173 = arith.addf %172, %171 : vector<2x32xf32>
    %174 = arith.divf %172, %173 : vector<2x32xf32>
    %175 = vector.extract_strided_slice %155 {offsets = [0, 32], sizes = [2, 32], strides = [1, 1]} : vector<2x192xf32> to vector<2x32xf32>
    %176 = vector.extract_strided_slice %162 {offsets = [0, 32], sizes = [2, 32], strides = [1, 1]} : vector<2x96xf32> to vector<2x32xf32>
    %177 = arith.addf %175, %176 : vector<2x32xf32>
    %178 = arith.negf %177 : vector<2x32xf32>
    %179 = math.exp %178 : vector<2x32xf32>
    %cst_70 = arith.constant 1.000000e+00 : f32
    %180 = vector.broadcast %cst_70 : f32 to vector<2x32xf32>
    %181 = arith.addf %180, %179 : vector<2x32xf32>
    %182 = arith.divf %180, %181 : vector<2x32xf32>
    %183 = vector.extract_strided_slice %155 {offsets = [0, 64], sizes = [2, 32], strides = [1, 1]} : vector<2x192xf32> to vector<2x32xf32>
    %184 = vector.extract_strided_slice %162 {offsets = [0, 64], sizes = [2, 32], strides = [1, 1]} : vector<2x96xf32> to vector<2x32xf32>
    %185 = arith.mulf %174, %184 : vector<2x32xf32>
    %186 = arith.addf %183, %185 : vector<2x32xf32>
    %187 = math.tanh %186 : vector<2x32xf32>
    %cst_71 = arith.constant 1.000000e+00 : f32
    %188 = vector.broadcast %cst_71 : f32 to vector<2x32xf32>
    %189 = arith.subf %188, %182 : vector<2x32xf32>
    %190 = arith.mulf %189, %187 : vector<2x32xf32>
    %191 = arith.mulf %182, %151 : vector<2x32xf32>
    %192 = arith.addf %190, %191 : vector<2x32xf32>
    %193 = vector.extract_strided_slice %158 {offsets = [0, 96], sizes = [2, 32], strides = [1, 1]} : vector<2x192xf32> to vector<2x32xf32>
    %194 = vector.extract_strided_slice %166 {offsets = [0, 0], sizes = [2, 32], strides = [1, 1]} : vector<2x96xf32> to vector<2x32xf32>
    %195 = arith.addf %193, %194 : vector<2x32xf32>
    %196 = arith.negf %195 : vector<2x32xf32>
    %197 = math.exp %196 : vector<2x32xf32>
    %cst_72 = arith.constant 1.000000e+00 : f32
    %198 = vector.broadcast %cst_72 : f32 to vector<2x32xf32>
    %199 = arith.addf %198, %197 : vector<2x32xf32>
    %200 = arith.divf %198, %199 : vector<2x32xf32>
    %201 = vector.extract_strided_slice %158 {offsets = [0, 128], sizes = [2, 32], strides = [1, 1]} : vector<2x192xf32> to vector<2x32xf32>
    %202 = vector.extract_strided_slice %166 {offsets = [0, 32], sizes = [2, 32], strides = [1, 1]} : vector<2x96xf32> to vector<2x32xf32>
    %203 = arith.addf %201, %202 : vector<2x32xf32>
    %204 = arith.negf %203 : vector<2x32xf32>
    %205 = math.exp %204 : vector<2x32xf32>
    %cst_73 = arith.constant 1.000000e+00 : f32
    %206 = vector.broadcast %cst_73 : f32 to vector<2x32xf32>
    %207 = arith.addf %206, %205 : vector<2x32xf32>
    %208 = arith.divf %206, %207 : vector<2x32xf32>
    %209 = vector.extract_strided_slice %158 {offsets = [0, 160], sizes = [2, 32], strides = [1, 1]} : vector<2x192xf32> to vector<2x32xf32>
    %210 = vector.extract_strided_slice %166 {offsets = [0, 64], sizes = [2, 32], strides = [1, 1]} : vector<2x96xf32> to vector<2x32xf32>
    %211 = arith.mulf %200, %210 : vector<2x32xf32>
    %212 = arith.addf %209, %211 : vector<2x32xf32>
    %213 = math.tanh %212 : vector<2x32xf32>
    %cst_74 = arith.constant 1.000000e+00 : f32
    %214 = vector.broadcast %cst_74 : f32 to vector<2x32xf32>
    %215 = arith.subf %214, %208 : vector<2x32xf32>
    %216 = arith.mulf %215, %213 : vector<2x32xf32>
    %217 = arith.mulf %208, %151 : vector<2x32xf32>
    %218 = arith.addf %216, %217 : vector<2x32xf32>
    %219 = arith.index_cast %c0_i32 : i32 to index
    %c0_75 = arith.constant 0 : index
    %c0_76 = arith.constant 0 : index
    %220 = vector.load %arg36[%219, %c0_75, %c0_76] : memref<4x2x64xf32, #tpu.memory_space<vmem>>, vector<1x2x32xf32>
    %221 = vector.shape_cast %220 : vector<1x2x32xf32> to vector<2x32xf32>
    %222 = vector.shape_cast %192 : vector<2x32xf32> to vector<1x2x32xf32>
    tpu.vector_store %arg36[%219, %c0_75, %c0_76], %222 {strides = array<i32>} : memref<4x2x64xf32, #tpu.memory_space<vmem>>, vector<1x2x32xf32>,
    %223 = arith.index_cast %152 : i32 to index
    %c0_77 = arith.constant 0 : index
    %c32 = arith.constant 32 : index
    %224 = vector.load %arg36[%223, %c0_77, %c32] : memref<4x2x64xf32, #tpu.memory_space<vmem>>, vector<1x2x32xf32>
    %225 = vector.shape_cast %224 : vector<1x2x32xf32> to vector<2x32xf32>
    %226 = vector.shape_cast %218 : vector<2x32xf32> to vector<1x2x32xf32>
    tpu.vector_store %arg36[%223, %c0_77, %c32], %226 {strides = array<i32>} : memref<4x2x64xf32, #tpu.memory_space<vmem>>, vector<1x2x32xf32>,
    %c1_i32 = arith.constant 1 : i32
    %c3_i32_78 = arith.constant 3 : i32
    %227 = arith.subi %c3_i32_78, %c1_i32 : i32
    %228 = arith.index_cast %c1_i32 : i32 to index
    %c0_79 = arith.constant 0 : index
    %c0_80 = arith.constant 0 : index
    %229 = vector.load %arg35[%228, %c0_79, %c0_80] : memref<4x2x192xf32, #tpu.memory_space<vmem>>, vector<1x2x192xf32>
    %230 = vector.shape_cast %229 : vector<1x2x192xf32> to vector<2x192xf32>
    %231 = arith.index_cast %227 : i32 to index
    %c0_81 = arith.constant 0 : index
    %c0_82 = arith.constant 0 : index
    %232 = vector.load %arg35[%231, %c0_81, %c0_82] : memref<4x2x192xf32, #tpu.memory_space<vmem>>, vector<1x2x192xf32>
    %233 = vector.shape_cast %232 : vector<1x2x192xf32> to vector<2x192xf32>
    %234 = arith.truncf %192 : vector<2x32xf32> to vector<2x32xbf16>
    %cst_83 = arith.constant dense<0.000000e+00> : vector<2x96xf32>
    %235 = tpu.matmul %234, %147, %cst_83 {dimension_numbers = #tpu.dot_dimension_numbers<[1], [0], [0], [1], [0, 0, 1, 1], [], []>} : vector<2x32xbf16>, vector<32x96xbf16>, vector<2x96xf32> -> vector<2x96xf32>
    %236 = vector.broadcast %149 : vector<1x96xf32> to vector<2x96xf32>
    %237 = arith.addf %235, %236 : vector<2x96xf32>
    %238 = arith.truncf %218 : vector<2x32xf32> to vector<2x32xbf16>
    %cst_84 = arith.constant dense<0.000000e+00> : vector<2x96xf32>
    %239 = tpu.matmul %238, %148, %cst_84 {dimension_numbers = #tpu.dot_dimension_numbers<[1], [0], [0], [1], [0, 0, 1, 1], [], []>} : vector<2x32xbf16>, vector<32x96xbf16>, vector<2x96xf32> -> vector<2x96xf32>
    %240 = vector.broadcast %150 : vector<1x96xf32> to vector<2x96xf32>
    %241 = arith.addf %239, %240 : vector<2x96xf32>
    %242 = vector.extract_strided_slice %230 {offsets = [0, 0], sizes = [2, 32], strides = [1, 1]} : vector<2x192xf32> to vector<2x32xf32>
    %243 = vector.extract_strided_slice %237 {offsets = [0, 0], sizes = [2, 32], strides = [1, 1]} : vector<2x96xf32> to vector<2x32xf32>
    %244 = arith.addf %242, %243 : vector<2x32xf32>
    %245 = arith.negf %244 : vector<2x32xf32>
    %246 = math.exp %245 : vector<2x32xf32>
    %cst_85 = arith.constant 1.000000e+00 : f32
    %247 = vector.broadcast %cst_85 : f32 to vector<2x32xf32>
    %248 = arith.addf %247, %246 : vector<2x32xf32>
    %249 = arith.divf %247, %248 : vector<2x32xf32>
    %250 = vector.extract_strided_slice %230 {offsets = [0, 32], sizes = [2, 32], strides = [1, 1]} : vector<2x192xf32> to vector<2x32xf32>
    %251 = vector.extract_strided_slice %237 {offsets = [0, 32], sizes = [2, 32], strides = [1, 1]} : vector<2x96xf32> to vector<2x32xf32>
    %252 = arith.addf %250, %251 : vector<2x32xf32>
    %253 = arith.negf %252 : vector<2x32xf32>
    %254 = math.exp %253 : vector<2x32xf32>
    %cst_86 = arith.constant 1.000000e+00 : f32
    %255 = vector.broadcast %cst_86 : f32 to vector<2x32xf32>
    %256 = arith.addf %255, %254 : vector<2x32xf32>
    %257 = arith.divf %255, %256 : vector<2x32xf32>
    %258 = vector.extract_strided_slice %230 {offsets = [0, 64], sizes = [2, 32], strides = [1, 1]} : vector<2x192xf32> to vector<2x32xf32>
    %259 = vector.extract_strided_slice %237 {offsets = [0, 64], sizes = [2, 32], strides = [1, 1]} : vector<2x96xf32> to vector<2x32xf32>
    %260 = arith.mulf %249, %259 : vector<2x32xf32>
    %261 = arith.addf %258, %260 : vector<2x32xf32>
    %262 = math.tanh %261 : vector<2x32xf32>
    %cst_87 = arith.constant 1.000000e+00 : f32
    %263 = vector.broadcast %cst_87 : f32 to vector<2x32xf32>
    %264 = arith.subf %263, %257 : vector<2x32xf32>
    %265 = arith.mulf %264, %262 : vector<2x32xf32>
    %266 = arith.mulf %257, %192 : vector<2x32xf32>
    %267 = arith.addf %265, %266 : vector<2x32xf32>
    %268 = vector.extract_strided_slice %233 {offsets = [0, 96], sizes = [2, 32], strides = [1, 1]} : vector<2x192xf32> to vector<2x32xf32>
    %269 = vector.extract_strided_slice %241 {offsets = [0, 0], sizes = [2, 32], strides = [1, 1]} : vector<2x96xf32> to vector<2x32xf32>
    %270 = arith.addf %268, %269 : vector<2x32xf32>
    %271 = arith.negf %270 : vector<2x32xf32>
    %272 = math.exp %271 : vector<2x32xf32>
    %cst_88 = arith.constant 1.000000e+00 : f32
    %273 = vector.broadcast %cst_88 : f32 to vector<2x32xf32>
    %274 = arith.addf %273, %272 : vector<2x32xf32>
    %275 = arith.divf %273, %274 : vector<2x32xf32>
    %276 = vector.extract_strided_slice %233 {offsets = [0, 128], sizes = [2, 32], strides = [1, 1]} : vector<2x192xf32> to vector<2x32xf32>
    %277 = vector.extract_strided_slice %241 {offsets = [0, 32], sizes = [2, 32], strides = [1, 1]} : vector<2x96xf32> to vector<2x32xf32>
    %278 = arith.addf %276, %277 : vector<2x32xf32>
    %279 = arith.negf %278 : vector<2x32xf32>
    %280 = math.exp %279 : vector<2x32xf32>
    %cst_89 = arith.constant 1.000000e+00 : f32
    %281 = vector.broadcast %cst_89 : f32 to vector<2x32xf32>
    %282 = arith.addf %281, %280 : vector<2x32xf32>
    %283 = arith.divf %281, %282 : vector<2x32xf32>
    %284 = vector.extract_strided_slice %233 {offsets = [0, 160], sizes = [2, 32], strides = [1, 1]} : vector<2x192xf32> to vector<2x32xf32>
    %285 = vector.extract_strided_slice %241 {offsets = [0, 64], sizes = [2, 32], strides = [1, 1]} : vector<2x96xf32> to vector<2x32xf32>
    %286 = arith.mulf %275, %285 : vector<2x32xf32>
    %287 = arith.addf %284, %286 : vector<2x32xf32>
    %288 = math.tanh %287 : vector<2x32xf32>
    %cst_90 = arith.constant 1.000000e+00 : f32
    %289 = vector.broadcast %cst_90 : f32 to vector<2x32xf32>
    %290 = arith.subf %289, %283 : vector<2x32xf32>
    %291 = arith.mulf %290, %288 : vector<2x32xf32>
    %292 = arith.mulf %283, %218 : vector<2x32xf32>
    %293 = arith.addf %291, %292 : vector<2x32xf32>
    %294 = arith.index_cast %c1_i32 : i32 to index
    %c0_91 = arith.constant 0 : index
    %c0_92 = arith.constant 0 : index
    %295 = vector.load %arg36[%294, %c0_91, %c0_92] : memref<4x2x64xf32, #tpu.memory_space<vmem>>, vector<1x2x32xf32>
    %296 = vector.shape_cast %295 : vector<1x2x32xf32> to vector<2x32xf32>
    %297 = vector.shape_cast %267 : vector<2x32xf32> to vector<1x2x32xf32>
    tpu.vector_store %arg36[%294, %c0_91, %c0_92], %297 {strides = array<i32>} : memref<4x2x64xf32, #tpu.memory_space<vmem>>, vector<1x2x32xf32>,
    %298 = arith.index_cast %227 : i32 to index
    %c0_93 = arith.constant 0 : index
    %c32_94 = arith.constant 32 : index
    %299 = vector.load %arg36[%298, %c0_93, %c32_94] : memref<4x2x64xf32, #tpu.memory_space<vmem>>, vector<1x2x32xf32>
    %300 = vector.shape_cast %299 : vector<1x2x32xf32> to vector<2x32xf32>
    %301 = vector.shape_cast %293 : vector<2x32xf32> to vector<1x2x32xf32>
    tpu.vector_store %arg36[%298, %c0_93, %c32_94], %301 {strides = array<i32>} : memref<4x2x64xf32, #tpu.memory_space<vmem>>, vector<1x2x32xf32>,
    %c2_i32 = arith.constant 2 : i32
    %c3_i32_95 = arith.constant 3 : i32
    %302 = arith.subi %c3_i32_95, %c2_i32 : i32
    %303 = arith.index_cast %c2_i32 : i32 to index
    %c0_96 = arith.constant 0 : index
    %c0_97 = arith.constant 0 : index
    %304 = vector.load %arg35[%303, %c0_96, %c0_97] : memref<4x2x192xf32, #tpu.memory_space<vmem>>, vector<1x2x192xf32>
    %305 = vector.shape_cast %304 : vector<1x2x192xf32> to vector<2x192xf32>
    %306 = arith.index_cast %302 : i32 to index
    %c0_98 = arith.constant 0 : index
    %c0_99 = arith.constant 0 : index
    %307 = vector.load %arg35[%306, %c0_98, %c0_99] : memref<4x2x192xf32, #tpu.memory_space<vmem>>, vector<1x2x192xf32>
    %308 = vector.shape_cast %307 : vector<1x2x192xf32> to vector<2x192xf32>
    %309 = arith.truncf %267 : vector<2x32xf32> to vector<2x32xbf16>
    %cst_100 = arith.constant dense<0.000000e+00> : vector<2x96xf32>
    %310 = tpu.matmul %309, %147, %cst_100 {dimension_numbers = #tpu.dot_dimension_numbers<[1], [0], [0], [1], [0, 0, 1, 1], [], []>} : vector<2x32xbf16>, vector<32x96xbf16>, vector<2x96xf32> -> vector<2x96xf32>
    %311 = vector.broadcast %149 : vector<1x96xf32> to vector<2x96xf32>
    %312 = arith.addf %310, %311 : vector<2x96xf32>
    %313 = arith.truncf %293 : vector<2x32xf32> to vector<2x32xbf16>
    %cst_101 = arith.constant dense<0.000000e+00> : vector<2x96xf32>
    %314 = tpu.matmul %313, %148, %cst_101 {dimension_numbers = #tpu.dot_dimension_numbers<[1], [0], [0], [1], [0, 0, 1, 1], [], []>} : vector<2x32xbf16>, vector<32x96xbf16>, vector<2x96xf32> -> vector<2x96xf32>
    %315 = vector.broadcast %150 : vector<1x96xf32> to vector<2x96xf32>
    %316 = arith.addf %314, %315 : vector<2x96xf32>
    %317 = vector.extract_strided_slice %305 {offsets = [0, 0], sizes = [2, 32], strides = [1, 1]} : vector<2x192xf32> to vector<2x32xf32>
    %318 = vector.extract_strided_slice %312 {offsets = [0, 0], sizes = [2, 32], strides = [1, 1]} : vector<2x96xf32> to vector<2x32xf32>
    %319 = arith.addf %317, %318 : vector<2x32xf32>
    %320 = arith.negf %319 : vector<2x32xf32>
    %321 = math.exp %320 : vector<2x32xf32>
    %cst_102 = arith.constant 1.000000e+00 : f32
    %322 = vector.broadcast %cst_102 : f32 to vector<2x32xf32>
    %323 = arith.addf %322, %321 : vector<2x32xf32>
    %324 = arith.divf %322, %323 : vector<2x32xf32>
    %325 = vector.extract_strided_slice %305 {offsets = [0, 32], sizes = [2, 32], strides = [1, 1]} : vector<2x192xf32> to vector<2x32xf32>
    %326 = vector.extract_strided_slice %312 {offsets = [0, 32], sizes = [2, 32], strides = [1, 1]} : vector<2x96xf32> to vector<2x32xf32>
    %327 = arith.addf %325, %326 : vector<2x32xf32>
    %328 = arith.negf %327 : vector<2x32xf32>
    %329 = math.exp %328 : vector<2x32xf32>
    %cst_103 = arith.constant 1.000000e+00 : f32
    %330 = vector.broadcast %cst_103 : f32 to vector<2x32xf32>
    %331 = arith.addf %330, %329 : vector<2x32xf32>
    %332 = arith.divf %330, %331 : vector<2x32xf32>
    %333 = vector.extract_strided_slice %305 {offsets = [0, 64], sizes = [2, 32], strides = [1, 1]} : vector<2x192xf32> to vector<2x32xf32>
    %334 = vector.extract_strided_slice %312 {offsets = [0, 64], sizes = [2, 32], strides = [1, 1]} : vector<2x96xf32> to vector<2x32xf32>
    %335 = arith.mulf %324, %334 : vector<2x32xf32>
    %336 = arith.addf %333, %335 : vector<2x32xf32>
    %337 = math.tanh %336 : vector<2x32xf32>
    %cst_104 = arith.constant 1.000000e+00 : f32
    %338 = vector.broadcast %cst_104 : f32 to vector<2x32xf32>
    %339 = arith.subf %338, %332 : vector<2x32xf32>
    %340 = arith.mulf %339, %337 : vector<2x32xf32>
    %341 = arith.mulf %332, %267 : vector<2x32xf32>
    %342 = arith.addf %340, %341 : vector<2x32xf32>
    %343 = vector.extract_strided_slice %308 {offsets = [0, 96], sizes = [2, 32], strides = [1, 1]} : vector<2x192xf32> to vector<2x32xf32>
    %344 = vector.extract_strided_slice %316 {offsets = [0, 0], sizes = [2, 32], strides = [1, 1]} : vector<2x96xf32> to vector<2x32xf32>
    %345 = arith.addf %343, %344 : vector<2x32xf32>
    %346 = arith.negf %345 : vector<2x32xf32>
    %347 = math.exp %346 : vector<2x32xf32>
    %cst_105 = arith.constant 1.000000e+00 : f32
    %348 = vector.broadcast %cst_105 : f32 to vector<2x32xf32>
    %349 = arith.addf %348, %347 : vector<2x32xf32>
    %350 = arith.divf %348, %349 : vector<2x32xf32>
    %351 = vector.extract_strided_slice %308 {offsets = [0, 128], sizes = [2, 32], strides = [1, 1]} : vector<2x192xf32> to vector<2x32xf32>
    %352 = vector.extract_strided_slice %316 {offsets = [0, 32], sizes = [2, 32], strides = [1, 1]} : vector<2x96xf32> to vector<2x32xf32>
    %353 = arith.addf %351, %352 : vector<2x32xf32>
    %354 = arith.negf %353 : vector<2x32xf32>
    %355 = math.exp %354 : vector<2x32xf32>
    %cst_106 = arith.constant 1.000000e+00 : f32
    %356 = vector.broadcast %cst_106 : f32 to vector<2x32xf32>
    %357 = arith.addf %356, %355 : vector<2x32xf32>
    %358 = arith.divf %356, %357 : vector<2x32xf32>
    %359 = vector.extract_strided_slice %308 {offsets = [0, 160], sizes = [2, 32], strides = [1, 1]} : vector<2x192xf32> to vector<2x32xf32>
    %360 = vector.extract_strided_slice %316 {offsets = [0, 64], sizes = [2, 32], strides = [1, 1]} : vector<2x96xf32> to vector<2x32xf32>
    %361 = arith.mulf %350, %360 : vector<2x32xf32>
    %362 = arith.addf %359, %361 : vector<2x32xf32>
    %363 = math.tanh %362 : vector<2x32xf32>
    %cst_107 = arith.constant 1.000000e+00 : f32
    %364 = vector.broadcast %cst_107 : f32 to vector<2x32xf32>
    %365 = arith.subf %364, %358 : vector<2x32xf32>
    %366 = arith.mulf %365, %363 : vector<2x32xf32>
    %367 = arith.mulf %358, %293 : vector<2x32xf32>
    %368 = arith.addf %366, %367 : vector<2x32xf32>
    %369 = arith.index_cast %c2_i32 : i32 to index
    %c0_108 = arith.constant 0 : index
    %c0_109 = arith.constant 0 : index
    %370 = vector.load %arg36[%369, %c0_108, %c0_109] : memref<4x2x64xf32, #tpu.memory_space<vmem>>, vector<1x2x32xf32>
    %371 = vector.shape_cast %370 : vector<1x2x32xf32> to vector<2x32xf32>
    %372 = vector.shape_cast %342 : vector<2x32xf32> to vector<1x2x32xf32>
    tpu.vector_store %arg36[%369, %c0_108, %c0_109], %372 {strides = array<i32>} : memref<4x2x64xf32, #tpu.memory_space<vmem>>, vector<1x2x32xf32>,
    %373 = arith.index_cast %302 : i32 to index
    %c0_110 = arith.constant 0 : index
    %c32_111 = arith.constant 32 : index
    %374 = vector.load %arg36[%373, %c0_110, %c32_111] : memref<4x2x64xf32, #tpu.memory_space<vmem>>, vector<1x2x32xf32>
    %375 = vector.shape_cast %374 : vector<1x2x32xf32> to vector<2x32xf32>
    %376 = vector.shape_cast %368 : vector<2x32xf32> to vector<1x2x32xf32>
    tpu.vector_store %arg36[%373, %c0_110, %c32_111], %376 {strides = array<i32>} : memref<4x2x64xf32, #tpu.memory_space<vmem>>, vector<1x2x32xf32>,
    %c3_i32_112 = arith.constant 3 : i32
    %c3_i32_113 = arith.constant 3 : i32
    %377 = arith.subi %c3_i32_113, %c3_i32_112 : i32
    %378 = arith.index_cast %c3_i32_112 : i32 to index
    %c0_114 = arith.constant 0 : index
    %c0_115 = arith.constant 0 : index
    %379 = vector.load %arg35[%378, %c0_114, %c0_115] : memref<4x2x192xf32, #tpu.memory_space<vmem>>, vector<1x2x192xf32>
    %380 = vector.shape_cast %379 : vector<1x2x192xf32> to vector<2x192xf32>
    %381 = arith.index_cast %377 : i32 to index
    %c0_116 = arith.constant 0 : index
    %c0_117 = arith.constant 0 : index
    %382 = vector.load %arg35[%381, %c0_116, %c0_117] : memref<4x2x192xf32, #tpu.memory_space<vmem>>, vector<1x2x192xf32>
    %383 = vector.shape_cast %382 : vector<1x2x192xf32> to vector<2x192xf32>
    %384 = arith.truncf %342 : vector<2x32xf32> to vector<2x32xbf16>
    %cst_118 = arith.constant dense<0.000000e+00> : vector<2x96xf32>
    %385 = tpu.matmul %384, %147, %cst_118 {dimension_numbers = #tpu.dot_dimension_numbers<[1], [0], [0], [1], [0, 0, 1, 1], [], []>} : vector<2x32xbf16>, vector<32x96xbf16>, vector<2x96xf32> -> vector<2x96xf32>
    %386 = vector.broadcast %149 : vector<1x96xf32> to vector<2x96xf32>
    %387 = arith.addf %385, %386 : vector<2x96xf32>
    %388 = arith.truncf %368 : vector<2x32xf32> to vector<2x32xbf16>
    %cst_119 = arith.constant dense<0.000000e+00> : vector<2x96xf32>
    %389 = tpu.matmul %388, %148, %cst_119 {dimension_numbers = #tpu.dot_dimension_numbers<[1], [0], [0], [1], [0, 0, 1, 1], [], []>} : vector<2x32xbf16>, vector<32x96xbf16>, vector<2x96xf32> -> vector<2x96xf32>
    %390 = vector.broadcast %150 : vector<1x96xf32> to vector<2x96xf32>
    %391 = arith.addf %389, %390 : vector<2x96xf32>
    %392 = vector.extract_strided_slice %380 {offsets = [0, 0], sizes = [2, 32], strides = [1, 1]} : vector<2x192xf32> to vector<2x32xf32>
    %393 = vector.extract_strided_slice %387 {offsets = [0, 0], sizes = [2, 32], strides = [1, 1]} : vector<2x96xf32> to vector<2x32xf32>
    %394 = arith.addf %392, %393 : vector<2x32xf32>
    %395 = arith.negf %394 : vector<2x32xf32>
    %396 = math.exp %395 : vector<2x32xf32>
    %cst_120 = arith.constant 1.000000e+00 : f32
    %397 = vector.broadcast %cst_120 : f32 to vector<2x32xf32>
    %398 = arith.addf %397, %396 : vector<2x32xf32>
    %399 = arith.divf %397, %398 : vector<2x32xf32>
    %400 = vector.extract_strided_slice %380 {offsets = [0, 32], sizes = [2, 32], strides = [1, 1]} : vector<2x192xf32> to vector<2x32xf32>
    %401 = vector.extract_strided_slice %387 {offsets = [0, 32], sizes = [2, 32], strides = [1, 1]} : vector<2x96xf32> to vector<2x32xf32>
    %402 = arith.addf %400, %401 : vector<2x32xf32>
    %403 = arith.negf %402 : vector<2x32xf32>
    %404 = math.exp %403 : vector<2x32xf32>
    %cst_121 = arith.constant 1.000000e+00 : f32
    %405 = vector.broadcast %cst_121 : f32 to vector<2x32xf32>
    %406 = arith.addf %405, %404 : vector<2x32xf32>
    %407 = arith.divf %405, %406 : vector<2x32xf32>
    %408 = vector.extract_strided_slice %380 {offsets = [0, 64], sizes = [2, 32], strides = [1, 1]} : vector<2x192xf32> to vector<2x32xf32>
    %409 = vector.extract_strided_slice %387 {offsets = [0, 64], sizes = [2, 32], strides = [1, 1]} : vector<2x96xf32> to vector<2x32xf32>
    %410 = arith.mulf %399, %409 : vector<2x32xf32>
    %411 = arith.addf %408, %410 : vector<2x32xf32>
    %412 = math.tanh %411 : vector<2x32xf32>
    %cst_122 = arith.constant 1.000000e+00 : f32
    %413 = vector.broadcast %cst_122 : f32 to vector<2x32xf32>
    %414 = arith.subf %413, %407 : vector<2x32xf32>
    %415 = arith.mulf %414, %412 : vector<2x32xf32>
    %416 = arith.mulf %407, %342 : vector<2x32xf32>
    %417 = arith.addf %415, %416 : vector<2x32xf32>
    %418 = vector.extract_strided_slice %383 {offsets = [0, 96], sizes = [2, 32], strides = [1, 1]} : vector<2x192xf32> to vector<2x32xf32>
    %419 = vector.extract_strided_slice %391 {offsets = [0, 0], sizes = [2, 32], strides = [1, 1]} : vector<2x96xf32> to vector<2x32xf32>
    %420 = arith.addf %418, %419 : vector<2x32xf32>
    %421 = arith.negf %420 : vector<2x32xf32>
    %422 = math.exp %421 : vector<2x32xf32>
    %cst_123 = arith.constant 1.000000e+00 : f32
    %423 = vector.broadcast %cst_123 : f32 to vector<2x32xf32>
    %424 = arith.addf %423, %422 : vector<2x32xf32>
    %425 = arith.divf %423, %424 : vector<2x32xf32>
    %426 = vector.extract_strided_slice %383 {offsets = [0, 128], sizes = [2, 32], strides = [1, 1]} : vector<2x192xf32> to vector<2x32xf32>
    %427 = vector.extract_strided_slice %391 {offsets = [0, 32], sizes = [2, 32], strides = [1, 1]} : vector<2x96xf32> to vector<2x32xf32>
    %428 = arith.addf %426, %427 : vector<2x32xf32>
    %429 = arith.negf %428 : vector<2x32xf32>
    %430 = math.exp %429 : vector<2x32xf32>
    %cst_124 = arith.constant 1.000000e+00 : f32
    %431 = vector.broadcast %cst_124 : f32 to vector<2x32xf32>
    %432 = arith.addf %431, %430 : vector<2x32xf32>
    %433 = arith.divf %431, %432 : vector<2x32xf32>
    %434 = vector.extract_strided_slice %383 {offsets = [0, 160], sizes = [2, 32], strides = [1, 1]} : vector<2x192xf32> to vector<2x32xf32>
    %435 = vector.extract_strided_slice %391 {offsets = [0, 64], sizes = [2, 32], strides = [1, 1]} : vector<2x96xf32> to vector<2x32xf32>
    %436 = arith.mulf %425, %435 : vector<2x32xf32>
    %437 = arith.addf %434, %436 : vector<2x32xf32>
    %438 = math.tanh %437 : vector<2x32xf32>
    %cst_125 = arith.constant 1.000000e+00 : f32
    %439 = vector.broadcast %cst_125 : f32 to vector<2x32xf32>
    %440 = arith.subf %439, %433 : vector<2x32xf32>
    %441 = arith.mulf %440, %438 : vector<2x32xf32>
    %442 = arith.mulf %433, %368 : vector<2x32xf32>
    %443 = arith.addf %441, %442 : vector<2x32xf32>
    %444 = arith.index_cast %c3_i32_112 : i32 to index
    %c0_126 = arith.constant 0 : index
    %c0_127 = arith.constant 0 : index
    %445 = vector.load %arg36[%444, %c0_126, %c0_127] : memref<4x2x64xf32, #tpu.memory_space<vmem>>, vector<1x2x32xf32>
    %446 = vector.shape_cast %445 : vector<1x2x32xf32> to vector<2x32xf32>
    %447 = vector.shape_cast %417 : vector<2x32xf32> to vector<1x2x32xf32>
    tpu.vector_store %arg36[%444, %c0_126, %c0_127], %447 {strides = array<i32>} : memref<4x2x64xf32, #tpu.memory_space<vmem>>, vector<1x2x32xf32>,
    %448 = arith.index_cast %377 : i32 to index
    %c0_128 = arith.constant 0 : index
    %c32_129 = arith.constant 32 : index
    %449 = vector.load %arg36[%448, %c0_128, %c32_129] : memref<4x2x64xf32, #tpu.memory_space<vmem>>, vector<1x2x32xf32>
    %450 = vector.shape_cast %449 : vector<1x2x32xf32> to vector<2x32xf32>
    %451 = vector.shape_cast %443 : vector<2x32xf32> to vector<1x2x32xf32>
    tpu.vector_store %arg36[%448, %c0_128, %c32_129], %451 {strides = array<i32>} : memref<4x2x64xf32, #tpu.memory_space<vmem>>, vector<1x2x32xf32>,
    %c4_i32 = arith.constant 4 : i32
    %c0_130 = arith.constant 0 : index
    %c0_131 = arith.constant 0 : index
    %c0_132 = arith.constant 0 : index
    %452 = vector.load %arg36[%c0_130, %c0_131, %c0_132] : memref<4x2x64xf32, #tpu.memory_space<vmem>>, vector<4x2x64xf32>
    %453 = vector.shape_cast %452 : vector<4x2x64xf32> to vector<8x64xf32>
    %454 = arith.truncf %453 : vector<8x64xf32> to vector<8x64xbf16>
    %c0_133 = arith.constant 0 : index
    %c0_134 = arith.constant 0 : index
    %455 = vector.load %arg20[%c0_133, %c0_134] : memref<64x64xbf16, #tpu.memory_space<vmem>>, vector<64x64xbf16>
    %cst_135 = arith.constant dense<0.000000e+00> : vector<8x64xf32>
    %456 = tpu.matmul %454, %455, %cst_135 {dimension_numbers = #tpu.dot_dimension_numbers<[1], [0], [0], [1], [0, 0, 1, 1], [], []>} : vector<8x64xbf16>, vector<64x64xbf16>, vector<8x64xf32> -> vector<8x64xf32>
    %c0_136 = arith.constant 0 : index
    %c0_137 = arith.constant 0 : index
    %457 = vector.load %arg21[%c0_136, %c0_137] : memref<1x64xf32, #tpu.memory_space<vmem>>, vector<1x64xf32>
    %458 = vector.broadcast %457 : vector<1x64xf32> to vector<8x64xf32>
    %459 = arith.addf %456, %458 : vector<8x64xf32>
    %460 = math.tanh %459 : vector<8x64xf32>
    %c0_138 = arith.constant 0 : index
    %c0_139 = arith.constant 0 : index
    %461 = vector.load %arg22[%c0_138, %c0_139] : memref<1x64xf32, #tpu.memory_space<vmem>>, vector<1x64xf32>
    %462 = vector.broadcast %461 : vector<1x64xf32> to vector<8x64xf32>
    %463 = arith.mulf %460, %462 : vector<8x64xf32>
    %cst_140 = arith.constant dense<0.000000e+00> : vector<8xf32>
    %464 = vector.multi_reduction <add>, %463, %cst_140 [1] : vector<8x64xf32> to vector<8xf32>
    %465 = vector.shape_cast %464 : vector<8xf32> to vector<8x1xf32>
    %466 = vector.shape_cast %465 : vector<8x1xf32> to vector<4x2x1xf32>
    %cst_141 = arith.constant dense<0xFF800000> : vector<2x1xf32>
    %467 = vector.multi_reduction <maximumf>, %466, %cst_141 [0] : vector<4x2x1xf32> to vector<2x1xf32>
    %468 = vector.shape_cast %467 : vector<2x1xf32> to vector<1x2x1xf32>
    %469 = vector.broadcast %468 : vector<1x2x1xf32> to vector<4x2x1xf32>
    %470 = arith.subf %466, %469 : vector<4x2x1xf32>
    %471 = math.exp %470 : vector<4x2x1xf32>
    %cst_142 = arith.constant dense<0.000000e+00> : vector<2x1xf32>
    %472 = vector.multi_reduction <add>, %471, %cst_142 [0] : vector<4x2x1xf32> to vector<2x1xf32>
    %473 = vector.shape_cast %472 : vector<2x1xf32> to vector<1x2x1xf32>
    %474 = vector.broadcast %473 : vector<1x2x1xf32> to vector<4x2x1xf32>
    %475 = arith.divf %471, %474 : vector<4x2x1xf32>
    %476 = vector.broadcast %475 : vector<4x2x1xf32> to vector<4x2x64xf32>
    %477 = arith.mulf %476, %452 : vector<4x2x64xf32>
    %cst_143 = arith.constant dense<0.000000e+00> : vector<2x64xf32>
    %478 = vector.multi_reduction <add>, %477, %cst_143 [0] : vector<4x2x64xf32> to vector<2x64xf32>
    %479 = arith.truncf %478 : vector<2x64xf32> to vector<2x64xbf16>
    %c0_144 = arith.constant 0 : index
    %c0_145 = arith.constant 0 : index
    %480 = vector.load %arg23[%c0_144, %c0_145] : memref<64x256xbf16, #tpu.memory_space<vmem>>, vector<64x256xbf16>
    %cst_146 = arith.constant dense<0.000000e+00> : vector<2x256xf32>
    %481 = tpu.matmul %479, %480, %cst_146 {dimension_numbers = #tpu.dot_dimension_numbers<[1], [0], [0], [1], [0, 0, 1, 1], [], []>} : vector<2x64xbf16>, vector<64x256xbf16>, vector<2x256xf32> -> vector<2x256xf32>
    %c0_147 = arith.constant 0 : index
    %c0_148 = arith.constant 0 : index
    %482 = vector.load %arg24[%c0_147, %c0_148] : memref<1x256xf32, #tpu.memory_space<vmem>>, vector<1x256xf32>
    %483 = vector.broadcast %482 : vector<1x256xf32> to vector<2x256xf32>
    %484 = arith.mulf %481, %483 : vector<2x256xf32>
    %c0_149 = arith.constant 0 : index
    %c0_150 = arith.constant 0 : index
    %485 = vector.load %arg25[%c0_149, %c0_150] : memref<1x256xf32, #tpu.memory_space<vmem>>, vector<1x256xf32>
    %486 = vector.broadcast %485 : vector<1x256xf32> to vector<2x256xf32>
    %487 = arith.addf %484, %486 : vector<2x256xf32>
    %cst_151 = arith.constant 0.000000e+00 : f32
    %488 = vector.broadcast %cst_151 : f32 to vector<2x256xf32>
    %489 = arith.maximumf %487, %488 : vector<2x256xf32>
    %490 = arith.truncf %489 : vector<2x256xf32> to vector<2x256xbf16>
    %c0_152 = arith.constant 0 : index
    %c0_153 = arith.constant 0 : index
    %491 = vector.load %arg26[%c0_152, %c0_153] : memref<256x128xbf16, #tpu.memory_space<vmem>>, vector<256x128xbf16>
    %cst_154 = arith.constant dense<0.000000e+00> : vector<2x128xf32>
    %492 = tpu.matmul %490, %491, %cst_154 {dimension_numbers = #tpu.dot_dimension_numbers<[1], [0], [0], [1], [0, 0, 1, 1], [], []>} : vector<2x256xbf16>, vector<256x128xbf16>, vector<2x128xf32> -> vector<2x128xf32>
    %c0_155 = arith.constant 0 : index
    %c0_156 = arith.constant 0 : index
    %493 = vector.load %arg27[%c0_155, %c0_156] : memref<1x128xf32, #tpu.memory_space<vmem>>, vector<1x128xf32>
    %494 = vector.broadcast %493 : vector<1x128xf32> to vector<2x128xf32>
    %495 = arith.mulf %492, %494 : vector<2x128xf32>
    %c0_157 = arith.constant 0 : index
    %c0_158 = arith.constant 0 : index
    %496 = vector.load %arg28[%c0_157, %c0_158] : memref<1x128xf32, #tpu.memory_space<vmem>>, vector<1x128xf32>
    %497 = vector.broadcast %496 : vector<1x128xf32> to vector<2x128xf32>
    %498 = arith.addf %495, %497 : vector<2x128xf32>
    %cst_159 = arith.constant 0.000000e+00 : f32
    %499 = vector.broadcast %cst_159 : f32 to vector<2x128xf32>
    %500 = arith.maximumf %498, %499 : vector<2x128xf32>
    %501 = arith.truncf %500 : vector<2x128xf32> to vector<2x128xbf16>
    %c0_160 = arith.constant 0 : index
    %c0_161 = arith.constant 0 : index
    %502 = vector.load %arg29[%c0_160, %c0_161] : memref<128x64xbf16, #tpu.memory_space<vmem>>, vector<128x64xbf16>
    %cst_162 = arith.constant dense<0.000000e+00> : vector<2x64xf32>
    %503 = tpu.matmul %501, %502, %cst_162 {dimension_numbers = #tpu.dot_dimension_numbers<[1], [0], [0], [1], [0, 0, 1, 1], [], []>} : vector<2x128xbf16>, vector<128x64xbf16>, vector<2x64xf32> -> vector<2x64xf32>
    %c0_163 = arith.constant 0 : index
    %c0_164 = arith.constant 0 : index
    %504 = vector.load %arg30[%c0_163, %c0_164] : memref<1x64xf32, #tpu.memory_space<vmem>>, vector<1x64xf32>
    %505 = vector.broadcast %504 : vector<1x64xf32> to vector<2x64xf32>
    %506 = arith.mulf %503, %505 : vector<2x64xf32>
    %c0_165 = arith.constant 0 : index
    %c0_166 = arith.constant 0 : index
    %507 = vector.load %arg31[%c0_165, %c0_166] : memref<1x64xf32, #tpu.memory_space<vmem>>, vector<1x64xf32>
    %508 = vector.broadcast %507 : vector<1x64xf32> to vector<2x64xf32>
    %509 = arith.addf %506, %508 : vector<2x64xf32>
    %cst_167 = arith.constant 0.000000e+00 : f32
    %510 = vector.broadcast %cst_167 : f32 to vector<2x64xf32>
    %511 = arith.maximumf %509, %510 : vector<2x64xf32>
    %512 = arith.truncf %511 : vector<2x64xf32> to vector<2x64xbf16>
    %c0_168 = arith.constant 0 : index
    %c0_169 = arith.constant 0 : index
    %513 = vector.load %arg32[%c0_168, %c0_169] : memref<64x2xbf16, #tpu.memory_space<vmem>>, vector<64x2xbf16>
    %cst_170 = arith.constant dense<0.000000e+00> : vector<2x2xf32>
    %514 = tpu.matmul %512, %513, %cst_170 {dimension_numbers = #tpu.dot_dimension_numbers<[1], [0], [0], [1], [0, 0, 1, 1], [], []>} : vector<2x64xbf16>, vector<64x2xbf16>, vector<2x2xf32> -> vector<2x2xf32>
    %c0_171 = arith.constant 0 : index
    %c0_172 = arith.constant 0 : index
    %515 = vector.load %arg33[%c0_171, %c0_172] : memref<1x2xf32, #tpu.memory_space<vmem>>, vector<1x2xf32>
    %516 = vector.broadcast %515 : vector<1x2xf32> to vector<2x2xf32>
    %517 = arith.addf %514, %516 : vector<2x2xf32>
    %c0_173 = arith.constant 0 : index
    %c0_174 = arith.constant 0 : index
    %518 = vector.load %arg34[%c0_173, %c0_174] : memref<2x2xf32, #tpu.memory_space<vmem>>, vector<2x2xf32>
    tpu.vector_store %arg34[%c0_173, %c0_174], %517 {strides = array<i32>} : memref<2x2xf32, #tpu.memory_space<vmem>>, vector<2x2xf32>,
    return
  }
  func.func @transform_0(%arg0: i32) -> (i32, i32, i32) {
    %c0_i32 = arith.constant 0 : i32
    %c0_i32_0 = arith.constant 0 : i32
    %c0_i32_1 = arith.constant 0 : i32
    return %c0_i32, %arg0, %c0_i32_0 : i32, i32, i32
  }
  func.func @transform_1(%arg0: i32) -> (i32, i32) {
    %c0_i32 = arith.constant 0 : i32
    %c0_i32_0 = arith.constant 0 : i32
    %c0_i32_1 = arith.constant 0 : i32
    return %c0_i32, %c0_i32_0 : i32, i32
  }
  func.func @transform_2(%arg0: i32) -> (i32, i32) {
    %c0_i32 = arith.constant 0 : i32
    %c0_i32_0 = arith.constant 0 : i32
    %c0_i32_1 = arith.constant 0 : i32
    return %c0_i32, %c0_i32_0 : i32, i32
  }
  func.func @transform_3(%arg0: i32) -> (i32, i32) {
    %c0_i32 = arith.constant 0 : i32
    %c0_i32_0 = arith.constant 0 : i32
    %c0_i32_1 = arith.constant 0 : i32
    return %c0_i32, %c0_i32_0 : i32, i32
  }
  func.func @transform_4(%arg0: i32) -> (i32, i32) {
    %c0_i32 = arith.constant 0 : i32
    %c0_i32_0 = arith.constant 0 : i32
    %c0_i32_1 = arith.constant 0 : i32
    return %c0_i32, %c0_i32_0 : i32, i32
  }
  func.func @transform_5(%arg0: i32) -> (i32, i32) {
    %c0_i32 = arith.constant 0 : i32
    %c0_i32_0 = arith.constant 0 : i32
    %c0_i32_1 = arith.constant 0 : i32
    return %c0_i32, %c0_i32_0 : i32, i32
  }
  func.func @transform_6(%arg0: i32) -> (i32, i32) {
    %c0_i32 = arith.constant 0 : i32
    %c0_i32_0 = arith.constant 0 : i32
    %c0_i32_1 = arith.constant 0 : i32
    return %c0_i32, %c0_i32_0 : i32, i32
  }
  func.func @transform_7(%arg0: i32) -> (i32, i32) {
    %c0_i32 = arith.constant 0 : i32
    %c0_i32_0 = arith.constant 0 : i32
    %c0_i32_1 = arith.constant 0 : i32
    return %c0_i32, %c0_i32_0 : i32, i32
  }
  func.func @transform_8(%arg0: i32) -> (i32, i32) {
    %c0_i32 = arith.constant 0 : i32
    %c0_i32_0 = arith.constant 0 : i32
    %c0_i32_1 = arith.constant 0 : i32
    return %c0_i32, %c0_i32_0 : i32, i32
  }
  func.func @transform_9(%arg0: i32) -> (i32, i32) {
    %c0_i32 = arith.constant 0 : i32
    %c0_i32_0 = arith.constant 0 : i32
    %c0_i32_1 = arith.constant 0 : i32
    return %c0_i32, %c0_i32_0 : i32, i32
  }
  func.func @transform_10(%arg0: i32) -> (i32, i32) {
    %c0_i32 = arith.constant 0 : i32
    %c0_i32_0 = arith.constant 0 : i32
    %c0_i32_1 = arith.constant 0 : i32
    return %c0_i32, %c0_i32_0 : i32, i32
  }
  func.func @transform_11(%arg0: i32) -> (i32, i32) {
    %c0_i32 = arith.constant 0 : i32
    %c0_i32_0 = arith.constant 0 : i32
    %c0_i32_1 = arith.constant 0 : i32
    return %c0_i32, %c0_i32_0 : i32, i32
  }
  func.func @transform_12(%arg0: i32) -> (i32, i32) {
    %c0_i32 = arith.constant 0 : i32
    %c0_i32_0 = arith.constant 0 : i32
    %c0_i32_1 = arith.constant 0 : i32
    return %c0_i32, %c0_i32_0 : i32, i32
  }
  func.func @transform_13(%arg0: i32) -> (i32, i32) {
    %c0_i32 = arith.constant 0 : i32
    %c0_i32_0 = arith.constant 0 : i32
    %c0_i32_1 = arith.constant 0 : i32
    return %c0_i32, %c0_i32_0 : i32, i32
  }
  func.func @transform_14(%arg0: i32) -> (i32, i32) {
    %c0_i32 = arith.constant 0 : i32
    %c0_i32_0 = arith.constant 0 : i32
    %c0_i32_1 = arith.constant 0 : i32
    return %c0_i32, %c0_i32_0 : i32, i32
  }
  func.func @transform_15(%arg0: i32) -> (i32, i32) {
    %c0_i32 = arith.constant 0 : i32
    %c0_i32_0 = arith.constant 0 : i32
    %c0_i32_1 = arith.constant 0 : i32
    return %c0_i32, %c0_i32_0 : i32, i32
  }
  func.func @transform_16(%arg0: i32) -> (i32, i32) {
    %c0_i32 = arith.constant 0 : i32
    %c0_i32_0 = arith.constant 0 : i32
    %c0_i32_1 = arith.constant 0 : i32
    return %c0_i32, %c0_i32_0 : i32, i32
  }
  func.func @transform_17(%arg0: i32) -> (i32, i32) {
    %c0_i32 = arith.constant 0 : i32
    %c0_i32_0 = arith.constant 0 : i32
    %c0_i32_1 = arith.constant 0 : i32
    return %c0_i32, %c0_i32_0 : i32, i32
  }
  func.func @transform_18(%arg0: i32) -> (i32, i32) {
    %c0_i32 = arith.constant 0 : i32
    %c0_i32_0 = arith.constant 0 : i32
    %c0_i32_1 = arith.constant 0 : i32
    return %c0_i32, %c0_i32_0 : i32, i32
  }
  func.func @transform_19(%arg0: i32) -> (i32, i32) {
    %c0_i32 = arith.constant 0 : i32
    %c0_i32_0 = arith.constant 0 : i32
    %c0_i32_1 = arith.constant 0 : i32
    return %c0_i32, %c0_i32_0 : i32, i32
  }
  func.func @transform_20(%arg0: i32) -> (i32, i32) {
    %c0_i32 = arith.constant 0 : i32
    %c0_i32_0 = arith.constant 0 : i32
    %c0_i32_1 = arith.constant 0 : i32
    return %c0_i32, %c0_i32_0 : i32, i32
  }
  func.func @transform_21(%arg0: i32) -> (i32, i32) {
    %c0_i32 = arith.constant 0 : i32
    %c0_i32_0 = arith.constant 0 : i32
    %c0_i32_1 = arith.constant 0 : i32
    return %c0_i32, %c0_i32_0 : i32, i32
  }
  func.func @transform_22(%arg0: i32) -> (i32, i32) {
    %c0_i32 = arith.constant 0 : i32
    %c0_i32_0 = arith.constant 0 : i32
    %c0_i32_1 = arith.constant 0 : i32
    return %c0_i32, %c0_i32_0 : i32, i32
  }
  func.func @transform_23(%arg0: i32) -> (i32, i32) {
    %c0_i32 = arith.constant 0 : i32
    %c0_i32_0 = arith.constant 0 : i32
    %c0_i32_1 = arith.constant 0 : i32
    return %c0_i32, %c0_i32_0 : i32, i32
  }
  func.func @transform_24(%arg0: i32) -> (i32, i32) {
    %c0_i32 = arith.constant 0 : i32
    %c0_i32_0 = arith.constant 0 : i32
    %c0_i32_1 = arith.constant 0 : i32
    return %c0_i32, %c0_i32_0 : i32, i32
  }
  func.func @transform_25(%arg0: i32) -> (i32, i32) {
    %c0_i32 = arith.constant 0 : i32
    %c0_i32_0 = arith.constant 0 : i32
    %c0_i32_1 = arith.constant 0 : i32
    return %c0_i32, %c0_i32_0 : i32, i32
  }
  func.func @transform_26(%arg0: i32) -> (i32, i32) {
    %c0_i32 = arith.constant 0 : i32
    %c0_i32_0 = arith.constant 0 : i32
    %c0_i32_1 = arith.constant 0 : i32
    return %c0_i32, %c0_i32_0 : i32, i32
  }
  func.func @transform_27(%arg0: i32) -> (i32, i32) {
    %c0_i32 = arith.constant 0 : i32
    %c0_i32_0 = arith.constant 0 : i32
    %c0_i32_1 = arith.constant 0 : i32
    return %c0_i32, %c0_i32_0 : i32, i32
  }
  func.func @transform_28(%arg0: i32) -> (i32, i32) {
    %c0_i32 = arith.constant 0 : i32
    %c0_i32_0 = arith.constant 0 : i32
    %c0_i32_1 = arith.constant 0 : i32
    return %c0_i32, %c0_i32_0 : i32, i32
  }
  func.func @transform_29(%arg0: i32) -> (i32, i32) {
    %c0_i32 = arith.constant 0 : i32
    %c0_i32_0 = arith.constant 0 : i32
    %c0_i32_1 = arith.constant 0 : i32
    return %c0_i32, %c0_i32_0 : i32, i32
  }
  func.func @transform_30(%arg0: i32) -> (i32, i32) {
    %c0_i32 = arith.constant 0 : i32
    %c0_i32_0 = arith.constant 0 : i32
    %c0_i32_1 = arith.constant 0 : i32
    return %c0_i32, %c0_i32_0 : i32, i32
  }
  func.func @transform_31(%arg0: i32) -> (i32, i32) {
    %c0_i32 = arith.constant 0 : i32
    %c0_i32_0 = arith.constant 0 : i32
    %c0_i32_1 = arith.constant 0 : i32
    return %c0_i32, %c0_i32_0 : i32, i32
  }
  func.func @transform_32(%arg0: i32) -> (i32, i32) {
    %c0_i32 = arith.constant 0 : i32
    %c0_i32_0 = arith.constant 0 : i32
    %c0_i32_1 = arith.constant 0 : i32
    return %c0_i32, %c0_i32_0 : i32, i32
  }
  func.func @transform_33(%arg0: i32) -> (i32, i32) {
    %c0_i32 = arith.constant 0 : i32
    %c0_i32_0 = arith.constant 0 : i32
    return %arg0, %c0_i32 : i32, i32
  }
}

</mosaic_0001>

<bundles_post_ra>
// kernel: deep_pulse_detector.1
= control target key start
LH: loop header
LB: loop body
LE: loop exit
PB: predicated region body
PF: predicated region fallthrough
CT: control target
= control target key end

     0   :  { %s5167_s6 = smov 1   ;;  %s5168_s10 = smov 2   ;;  %s6962_s0 = inlined_call_operand.smem [shape: u32[34], index: -1, kind: input, shape index: {}] }
   0x1   :  { %s5218_s5 = sld [smem:[%s6962_s0]]   ;;  %s5169_s14 = smov 3  }
   0x2   :  { %s5223_s9 = sld [smem:[%s6962_s0 + %s5167_s6]]   ;;  %s5170_s18 = smov 4  }
   0x3   :  { %s5228_s13 = sld [smem:[%s6962_s0 + %s5168_s10]]   ;;  %s5171_s22 = smov 5  }
   0x4   :  { %s5233_s17 = sld [smem:[%s6962_s0 + %s5169_s14]]   ;;  %s5172_s26 = smov 6  }
   0x5   :  { %s5238_s21 = sld [smem:[%s6962_s0 + %s5170_s18]]   ;;  %s5173_s30 = smov 7  }
   0x6   :  { %s5243_s25 = sld [smem:[%s6962_s0 + %s5171_s22]]   ;;  %s5174_s4 = smov 8  }
   0x7   :  { %s5248_s29 = sld [smem:[%s6962_s0 + %s5172_s26]]   ;;  %s5175_s10 = smov 9  }
   0x8   :  { %s5253_s3 = sld [smem:[%s6962_s0 + %s5173_s30]]   ;;  %s5176_s15 = smov 10  }
   0x9   :  { %s5258_s8 = sld [smem:[%s6962_s0 + %s5174_s4]]   ;;  %s5177_s20 = smov 11  }
   0xa   :  { %s5263_s14 = sld [smem:[%s6962_s0 + %s5175_s10]]   ;;  %s5178_s26 = smov 12  }
   0xb   :  { %s5268_s19 = sld [smem:[%s6962_s0 + %s5176_s15]]   ;;  %s5179_s1 = smov 13  }
   0xc   :  { %s5273_s24 = sld [smem:[%s6962_s0 + %s5177_s20]]   ;;  %s5180_s7 = smov 14  }
   0xd   :  { %s5278_s30 = sld [smem:[%s6962_s0 + %s5178_s26]]   ;;  %s5181_s15 = smov 15  }
   0xe   :  { %s5283_s6 = sld [smem:[%s6962_s0 + %s5179_s1]]   ;;  %s5182_s22 = smov 16  }
   0xf   :  { %s5288_s12 = sld [smem:[%s6962_s0 + %s5180_s7]]   ;;  %s5183_s28 = smov 17  }
  0x10   :  { %s5293_s20 = sld [smem:[%s6962_s0 + %s5181_s15]]   ;;  %s5184_s7 = smov 18  }
  0x11   :  { %s5298_s27 = sld [smem:[%s6962_s0 + %s5182_s22]]   ;;  %s5185_s15 = smov 19  }
  0x12   :  { %s5303_s4 = sld [smem:[%s6962_s0 + %s5183_s28]]   ;;  %s5186_s22 = smov 20  }
  0x13   :  { %7016 = sst [smem:[#allocation7_spill]] %s5278_s30  ;;  %s5187_s28 = smov 21  }
  0x14   :  { %s5313_s30 = sld [smem:[%s6962_s0 + %s5185_s15]]   ;;  %s5189_s15 = smov 23  }
  0x15   :  { %7017 = sst [smem:[#allocation8_spill]] %s5288_s12 }
  0x16   :  { %s5308_s12 = sld [smem:[%s6962_s0 + %s5184_s7]]   ;;  %s5188_s7 = smov 22  }
  0x17   :  { %7018 = sst [smem:[#allocation9_spill]] %s5298_s27 }
  0x18   :  { %7019 = sst [smem:[#allocation10_spill]] %s5303_s4 }
  0x19   :  { %s5318_s27 = sld [smem:[%s6962_s0 + %s5186_s22]]   ;;  %s5190_s22 = smov 24  }
  0x1a   :  { %7021 = sst [smem:[#allocation12_spill]] %s5313_s30 }
  0x1b   :  { %s5323_s4 = sld [smem:[%s6962_s0 + %s5187_s28]]   ;;  %s5191_s28 = smov 25  }
  0x1c   :  { %7020 = sst [smem:[#allocation11_spill]] %s5308_s12 }
  0x1d   :  { %s5328_s12 = sld [smem:[%s6962_s0 + %s5188_s7]]   ;;  %s5192_s7 = smov 26  }
  0x1e   :  { %s5333_s30 = sld [smem:[%s6962_s0 + %s5189_s15]]   ;;  %s5193_s15 = smov 27  }
  0x1f   :  { %7022 = sst [smem:[#allocation13_spill]] %s5318_s27 }
  0x20   :  { %s5338_s27 = sld [smem:[%s6962_s0 + %s5190_s22]]   ;;  %s5194_s22 = smov 28  }
  0x21   :  { %7023 = sst [smem:[#allocation14_spill]] %s5323_s4 }
  0x22   :  { %s5343_s4 = sld [smem:[%s6962_s0 + %s5191_s28]]   ;;  %s5195_s28 = smov 29  }
  0x23   :  { %7024 = sst [smem:[#allocation15_spill]] %s5328_s12 }
  0x24   :  { %7025 = sst [smem:[#allocation16_spill]] %s5333_s30 }
  0x25   :  { %s5348_s12 = sld [smem:[%s6962_s0 + %s5192_s7]]   ;;  %s5196_s7 = smov 30  }
  0x26   :  { %7026 = sst [smem:[#allocation17_spill]] %s5338_s27 }
  0x27   :  { %s5353_s30 = sld [smem:[%s6962_s0 + %s5193_s15]]   ;;  %s5197_s15 = smov 31  }
  0x28   :  { %7027 = sst [smem:[#allocation18_spill]] %s5343_s4 }
  0x29   :  { %s5358_s27 = sld [smem:[%s6962_s0 + %s5194_s22]]   ;;  %s5198_s22 = smov 32  }
  0x2a   :  { %s5363_s4 = sld [smem:[%s6962_s0 + %s5195_s28]]   ;;  %s5199_s28 = smov 33  }
  0x2b   :  { %7028 = sst [smem:[#allocation19_spill]] %s5348_s12 }
  0x2c   :  { %s5368_s12 = sld [smem:[%s6962_s0 + %s5196_s7]]  }
  0x2d   :  { %7029 = sst [smem:[#allocation20_spill]] %s5353_s30 }
  0x2e   :  { %s5373_s30 = sld [smem:[%s6962_s0 + %s5197_s15]]  }
  0x2f   :  { %7030 = sst [smem:[#allocation21_spill]] %s5358_s27 }
  0x30   :  { %7031 = sst [smem:[#allocation22_spill]] %s5363_s4 }
  0x31   :  { %s5378_s27 = sld [smem:[%s6962_s0 + %s5198_s22]]  }
  0x32   :  { %s5383_s4 = sld [smem:[%s6962_s0 + %s5199_s28]]  }
  0x33   :  { %v491_v0 = vld [vmem:[%s5223_s9] sm:$0xc]  ;;  %vm521_vm0 = vcmask 1041408   ;;  %v378_v1 = vld [vmem:[%s5223_s9] sm:$0x3]  ;;  %v6968_v11 = vmov 0.0  }
  0x34   :  { %v493_v2 = vunpack.c.l.b16 %v491_v0  ;;  %v599_v3 = vsel %vm521_vm0, %v378_v1, 0  ;;  %v5390_v7 = vld [vmem:[%s5218_s5] sm:$0x3]  ;;  %v5393_v8 = vld [vmem:[%s5218_s5 + $0x2] sm:$0x3] }
  0x35   :  { %608 = vmatpush.bf16.msra.mxu1 %v599_v3  ;;  %v5396_v9 = vld [vmem:[%s5218_s5 + $0x4] sm:$0x3]  ;;  %v5399_v10 = vld [vmem:[%s5218_s5 + $0x6] sm:$0x3]  ;;  %267 = vst [vmem:[#allocation1] ss:$4 sm:$0xff] %v6968_v11 }
  0x36   :  { %v494_v4 = vpack.c.b16 %v493_v2, %v493_v2  ;;  %v5403_v12 = vld [vmem:[%s5218_s5 + $0x8] sm:$0x3]  ;;  %269 = vst [vmem:[#allocation1 + $0x1] ss:$4 sm:$0xff] %v6968_v11  ;;  %v5407_v13 = vld [vmem:[%s5218_s5 + $0xa] sm:$0x3] }
  0x37   :  { %271 = vst [vmem:[#allocation1 + $0x2] ss:$4 sm:$0xff] %v5390_v7  ;;  %v5414_v14 = vld [vmem:[%s5218_s5 + $0xc] sm:$0x3]  ;;  %v5419_v15 = vld [vmem:[%s5218_s5 + $0xe] sm:$0x3] }
  0x38   :  { %v495_v5 = vrot.slane %v494_v4, 2  ;;  %273 = vst [vmem:[#allocation1 + $0x3] ss:$4 sm:$0xff] %v5393_v8 }
  0x39   :  { %275 = vst [vmem:[#allocation1 + $0x20] ss:$4 sm:$0xff] %v5396_v9 }
  0x3a   :  { %v523_v6 = vsel %vm521_vm0, %v495_v5, 0  ;;  %277 = vst [vmem:[#allocation1 + $0x21] ss:$4 sm:$0xff] %v5399_v10 }
  0x3b   :  { %532 = vmatpush.bf16.msra.mxu0 %v523_v6  ;;  %279 = vst [vmem:[#allocation1 + $0x22] ss:$4 sm:$0xff] %v5403_v12 }
  0x3c   :  { %281 = vst [vmem:[#allocation1 + $0x23] ss:$4 sm:$0xff] %v5407_v13 }
  0x3d   :  { %72 = vsyncpa [#allocation5], 0  ;;  %v5422_v16 = vld [vmem:[%s5218_s5 + $0x10] sm:$0x3]  ;;  %v5427_v18 = vld [vmem:[%s5218_s5 + $0x12] sm:$0x3] }
  0x3e   :  { %7032 = vst [vmem:[#allocation23_spill] sm:$0xff] %v5427_v18  ;;  %v5431_v19 = vld [vmem:[%s5218_s5 + $0x14] sm:$0x3]  ;;  %v5435_v20 = vld [vmem:[%s5218_s5 + $0x16] sm:$0x3]  ;;  %vm496_vm1 = vcmask 31744  }
  0x3f   :  { %v5424_v17 = vld.sshfl [vmem:[#allocation1] sm:$0xff pattern:$0x73625140]  ;;  %v5438_v21 = vld [vmem:[%s5218_s5 + $0x18] sm:$0x3]  ;;  %s5201_s0 = smov 32  }
  0x40   :  { %284 = vst [vmem:[#allocation1] ss:$4 sm:$0xff] %v5414_v14  ;;  %v5445_v23 = vld [vmem:[%s5218_s5 + $0x1a] sm:$0x3]  ;;  %v5452_v24 = vld [vmem:[%s5218_s5 + $0x1c] sm:$0x3] }
  0x41   :  { %285 = vst [vmem:[#allocation1 + $0x1] ss:$4 sm:$0xff] %v5419_v15  ;;  %v5455_v25 = vld [vmem:[%s5218_s5 + $0x1e] sm:$0x3]  ;;  %v5458_v26 = vld [vmem:[%s5218_s5 + $0x20] sm:$0x3] }
  0x42   :  { %286 = vst [vmem:[#allocation1 + $0x2] ss:$4 sm:$0xff] %v5422_v16  ;;  %v5463_v28 = vld [vmem:[%s5218_s5 + $0x22] sm:$0x3]  ;;  %v5467_v29 = vld [vmem:[%s5218_s5 + $0x24] sm:$0x3] }
  0x43   :  { %v5441_v22 = vld.sshfl [vmem:[#allocation1 + $0x20] sm:$0xff pattern:$0x73625140]  ;;  %287 = vst [vmem:[#allocation1 + $0x3] ss:$4 sm:$0xff] %v5427_v18  ;;  %vm1822_vm2 = vcmask 261120  }
  0x44   :  { %288 = vst [vmem:[#allocation1 + $0x20] ss:$4 sm:$0xff] %v5431_v19  ;;  %v5471_v30 = vld [vmem:[%s5218_s5 + $0x26] sm:$0x3]  ;;  %v5474_v31 = vld [vmem:[%s5218_s5 + $0x28] sm:$0x3] }
  0x45   :  { %289 = vst [vmem:[#allocation1 + $0x21] ss:$4 sm:$0xff] %v5435_v20  ;;  %v5481_v33 = vld [vmem:[%s5218_s5 + $0x2a] sm:$0x3]  ;;  %v5488_v34 = vld [vmem:[%s5218_s5 + $0x2c] sm:$0x3] }
  0x46   :  { %290 = vst [vmem:[#allocation1 + $0x22] ss:$4 sm:$0xff] %v5438_v21  ;;  %v5491_v35 = vld [vmem:[%s5218_s5 + $0x2e] sm:$0x3]  ;;  %v5494_v36 = vld [vmem:[%s5218_s5 + $0x30] sm:$0x3] }
  0x47   :  { %291 = vst [vmem:[#allocation1 + $0x23] ss:$4 sm:$0xff] %v5445_v23  ;;  %v5499_v38 = vld [vmem:[%s5218_s5 + $0x32] sm:$0x3]  ;;  %v5503_v39 = vld [vmem:[%s5218_s5 + $0x34] sm:$0x3] }
  0x48   :  { %7035 = vst [vmem:[#allocation26_spill] sm:$0xff] %v5481_v33  ;;  %v5507_v40 = vld [vmem:[%s5218_s5 + $0x36] sm:$0x3]  ;;  %v5510_v41 = vld [vmem:[%s5218_s5 + $0x38] sm:$0x3]  ;;  %vm1831_vm3 = vcmask 523264  }
  0x49   :  { %7037 = vst [vmem:[#allocation28_spill] sm:$0xff] %v5499_v38  ;;  %v5517_v43 = vld [vmem:[%s5218_s5 + $0x3a] sm:$0x3]  ;;  %v5524_v44 = vld [vmem:[%s5218_s5 + $0x3c] sm:$0x3]  ;;  %vm1840_vm4 = vcmask 785408  }
  0x4a   :  { %v5460_v27 = vld.sshfl [vmem:[#allocation1] sm:$0xff pattern:$0x73625140]  ;;  %7039 = vst [vmem:[#allocation30_spill] sm:$0xff] %v5524_v44  ;;  %v5527_v45 = vld [vmem:[%s5218_s5 + $0x3e] sm:$0x3] }
  0x4b   :  { %7033 = vst [vmem:[#allocation24_spill] sm:$0xff] %v5460_v27  ;;  %v5530_v46 = vld [vmem:[%s5218_s5 + $0x40] sm:$0x3]  ;;  %v5535_v48 = vld [vmem:[%s5218_s5 + $0x42] sm:$0x3]  ;;  %vm3016_vm5 = vcmask 519170  }
  0x4c   :  { %294 = vst [vmem:[#allocation1] ss:$4 sm:$0xff] %v5452_v24  ;;  %v5539_v49 = vld [vmem:[%s5218_s5 + $0x44] sm:$0x3]  ;;  %v5543_v50 = vld [vmem:[%s5218_s5 + $0x46] sm:$0x3]  ;;  %vm3017_vm9 = vmor %vm3016_vm5, %vm521_vm0 }
  0x4d   :  { %295 = vst [vmem:[#allocation1 + $0x1] ss:$4 sm:$0xff] %v5455_v25  ;;  %v5546_v51 = vld [vmem:[%s5218_s5 + $0x48] sm:$0x3]  ;;  %v5553_v53 = vld [vmem:[%s5218_s5 + $0x4a] sm:$0x3] }
  0x4e   :  { %296 = vst [vmem:[#allocation1 + $0x2] ss:$4 sm:$0xff] %v5458_v26  ;;  %v5477_v32 = vld.sshfl [vmem:[#allocation1 + $0x20] sm:$0xff pattern:$0x73625140]  ;;  %vm3003_vm6 = vcmask 1043458  }
  0x4f   :  { %7034 = vst [vmem:[#allocation25_spill] sm:$0xff] %v5477_v32  ;;  %v5560_v54 = vld [vmem:[%s5218_s5 + $0x4c] sm:$0x3]  ;;  %v5563_v55 = vld [vmem:[%s5218_s5 + $0x4e] sm:$0x3]  ;;  %vm3006_vm7 = vcmask 1045508  }
  0x50   :  { %297 = vst [vmem:[#allocation1 + $0x3] ss:$4 sm:$0xff] %v5463_v28  ;;  %v5566_v56 = vld [vmem:[%s5218_s5 + $0x50] sm:$0x3]  ;;  %v5571_v58 = vld [vmem:[%s5218_s5 + $0x52] sm:$0x3] }
  0x51   :  { %298 = vst [vmem:[#allocation1 + $0x20] ss:$4 sm:$0xff] %v5467_v29  ;;  %v5575_v59 = vld [vmem:[%s5218_s5 + $0x54] sm:$0x3]  ;;  %v5579_v60 = vld [vmem:[%s5218_s5 + $0x56] sm:$0x3] }
  0x52   :  { %299 = vst [vmem:[#allocation1 + $0x21] ss:$4 sm:$0xff] %v5471_v30  ;;  %v5582_v61 = vld [vmem:[%s5218_s5 + $0x58] sm:$0x3]  ;;  %v5589_v63 = vld [vmem:[%s5218_s5 + $0x5a] sm:$0x3] }
  0x53   :  { %300 = vst [vmem:[#allocation1 + $0x22] ss:$4 sm:$0xff] %v5474_v31  ;;  %v5596_v0 = vld [vmem:[%s5218_s5 + $0x5c] sm:$0x3]  ;;  %v5599_v1 = vld [vmem:[%s5218_s5 + $0x5e] sm:$0x3] }
  0x54   :  { %301 = vst [vmem:[#allocation1 + $0x23] ss:$4 sm:$0xff] %v5481_v33  ;;  %v5602_v2 = vld [vmem:[%s5218_s5 + $0x60] sm:$0x3]  ;;  %v5607_v4 = vld [vmem:[%s5218_s5 + $0x62] sm:$0x3] }
  0x55   :  { %7041 = vst [vmem:[#allocation32_spill] sm:$0xff] %v5535_v48  ;;  %v5611_v5 = vld [vmem:[%s5218_s5 + $0x64] sm:$0x3]  ;;  %v5615_v6 = vld [vmem:[%s5218_s5 + $0x66] sm:$0x3]  ;;  %vm3009_vm8 = vcmask 1045504  }
  0x56   :  { %7043 = vst [vmem:[#allocation34_spill] sm:$0xff] %v5553_v53  ;;  %v5618_v11 = vld [vmem:[%s5218_s5 + $0x68] sm:$0x3]  ;;  %v5648_v27 = vld [vmem:[%s5218_s5 + $0x72] sm:$0x3]  ;;  %s7144_s7 = sld [smem:[#allocation17_spill]] }
  0x57   :  { %v5496_v37 = vld.sshfl [vmem:[#allocation1] sm:$0xff pattern:$0x73625140]  ;;  %7044 = vst [vmem:[#allocation35_spill] sm:$0xff] %v5560_v54  ;;  %s7145_s10 = sld [smem:[#allocation19_spill]]  ;;  %s5209_s16 = smov [#allocation4]  }
  0x58   :  { %7036 = vst [vmem:[#allocation27_spill] sm:$0xff] %v5496_v37  ;;  %v5642_v37 = vld [vmem:[%s5218_s5 + $0x70] sm:$0x3]  ;;  %s7146_s11 = sld [smem:[#allocation20_spill]]  ;;  %s4290_s18 = sshll.u32 %s5209_s16, 4  ;;  %s4291_s18 = int_to_ptr.vmem [resolvable:$true] %s4290_s18 }
  0x59   :  { %304 = vst [vmem:[#allocation1] ss:$4 sm:$0xff] %v5488_v34  ;;  %s7147_s15 = sld [smem:[#allocation22_spill]]  ;;  %s4292_s22 = sshll.u32 %s5383_s4, 4  ;;  %s4293_s22 = int_to_ptr.hbm [resolvable:$true] %s4292_s22 }
  0x5a   :  { %305 = vst [vmem:[#allocation1 + $0x1] ss:$4 sm:$0xff] %v5491_v35  ;;  %s5157_s23 = scalar_lea.hbm %s5383_s4, 2 }
  0x5b   :  { %306 = vst [vmem:[#allocation1 + $0x2] ss:$4 sm:$0xff] %v5494_v36  ;;  %v5513_v42 = vld.sshfl [vmem:[#allocation1 + $0x20] sm:$0xff pattern:$0x73625140] }
  0x5c   :  { %7038 = vst [vmem:[#allocation29_spill] sm:$0xff] %v5513_v42 }
  0x5d   :  { %307 = vst [vmem:[#allocation1 + $0x3] ss:$4 sm:$0xff] %v5499_v38 }
  0x5e   :  { %308 = vst [vmem:[#allocation1 + $0x20] ss:$4 sm:$0xff] %v5503_v39 }
  0x5f   :  { %309 = vst [vmem:[#allocation1 + $0x21] ss:$4 sm:$0xff] %v5507_v40 }
  0x60   :  { %310 = vst [vmem:[#allocation1 + $0x22] ss:$4 sm:$0xff] %v5510_v41 }
  0x61   :  { %311 = vst [vmem:[#allocation1 + $0x23] ss:$4 sm:$0xff] %v5517_v43 }
  0x62   :  { %7045 = vst [vmem:[#allocation36_spill] sm:$0xff] %v5563_v55 }
  0x63   :  { %7046 = vst [vmem:[#allocation37_spill] sm:$0xff] %v5566_v56 }
  0x64   :  { %v5532_v47 = vld.sshfl [vmem:[#allocation1] sm:$0xff pattern:$0x73625140]  ;;  %7048 = vst [vmem:[#allocation39_spill] sm:$0xff] %v5571_v58 }
  0x65   :  { %7040 = vst [vmem:[#allocation31_spill] sm:$0xff] %v5532_v47  ;;  %v5638_v47 = vld [vmem:[%s5218_s5 + $0x6e] sm:$0x3] }
  0x66   :  { %314 = vst [vmem:[#allocation1] ss:$4 sm:$0xff] %v5524_v44 }
  0x67   :  { %315 = vst [vmem:[#allocation1 + $0x1] ss:$4 sm:$0xff] %v5527_v45 }
  0x68   :  { %316 = vst [vmem:[#allocation1 + $0x2] ss:$4 sm:$0xff] %v5530_v46  ;;  %v5549_v52 = vld.sshfl [vmem:[#allocation1 + $0x20] sm:$0xff pattern:$0x73625140] }
  0x69   :  { %7042 = vst [vmem:[#allocation33_spill] sm:$0xff] %v5549_v52  ;;  %v762_v52 = vld [vmem:[%s5223_s9 + $0x4] sm:$0x3] }
  0x6a   :  { %317 = vst [vmem:[#allocation1 + $0x3] ss:$4 sm:$0xff] %v5535_v48  ;;  %v788_v42 = vsel %vm521_vm0, %v762_v52, 0 }
  0x6b   :  { %318 = vst [vmem:[#allocation1 + $0x20] ss:$4 sm:$0xff] %v5539_v49  ;;  %797 = vmatpush.bf16.msra.mxu2 %v788_v42 }
  0x6c   :  { %319 = vst [vmem:[#allocation1 + $0x21] ss:$4 sm:$0xff] %v5543_v50 }
  0x6d   :  { %320 = vst [vmem:[#allocation1 + $0x22] ss:$4 sm:$0xff] %v5546_v51 }
  0x6e   :  { %321 = vst [vmem:[#allocation1 + $0x23] ss:$4 sm:$0xff] %v5553_v53 }
  0x6f   :  { %7049 = vst [vmem:[#allocation40_spill] sm:$0xff] %v5575_v59 }
  0x70   :  { %7050 = vst [vmem:[#allocation41_spill] sm:$0xff] %v5579_v60 }
  0x71   :  { %v5568_v57 = vld.sshfl [vmem:[#allocation1] sm:$0xff pattern:$0x73625140]  ;;  %7051 = vst [vmem:[#allocation42_spill] sm:$0xff] %v5582_v61 }
  0x72   :  { %7047 = vst [vmem:[#allocation38_spill] sm:$0xff] %v5568_v57  ;;  %v5632_v57 = vld [vmem:[%s5218_s5 + $0x6c] sm:$0x3] }
  0x73   :  { %324 = vst [vmem:[#allocation1] ss:$4 sm:$0xff] %v5560_v54 }
  0x74   :  { %325 = vst [vmem:[#allocation1 + $0x1] ss:$4 sm:$0xff] %v5563_v55 }
  0x75   :  { %326 = vst [vmem:[#allocation1 + $0x2] ss:$4 sm:$0xff] %v5566_v56  ;;  %v5585_v62 = vld.sshfl [vmem:[#allocation1 + $0x20] sm:$0xff pattern:$0x73625140] }
  0x76   :  { %7052 = vst [vmem:[#allocation43_spill] sm:$0xff] %v5585_v62 }
  0x77   :  { %327 = vst [vmem:[#allocation1 + $0x3] ss:$4 sm:$0xff] %v5571_v58 }
  0x78   :  { %7053 = vst [vmem:[#allocation44_spill] sm:$0xff] %v5589_v63 }
  0x79   :  { %328 = vst [vmem:[#allocation1 + $0x20] ss:$4 sm:$0xff] %v5575_v59 }
  0x7a   :  { %329 = vst [vmem:[#allocation1 + $0x21] ss:$4 sm:$0xff] %v5579_v60 }
  0x7b   :  { %330 = vst [vmem:[#allocation1 + $0x22] ss:$4 sm:$0xff] %v5582_v61 }
  0x7c   :  { %331 = vst [vmem:[#allocation1 + $0x23] ss:$4 sm:$0xff] %v5589_v63 }
  0x7d   :  { %7054 = vst [vmem:[#allocation45_spill] sm:$0xff] %v5596_v0 }
  0x7e   :  { %7055 = vst [vmem:[#allocation46_spill] sm:$0xff] %v5599_v1  ;;  %v5604_v3 = vld.sshfl [vmem:[#allocation1] sm:$0xff pattern:$0x73625140] }
  0x7f   :  { %7056 = vst [vmem:[#allocation47_spill] sm:$0xff] %v5602_v2 }
  0x80   :  { %7057 = vst [vmem:[#allocation48_spill] sm:$0xff] %v5604_v3  ;;  %v5625_v3 = vld [vmem:[%s5218_s5 + $0x6a] sm:$0x3] }
  0x81   :  { %7058 = vst [vmem:[#allocation49_spill] sm:$0xff] %v5607_v4 }
  0x82   :  { %334 = vst [vmem:[#allocation1] ss:$4 sm:$0xff] %v5596_v0 }
  0x83   :  { %335 = vst [vmem:[#allocation1 + $0x1] ss:$4 sm:$0xff] %v5599_v1  ;;  %v5621_v62 = vld.sshfl [vmem:[#allocation1 + $0x20] sm:$0xff pattern:$0x73625140] }
  0x84   :  { %7059 = vst [vmem:[#allocation50_spill] sm:$0xff] %v5615_v6 }
  0x85   :  { %336 = vst [vmem:[#allocation1 + $0x2] ss:$4 sm:$0xff] %v5602_v2 }
  0x86   :  { %7060 = vst [vmem:[#allocation51_spill] sm:$0xff] %v5621_v62  ;;  %v370_v62 = vpack.c.bf16 %v5441_v22, %v5424_v17  ;;  %v5656_v17 = vld [vmem:[%s5218_s5 + $0x76] sm:$0x3]  ;;  %v5659_v22 = vld [vmem:[%s5218_s5 + $0x78] sm:$0x3] }
  0x87   :  { %337 = vst [vmem:[#allocation1 + $0x3] ss:$4 sm:$0xff] %v5607_v4 }
  0x88   :  { %7061 = vst [vmem:[#allocation52_spill] sm:$0xff] %v5625_v3  ;;  %4342 = vmatmul.msk.bf16.vlgmr.msra.gmra.mxu1 %vm496_vm1, %v370_v62  ;;  %v5666_v62 = vld [vmem:[%s5218_s5 + $0x7a] sm:$0x3] }
  0x89   :  { %338 = vst [vmem:[#allocation1 + $0x20] ss:$4 sm:$0xff] %v5611_v5 }
  0x8a   :  { %339 = vst [vmem:[#allocation1 + $0x21] ss:$4 sm:$0xff] %v5615_v6 }
  0x8b   :  { %340 = vst [vmem:[#allocation1 + $0x22] ss:$4 sm:$0xff] %v5618_v11 }
  0x8c   :  { %341 = vst [vmem:[#allocation1 + $0x23] ss:$4 sm:$0xff] %v5625_v3  ;;  %v5652_v3 = vld [vmem:[%s5218_s5 + $0x74] sm:$0x3] }
  0x8d   :  { %7062 = vst [vmem:[#allocation53_spill] sm:$0xff] %v5632_v57 }
  0x8e   :  { %v5644_v32 = vld.sshfl [vmem:[#allocation1] sm:$0xff pattern:$0x73625140]  ;;  %7064 = vst [vmem:[#allocation55_spill] sm:$0xff] %v5659_v22 }
  0x8f   :  { %7063 = vst [vmem:[#allocation54_spill] sm:$0xff] %v5644_v32  ;;  %v7068_v32 = vmov 0.0  }
  0x90   :  { %344 = vst [vmem:[#allocation1] ss:$4 sm:$0xff] %v5632_v57 }
  0x91   :  { %345 = vst [vmem:[#allocation1 + $0x1] ss:$4 sm:$0xff] %v5638_v47 }
  0x92   :  { %346 = vst [vmem:[#allocation1 + $0x2] ss:$4 sm:$0xff] %v5642_v37 }
  0x93   :  { %v5662_v52 = vld.sshfl [vmem:[#allocation1 + $0x20] sm:$0xff pattern:$0x73625140]  ;;  %347 = vst [vmem:[#allocation1 + $0x3] ss:$4 sm:$0xff] %v5648_v27 }
  0x94   :  { %7065 = vst [vmem:[#allocation56_spill] sm:$0xff] %v5662_v52 }
  0x95   :  { %7066 = vst [vmem:[#allocation57_spill] sm:$0xff] %v5666_v62 }
  0x96   :  { %348 = vst [vmem:[#allocation1 + $0x20] ss:$4 sm:$0xff] %v5652_v3 }
  0x97   :  { %349 = vst [vmem:[#allocation1 + $0x21] ss:$4 sm:$0xff] %v5656_v17 }
  0x98   :  { %350 = vst [vmem:[#allocation1 + $0x22] ss:$4 sm:$0xff] %v5659_v22 }
  0x99   :  { %351 = vst [vmem:[#allocation1 + $0x23] ss:$4 sm:$0xff] %v5666_v62 }
  0x9a   :  { %v5672_v42 = vld.sshfl [vmem:[#allocation1] sm:$0xff pattern:$0x73625140] }
  0x9b   :  { %7067 = vst [vmem:[#allocation58_spill] sm:$0xff] %v5672_v42 }
  0x9c   :  { %380 = vst [vmem:[#allocation1] ss:$4 sm:$0xff] %v7068_v32 }
  0x9d   :  { %382 = vst [vmem:[#allocation1 + $0x1] ss:$4 sm:$0xff] %v5390_v7 }
  0x9e   :  { %384 = vst [vmem:[#allocation1 + $0x2] ss:$4 sm:$0xff] %v5393_v8 }
  0x9f   :  { %386 = vst [vmem:[#allocation1 + $0x3] ss:$4 sm:$0xff] %v5396_v9 }
  0xa0   :  { %v5677_v52 = vld.sshfl [vmem:[#allocation1 + $0x20] sm:$0xff pattern:$0x73625140] }
  0xa1   :  { %7069 = vst [vmem:[#allocation59_spill] sm:$0xff] %v5677_v52 }
  0xa2   :  { %388 = vst [vmem:[#allocation1 + $0x20] ss:$4 sm:$0xff] %v5399_v10 }
  0xa3   :  { %390 = vst [vmem:[#allocation1 + $0x21] ss:$4 sm:$0xff] %v5403_v12 }
  0xa4   :  { %392 = vst [vmem:[#allocation1 + $0x22] ss:$4 sm:$0xff] %v5407_v13 }
  0xa5   :  { %394 = vst [vmem:[#allocation1 + $0x23] ss:$4 sm:$0xff] %v5414_v14 }
  0xa6   :  { %v395_v62 = vld.sshfl [vmem:[#allocation1] sm:$0xff pattern:$0x73625140] }
  0xa7   :  { %397 = vst [vmem:[#allocation1] ss:$4 sm:$0xff] %v5419_v15 }
  0xa8   :  { %398 = vst [vmem:[#allocation1 + $0x1] ss:$4 sm:$0xff] %v5422_v16 }
  0xa9   :  { %399 = vst [vmem:[#allocation1 + $0x2] ss:$4 sm:$0xff] %v5427_v18 }
  0xaa   :  { %400 = vst [vmem:[#allocation1 + $0x3] ss:$4 sm:$0xff] %v5431_v19 }
  0xac   :  { %v396_v32 = vld.sshfl [vmem:[#allocation1 + $0x20] sm:$0xff pattern:$0x73625140] }
  0xad   :  { %v483_v52 = vpack.c.bf16 %v396_v32, %v395_v62  ;;  %401 = vst [vmem:[#allocation1 + $0x20] ss:$4 sm:$0xff] %v5435_v20 }
  0xae   :  { %402 = vst [vmem:[#allocation1 + $0x21] ss:$4 sm:$0xff] %v5438_v21 }
  0xaf   :  { %4334 = vmatmul.msk.bf16.vlgmr.msra.gmra.mxu0 %vm496_vm1, %v483_v52  ;;  %403 = vst [vmem:[#allocation1 + $0x22] ss:$4 sm:$0xff] %v5445_v23 }
  0xb0   :  { %404 = vst [vmem:[#allocation1 + $0x23] ss:$4 sm:$0xff] %v5452_v24 }
  0xb1   :  { %v405_v42 = vld.sshfl [vmem:[#allocation1] sm:$0xff pattern:$0x73625140] }
  0xb2   :  { %407 = vst [vmem:[#allocation1] ss:$4 sm:$0xff] %v5455_v25 }
  0xb3   :  { %408 = vst [vmem:[#allocation1 + $0x1] ss:$4 sm:$0xff] %v5458_v26 }
  0xb4   :  { %409 = vst [vmem:[#allocation1 + $0x2] ss:$4 sm:$0xff] %v5463_v28 }
  0xb5   :  { %410 = vst [vmem:[#allocation1 + $0x3] ss:$4 sm:$0xff] %v5467_v29 }
  0xb7   :  { %v406_v18 = vld.sshfl [vmem:[#allocation1 + $0x20] sm:$0xff pattern:$0x73625140] }
  0xb8   :  { %411 = vst [vmem:[#allocation1 + $0x20] ss:$4 sm:$0xff] %v5471_v30 }
  0xb9   :  { %412 = vst [vmem:[#allocation1 + $0x21] ss:$4 sm:$0xff] %v5474_v31 }
  0xba   :  { %413 = vst [vmem:[#allocation1 + $0x22] ss:$4 sm:$0xff] %v5481_v33 }
  0xbb   :  { %414 = vst [vmem:[#allocation1 + $0x23] ss:$4 sm:$0xff] %v5488_v34 }
  0xbc   :  { %v5701_v32 = vld.sshfl [vmem:[#allocation1] sm:$0xff pattern:$0x73625140] }
  0xbd   :  { %417 = vst [vmem:[#allocation1] ss:$4 sm:$0xff] %v5491_v35 }
  0xbe   :  { %418 = vst [vmem:[#allocation1 + $0x1] ss:$4 sm:$0xff] %v5494_v36 }
  0xbf   :  { %419 = vst [vmem:[#allocation1 + $0x2] ss:$4 sm:$0xff] %v5499_v38 }
  0xc0   :  { %420 = vst [vmem:[#allocation1 + $0x3] ss:$4 sm:$0xff] %v5503_v39 }
  0xc2   :  { %v5706_v52 = vld.sshfl [vmem:[#allocation1 + $0x20] sm:$0xff pattern:$0x73625140] }
  0xc3   :  { %421 = vst [vmem:[#allocation1 + $0x20] ss:$4 sm:$0xff] %v5507_v40 }
  0xc4   :  { %422 = vst [vmem:[#allocation1 + $0x21] ss:$4 sm:$0xff] %v5510_v41 }
  0xc5   :  { %423 = vst [vmem:[#allocation1 + $0x22] ss:$4 sm:$0xff] %v5517_v43 }
  0xc6   :  { %424 = vst [vmem:[#allocation1 + $0x23] ss:$4 sm:$0xff] %v5524_v44 }
  0xc7   :  { %v5713_v62 = vld.sshfl [vmem:[#allocation1] sm:$0xff pattern:$0x73625140] }
  0xc8   :  { %427 = vst [vmem:[#allocation1] ss:$4 sm:$0xff] %v5527_v45 }
  0xc9   :  { %428 = vst [vmem:[#allocation1 + $0x1] ss:$4 sm:$0xff] %v5530_v46 }
  0xca   :  { %429 = vst [vmem:[#allocation1 + $0x2] ss:$4 sm:$0xff] %v5535_v48 }
  0xcb   :  { %430 = vst [vmem:[#allocation1 + $0x3] ss:$4 sm:$0xff] %v5539_v49 }
  0xcd   :  { %v5718_v38 = vld.sshfl [vmem:[#allocation1 + $0x20] sm:$0xff pattern:$0x73625140] }
  0xce   :  { %431 = vst [vmem:[#allocation1 + $0x20] ss:$4 sm:$0xff] %v5543_v50 }
  0xcf   :  { %432 = vst [vmem:[#allocation1 + $0x21] ss:$4 sm:$0xff] %v5546_v51 }
  0xd0   :  { %433 = vst [vmem:[#allocation1 + $0x22] ss:$4 sm:$0xff] %v5553_v53 }
  0xd1   :  { %434 = vst [vmem:[#allocation1 + $0x23] ss:$4 sm:$0xff] %v5560_v54 }
  0xd2   :  { %v5725_v44 = vld.sshfl [vmem:[#allocation1] sm:$0xff pattern:$0x73625140] }
  0xd3   :  { %437 = vst [vmem:[#allocation1] ss:$4 sm:$0xff] %v5563_v55 }
  0xd4   :  { %438 = vst [vmem:[#allocation1 + $0x1] ss:$4 sm:$0xff] %v5566_v56 }
  0xd5   :  { %439 = vst [vmem:[#allocation1 + $0x2] ss:$4 sm:$0xff] %v5571_v58 }
  0xd6   :  { %440 = vst [vmem:[#allocation1 + $0x3] ss:$4 sm:$0xff] %v5575_v59 }
  0xd8   :  { %v5730_v48 = vld.sshfl [vmem:[#allocation1 + $0x20] sm:$0xff pattern:$0x73625140] }
  0xd9   :  { %441 = vst [vmem:[#allocation1 + $0x20] ss:$4 sm:$0xff] %v5579_v60 }
  0xda   :  { %442 = vst [vmem:[#allocation1 + $0x21] ss:$4 sm:$0xff] %v5582_v61  ;;  %v7072_v61 = vld [vmem:[#allocation52_spill] sm:$0xff] }
  0xdb   :  { %443 = vst [vmem:[#allocation1 + $0x22] ss:$4 sm:$0xff] %v5589_v63  ;;  %v7074_v63 = vld [vmem:[#allocation25_spill] sm:$0xff] }
  0xdc   :  { %444 = vst [vmem:[#allocation1 + $0x23] ss:$4 sm:$0xff] %v5596_v0  ;;  %v484_v0 = vpack.c.bf16 %v406_v18, %v405_v42  ;;  %v5764_v18 = vld [vmem:[%s5218_s5 + $0x7c] sm:$0x3] }
  0xdd   :  { %v5737_v54 = vld.sshfl [vmem:[#allocation1] sm:$0xff pattern:$0x73625140] }
  0xde   :  { %7070 = vst [vmem:[#allocation60_spill] sm:$0xff] %v5737_v54  ;;  %v1174_v54 = vld [vmem:[%s5223_s9 + $0x8] sm:$0x3]  ;;  %4335 = vmatmul.msk.bf16.gmra.mxu0 %vm496_vm1, %v484_v0  ;;  %v485_v0 = vpack.c.bf16 %v5706_v52, %v5701_v32 }
  0xdf   :  { %447 = vst [vmem:[#allocation1] ss:$4 sm:$0xff] %v5599_v1  ;;  %v7073_v1 = vld [vmem:[#allocation24_spill] sm:$0xff]  ;;  %v7080_v32 = vld [vmem:[#allocation23_spill] sm:$0xff] }
  0xe0   :  { %448 = vst [vmem:[#allocation1 + $0x1] ss:$4 sm:$0xff] %v5602_v2  ;;  %v371_v2 = vpack.c.bf16 %v7074_v63, %v7073_v1  ;;  %v7077_v1 = vld [vmem:[#allocation27_spill] sm:$0xff] }
  0xe1   :  { %449 = vst [vmem:[#allocation1 + $0x2] ss:$4 sm:$0xff] %v5607_v4  ;;  %v1200_v4 = vsel %vm521_vm0, %v1174_v54, 0  ;;  %v7075_v54 = vld [vmem:[#allocation57_spill] sm:$0xff] }
  0xe2   :  { %450 = vst [vmem:[#allocation1 + $0x3] ss:$4 sm:$0xff] %v5611_v5  ;;  %1209 = vmatpush.bf16.msrb.mxu0 %v1200_v4  ;;  %4343 = vmatmul.msk.bf16.gmra.mxu1 %vm496_vm1, %v371_v2  ;;  %v7078_v2 = vld [vmem:[#allocation29_spill] sm:$0xff] }
  0xe3   :  { %v5742_v58 = vld.sshfl [vmem:[#allocation1 + $0x20] sm:$0xff pattern:$0x73625140]  ;;  %v372_v4 = vpack.c.bf16 %v7078_v2, %v7077_v1 }
  0xe4   :  { %7071 = vst [vmem:[#allocation61_spill] sm:$0xff] %v5742_v58  ;;  %v7081_v2 = vld [vmem:[#allocation31_spill] sm:$0xff] }
  0xe5   :  { %451 = vst [vmem:[#allocation1 + $0x20] ss:$4 sm:$0xff] %v5615_v6 }
  0xe6   :  { %452 = vst [vmem:[#allocation1 + $0x21] ss:$4 sm:$0xff] %v5618_v11 }
  0xe7   :  { %453 = vst [vmem:[#allocation1 + $0x22] ss:$4 sm:$0xff] %v7072_v61 }
  0xe8   :  { %454 = vst [vmem:[#allocation1 + $0x23] ss:$4 sm:$0xff] %v5632_v57 }
  0xe9   :  { %v5753_v60 = vld.sshfl [vmem:[#allocation1] sm:$0xff pattern:$0x73625140] }
  0xea   :  { %457 = vst [vmem:[#allocation1] ss:$4 sm:$0xff] %v5638_v47 }
  0xeb   :  { %458 = vst [vmem:[#allocation1 + $0x1] ss:$4 sm:$0xff] %v5642_v37 }
  0xec   :  { %459 = vst [vmem:[#allocation1 + $0x2] ss:$4 sm:$0xff] %v5648_v27 }
  0xed   :  { %460 = vst [vmem:[#allocation1 + $0x3] ss:$4 sm:$0xff] %v5652_v3 }
  0xee   :  { %4336 = vmatmul.msk.bf16.gmra.mxu0 %vm496_vm1, %v485_v0  ;;  %v486_v0 = vpack.c.bf16 %v5718_v38, %v5713_v62 }
  0xef   :  { %v5760_v58 = vld.sshfl [vmem:[#allocation1 + $0x20] sm:$0xff pattern:$0x73625140] }
  0xf0   :  { %461 = vst [vmem:[#allocation1 + $0x20] ss:$4 sm:$0xff] %v5656_v17 }
  0xf1   :  { %462 = vst [vmem:[#allocation1 + $0x21] ss:$4 sm:$0xff] %v5659_v22 }
  0xf2   :  { %463 = vst [vmem:[#allocation1 + $0x22] ss:$4 sm:$0xff] %v7075_v54  ;;  %4344 = vmatmul.msk.bf16.gmra.mxu1 %vm496_vm1, %v372_v4  ;;  %v7082_v4 = vld [vmem:[#allocation33_spill] sm:$0xff] }
  0xf3   :  { %464 = vst [vmem:[#allocation1 + $0x23] ss:$4 sm:$0xff] %v5764_v18 }
  0xf4   :  { %v5770_v63 = vld.sshfl [vmem:[#allocation1] sm:$0xff pattern:$0x73625140] }
  0xf5   :  { %7076 = vst [vmem:[#allocation52_spill] sm:$0xff] %v5770_v63 }
  0xf6   :  { %651 = vst [vmem:[#allocation1] ss:$4 sm:$0xff] %v5390_v7 }
  0xf7   :  { %653 = vst [vmem:[#allocation1 + $0x1] ss:$4 sm:$0xff] %v5393_v8 }
  0xf8   :  { %655 = vst [vmem:[#allocation1 + $0x2] ss:$4 sm:$0xff] %v5396_v9 }
  0xf9   :  { %657 = vst [vmem:[#allocation1 + $0x3] ss:$4 sm:$0xff] %v5399_v10 }
  0xfa   :  { %v5779_v42 = vld.sshfl [vmem:[#allocation1 + $0x20] sm:$0xff pattern:$0x73625140] }
  0xfb   :  { %7079 = vst [vmem:[#allocation24_spill] sm:$0xff] %v5779_v42  ;;  %v373_v42 = vpack.c.bf16 %v7082_v4, %v7081_v2  ;;  %v966_v2 = vld [vmem:[%s5223_s9 + $0x4] sm:$0xc]  ;;  %v7085_v4 = vld [vmem:[#allocation28_spill] sm:$0xff]  ;;  %s5203_s9 = smov 96  }
  0xfc   :  { %659 = vst [vmem:[#allocation1 + $0x20] ss:$4 sm:$0xff] %v5403_v12 }
  0xfd   :  { %661 = vst [vmem:[#allocation1 + $0x21] ss:$4 sm:$0xff] %v5407_v13 }
  0xfe   :  { %663 = vst [vmem:[#allocation1 + $0x22] ss:$4 sm:$0xff] %v5414_v14  ;;  %4337 = vmatmul.msk.bf16.gmra.mxu0 %vm496_vm1, %v486_v0 }
  0xff   :  { %665 = vst [vmem:[#allocation1 + $0x23] ss:$4 sm:$0xff] %v5419_v15 }
 0x100   :  { %v666_v7 = vld.sshfl [vmem:[#allocation1] sm:$0xff pattern:$0x73625140] }
 0x101   :  { %668 = vst [vmem:[#allocation1] ss:$4 sm:$0xff] %v5422_v16 }
 0x102   :  { %669 = vst [vmem:[#allocation1 + $0x1] ss:$4 sm:$0xff] %v7080_v32  ;;  %4345 = vmatmul.msk.bf16.gmra.mxu1 %vm496_vm1, %v373_v42  ;;  %v487_v42 = vpack.c.bf16 %v5730_v48, %v5725_v44  ;;  %v7086_v48 = vld [vmem:[#allocation30_spill] sm:$0xff] }
 0x103   :  { %670 = vst [vmem:[#allocation1 + $0x2] ss:$4 sm:$0xff] %v5431_v19 }
 0x104   :  { %671 = vst [vmem:[#allocation1 + $0x3] ss:$4 sm:$0xff] %v5435_v20 }
 0x106   :  { %v667_v52 = vld.sshfl [vmem:[#allocation1 + $0x20] sm:$0xff pattern:$0x73625140] }
 0x107   :  { %v754_v1 = vpack.c.bf16 %v667_v52, %v666_v7  ;;  %672 = vst [vmem:[#allocation1 + $0x20] ss:$4 sm:$0xff] %v5438_v21  ;;  %v7083_v52 = vld [vmem:[#allocation38_spill] sm:$0xff] }
 0x108   :  { %673 = vst [vmem:[#allocation1 + $0x21] ss:$4 sm:$0xff] %v5445_v23 }
 0x109   :  { %4350 = vmatmul.msk.bf16.vlgmr.msra.gmra.mxu2 %vm496_vm1, %v754_v1  ;;  %674 = vst [vmem:[#allocation1 + $0x22] ss:$4 sm:$0xff] %v5452_v24  ;;  %v7084_v1 = vld [vmem:[#allocation43_spill] sm:$0xff] }
 0x10a   :  { %675 = vst [vmem:[#allocation1 + $0x23] ss:$4 sm:$0xff] %v5455_v25  ;;  %v374_v0 = vpack.c.bf16 %v7084_v1, %v7083_v52 }
 0x10b   :  { %v676_v63 = vld.sshfl [vmem:[#allocation1] sm:$0xff pattern:$0x73625140] }
 0x10c   :  { %678 = vst [vmem:[#allocation1] ss:$4 sm:$0xff] %v5458_v26 }
 0x10d   :  { %679 = vst [vmem:[#allocation1 + $0x1] ss:$4 sm:$0xff] %v5463_v28 }
 0x10e   :  { %680 = vst [vmem:[#allocation1 + $0x2] ss:$4 sm:$0xff] %v5467_v29  ;;  %4338 = vmatmul.msk.bf16.gmra.mxu0 %vm496_vm1, %v487_v42  ;;  %v7088_v42 = vld [vmem:[#allocation35_spill] sm:$0xff] }
 0x10f   :  { %681 = vst [vmem:[#allocation1 + $0x3] ss:$4 sm:$0xff] %v5471_v30 }
 0x111   :  { %v677_v7 = vld.sshfl [vmem:[#allocation1 + $0x20] sm:$0xff pattern:$0x73625140] }
 0x112   :  { %682 = vst [vmem:[#allocation1 + $0x20] ss:$4 sm:$0xff] %v5474_v31  ;;  %v755_v38 = vpack.c.bf16 %v677_v7, %v676_v63  ;;  %4346 = vmatmul.msk.bf16.gmra.mxu1 %vm496_vm1, %v374_v0  ;;  %v7087_v0 = vld [vmem:[#allocation32_spill] sm:$0xff] }
 0x113   :  { %683 = vst [vmem:[#allocation1 + $0x21] ss:$4 sm:$0xff] %v5481_v33  ;;  %v968_v33 = vunpack.c.l.b16 %v966_v2 }
 0x114   :  { %684 = vst [vmem:[#allocation1 + $0x22] ss:$4 sm:$0xff] %v5488_v34 }
 0x115   :  { %685 = vst [vmem:[#allocation1 + $0x23] ss:$4 sm:$0xff] %v5491_v35  ;;  %v969_v7 = vpack.c.b16 %v968_v33, %v968_v33 }
 0x116   :  { %v686_v62 = vld.sshfl [vmem:[#allocation1] sm:$0xff pattern:$0x73625140] }
 0x117   :  { %688 = vst [vmem:[#allocation1] ss:$4 sm:$0xff] %v5494_v36  ;;  %v970_v44 = vrot.slane %v969_v7, 2  ;;  %v7090_v7 = vld [vmem:[#allocation41_spill] sm:$0xff] }
 0x118   :  { %689 = vst [vmem:[#allocation1 + $0x1] ss:$4 sm:$0xff] %v7085_v4 }
 0x119   :  { %4351 = vmatmul.msk.bf16.gmra.mxu2 %vm496_vm1, %v755_v38  ;;  %690 = vst [vmem:[#allocation1 + $0x2] ss:$4 sm:$0xff] %v5503_v39  ;;  %v996_v38 = vsel %vm521_vm0, %v970_v44, 0  ;;  %v7091_v44 = vld [vmem:[#allocation42_spill] sm:$0xff] }
 0x11a   :  { %691 = vst [vmem:[#allocation1 + $0x3] ss:$4 sm:$0xff] %v5507_v40  ;;  %1005 = vmatpush.bf16.msra.mxu3 %v996_v38  ;;  %v7092_v38 = vld [vmem:[#allocation44_spill] sm:$0xff] }
 0x11c   :  { %v687_v63 = vld.sshfl [vmem:[#allocation1 + $0x20] sm:$0xff pattern:$0x73625140] }
 0x11d   :  { %692 = vst [vmem:[#allocation1 + $0x20] ss:$4 sm:$0xff] %v5510_v41  ;;  %v756_v1 = vpack.c.bf16 %v687_v63, %v686_v62  ;;  %v7089_v62 = vld [vmem:[#allocation39_spill] sm:$0xff] }
 0x11e   :  { %693 = vst [vmem:[#allocation1 + $0x21] ss:$4 sm:$0xff] %v5517_v43 }
 0x11f   :  { %694 = vst [vmem:[#allocation1 + $0x22] ss:$4 sm:$0xff] %v7086_v48 }
 0x120   :  { %695 = vst [vmem:[#allocation1 + $0x23] ss:$4 sm:$0xff] %v5527_v45 }
 0x121   :  { %v696_v52 = vld.sshfl [vmem:[#allocation1] sm:$0xff pattern:$0x73625140] }
 0x122   :  { %698 = vst [vmem:[#allocation1] ss:$4 sm:$0xff] %v5530_v46 }
 0x123   :  { %699 = vst [vmem:[#allocation1 + $0x1] ss:$4 sm:$0xff] %v7087_v0 }
 0x124   :  { %700 = vst [vmem:[#allocation1 + $0x2] ss:$4 sm:$0xff] %v5539_v49 }
 0x125   :  { %701 = vst [vmem:[#allocation1 + $0x3] ss:$4 sm:$0xff] %v5543_v50 }
 0x127   :  { %v697_v33 = vld.sshfl [vmem:[#allocation1 + $0x20] sm:$0xff pattern:$0x73625140] }
 0x128   :  { %702 = vst [vmem:[#allocation1 + $0x20] ss:$4 sm:$0xff] %v5546_v51 }
 0x129   :  { %4352 = vmatmul.msk.bf16.gmra.mxu2 %vm496_vm1, %v756_v1  ;;  %703 = vst [vmem:[#allocation1 + $0x21] ss:$4 sm:$0xff] %v5553_v53  ;;  %v757_v1 = vpack.c.bf16 %v697_v33, %v696_v52  ;;  %v7093_v53 = vld [vmem:[#allocation45_spill] sm:$0xff]  ;;  %v7097_v52 = vld [vmem:[#allocation60_spill] sm:$0xff] }
 0x12a   :  { %704 = vst [vmem:[#allocation1 + $0x22] ss:$4 sm:$0xff] %v7088_v42  ;;  %v7094_v42 = vld [vmem:[#allocation46_spill] sm:$0xff]  ;;  %v7098_v33 = vld [vmem:[#allocation61_spill] sm:$0xff] }
 0x12b   :  { %705 = vst [vmem:[#allocation1 + $0x23] ss:$4 sm:$0xff] %v5563_v55 }
 0x12c   :  { %v706_v2 = vld.sshfl [vmem:[#allocation1] sm:$0xff pattern:$0x73625140] }
 0x12d   :  { %708 = vst [vmem:[#allocation1] ss:$4 sm:$0xff] %v5566_v56  ;;  %v7095_v56 = vld [vmem:[#allocation47_spill] sm:$0xff] }
 0x12e   :  { %709 = vst [vmem:[#allocation1 + $0x1] ss:$4 sm:$0xff] %v7089_v62  ;;  %v7096_v62 = vld [vmem:[#allocation49_spill] sm:$0xff] }
 0x12f   :  { %710 = vst [vmem:[#allocation1 + $0x2] ss:$4 sm:$0xff] %v5575_v59 }
 0x130   :  { %711 = vst [vmem:[#allocation1 + $0x3] ss:$4 sm:$0xff] %v7090_v7 }
 0x132   :  { %v707_v63 = vld.sshfl [vmem:[#allocation1 + $0x20] sm:$0xff pattern:$0x73625140] }
 0x133   :  { %712 = vst [vmem:[#allocation1 + $0x20] ss:$4 sm:$0xff] %v7091_v44 }
 0x134   :  { %713 = vst [vmem:[#allocation1 + $0x21] ss:$4 sm:$0xff] %v7092_v38 }
 0x135   :  { %714 = vst [vmem:[#allocation1 + $0x22] ss:$4 sm:$0xff] %v7093_v53 }
 0x136   :  { %715 = vst [vmem:[#allocation1 + $0x23] ss:$4 sm:$0xff] %v7094_v42  ;;  %v7100_v42 = vld [vmem:[#allocation51_spill] sm:$0xff] }
 0x137   :  { %v716_v55 = vld.sshfl [vmem:[#allocation1] sm:$0xff pattern:$0x73625140] }
 0x138   :  { %718 = vst [vmem:[#allocation1] ss:$4 sm:$0xff] %v7095_v56  ;;  %v7099_v56 = vld [vmem:[#allocation48_spill] sm:$0xff] }
 0x139   :  { %4353 = vmatmul.msk.bf16.gmra.mxu2 %vm496_vm1, %v757_v1  ;;  %719 = vst [vmem:[#allocation1 + $0x1] ss:$4 sm:$0xff] %v7096_v62  ;;  %v488_v1 = vpack.c.bf16 %v7098_v33, %v7097_v52  ;;  %v375_v62 = vpack.c.bf16 %v7100_v42, %v7099_v56  ;;  %v5866_v52 = vld [vmem:[%s5218_s5 + $0x7e] sm:$0x3]  ;;  %v489_v42 = vpack.c.bf16 %v5760_v58, %v5753_v60  ;;  %s5202_s5 = smov 64  }
 0x13a   :  { %720 = vst [vmem:[#allocation1 + $0x2] ss:$4 sm:$0xff] %v5611_v5 }
 0x13b   :  { %721 = vst [vmem:[#allocation1 + $0x3] ss:$4 sm:$0xff] %v5615_v6  ;;  %4339 = vmatmul.msk.bf16.gmra.mxu0 %vm496_vm1, %v488_v1  ;;  %4347 = vmatmul.msk.bf16.gmra.mxu1 %vm496_vm1, %v375_v62  ;;  %v758_v6 = vpack.c.bf16 %v707_v63, %v706_v2  ;;  %v7101_v2 = vld [vmem:[#allocation54_spill] sm:$0xff] }
 0x13d   :  { %v717_v59 = vld.sshfl [vmem:[#allocation1 + $0x20] sm:$0xff pattern:$0x73625140] }
 0x13e   :  { %722 = vst [vmem:[#allocation1 + $0x20] ss:$4 sm:$0xff] %v5618_v11 }
 0x13f   :  { %723 = vst [vmem:[#allocation1 + $0x21] ss:$4 sm:$0xff] %v7072_v61 }
 0x140   :  { %724 = vst [vmem:[#allocation1 + $0x22] ss:$4 sm:$0xff] %v5632_v57 }
 0x141   :  { %725 = vst [vmem:[#allocation1 + $0x23] ss:$4 sm:$0xff] %v5638_v47 }
 0x142   :  { %v726_v53 = vld.sshfl [vmem:[#allocation1] sm:$0xff pattern:$0x73625140] }
 0x143   :  { %728 = vst [vmem:[#allocation1] ss:$4 sm:$0xff] %v5642_v37 }
 0x144   :  { %729 = vst [vmem:[#allocation1 + $0x1] ss:$4 sm:$0xff] %v5648_v27 }
 0x145   :  { %730 = vst [vmem:[#allocation1 + $0x2] ss:$4 sm:$0xff] %v5652_v3 }
 0x146   :  { %731 = vst [vmem:[#allocation1 + $0x3] ss:$4 sm:$0xff] %v5656_v17 }
 0x148   :  { %v727_v57 = vld.sshfl [vmem:[#allocation1 + $0x20] sm:$0xff pattern:$0x73625140] }
 0x149   :  { %4354 = vmatmul.msk.bf16.gmra.mxu2 %vm496_vm1, %v758_v6  ;;  %732 = vst [vmem:[#allocation1 + $0x20] ss:$4 sm:$0xff] %v5659_v22  ;;  %v7102_v6 = vld [vmem:[#allocation56_spill] sm:$0xff] }
 0x14a   :  { %733 = vst [vmem:[#allocation1 + $0x21] ss:$4 sm:$0xff] %v7075_v54  ;;  %v376_v62 = vpack.c.bf16 %v7102_v6, %v7101_v2  ;;  %v7106_v2 = vld [vmem:[#allocation59_spill] sm:$0xff] }
 0x14b   :  { %734 = vst [vmem:[#allocation1 + $0x22] ss:$4 sm:$0xff] %v5764_v18  ;;  %4340 = vmatmul.msk.bf16.gmra.mxu0 %vm496_vm1, %v489_v42  ;;  %v7105_v42 = vld [vmem:[#allocation58_spill] sm:$0xff] }
 0x14c   :  { %735 = vst [vmem:[#allocation1 + $0x23] ss:$4 sm:$0xff] %v5866_v52  ;;  %4348 = vmatmul.msk.bf16.gmra.mxu1 %vm496_vm1, %v376_v62  ;;  %v377_v6 = vpack.c.bf16 %v7106_v2, %v7105_v42  ;;  %v7110_v2 = vld [vmem:[#allocation36_spill] sm:$0xff] }
 0x14d   :  { %v736_v56 = vld.sshfl [vmem:[#allocation1] sm:$0xff pattern:$0x73625140] }
 0x14e   :  { %855 = vst [vmem:[#allocation1] ss:$4 sm:$0xff] %v5393_v8  ;;  %v759_v8 = vpack.c.bf16 %v717_v59, %v716_v55  ;;  %v7103_v55 = vld [vmem:[#allocation52_spill] sm:$0xff] }
 0x14f   :  { %857 = vst [vmem:[#allocation1 + $0x1] ss:$4 sm:$0xff] %v5396_v9  ;;  %v7104_v59 = vld [vmem:[#allocation24_spill] sm:$0xff] }
 0x150   :  { %859 = vst [vmem:[#allocation1 + $0x2] ss:$4 sm:$0xff] %v5399_v10  ;;  %v490_v1 = vpack.c.bf16 %v7104_v59, %v7103_v55 }
 0x151   :  { %861 = vst [vmem:[#allocation1 + $0x3] ss:$4 sm:$0xff] %v5403_v12 }
 0x153   :  { %v737_v63 = vld.sshfl [vmem:[#allocation1 + $0x20] sm:$0xff pattern:$0x73625140] }
 0x154   :  { %863 = vst [vmem:[#allocation1 + $0x20] ss:$4 sm:$0xff] %v5407_v13  ;;  %v761_v55 = vpack.c.bf16 %v737_v63, %v736_v56  ;;  %v7108_v56 = vld [vmem:[#allocation34_spill] sm:$0xff]  ;;  %v7109_v63 = vld [vmem:[#allocation35_spill] sm:$0xff] }
 0x155   :  { %865 = vst [vmem:[#allocation1 + $0x21] ss:$4 sm:$0xff] %v5414_v14 }
 0x156   :  { %867 = vst [vmem:[#allocation1 + $0x22] ss:$4 sm:$0xff] %v5419_v15 }
 0x157   :  { %869 = vst [vmem:[#allocation1 + $0x23] ss:$4 sm:$0xff] %v5422_v16 }
 0x158   :  { %v870_v58 = vld.sshfl [vmem:[#allocation1] sm:$0xff pattern:$0x73625140] }
 0x159   :  { %4355 = vmatmul.msk.bf16.gmra.mxu2 %vm496_vm1, %v759_v8  ;;  %872 = vst [vmem:[#allocation1] ss:$4 sm:$0xff] %v7080_v32  ;;  %v760_v8 = vpack.c.bf16 %v727_v57, %v726_v53 }
 0x15a   :  { %873 = vst [vmem:[#allocation1 + $0x1] ss:$4 sm:$0xff] %v5431_v19 }
 0x15b   :  { %874 = vst [vmem:[#allocation1 + $0x2] ss:$4 sm:$0xff] %v5435_v20  ;;  %4341 = vmatmul.msk.bf16.gmra.mxu0 %vm496_vm1, %v490_v1 }
 0x15c   :  { %875 = vst [vmem:[#allocation1 + $0x3] ss:$4 sm:$0xff] %v5438_v21  ;;  %4349 = vmatmul.msk.bf16.gmra.mxu1 %vm496_vm1, %v377_v6  ;;  %v7111_v6 = vld [vmem:[#allocation37_spill] sm:$0xff] }
 0x15e   :  { %v871_v60 = vld.sshfl [vmem:[#allocation1 + $0x20] sm:$0xff pattern:$0x73625140] }
 0x15f   :  { %v958_v33 = vpack.c.bf16 %v871_v60, %v870_v58  ;;  %876 = vst [vmem:[#allocation1 + $0x20] ss:$4 sm:$0xff] %v5445_v23  ;;  %v7107_v60 = vld [vmem:[#allocation26_spill] sm:$0xff] }
 0x160   :  { %877 = vst [vmem:[#allocation1 + $0x21] ss:$4 sm:$0xff] %v5452_v24 }
 0x161   :  { %4358 = vmatmul.msk.bf16.vlgmr.msra.gmra.mxu3 %vm496_vm1, %v958_v33  ;;  %878 = vst [vmem:[#allocation1 + $0x22] ss:$4 sm:$0xff] %v5455_v25 }
 0x162   :  { %879 = vst [vmem:[#allocation1 + $0x23] ss:$4 sm:$0xff] %v5458_v26 }
 0x163   :  { %v880_v62 = vld.sshfl [vmem:[#allocation1] sm:$0xff pattern:$0x73625140] }
 0x164   :  { %882 = vst [vmem:[#allocation1] ss:$4 sm:$0xff] %v5463_v28 }
 0x165   :  { %883 = vst [vmem:[#allocation1 + $0x1] ss:$4 sm:$0xff] %v5467_v29 }
 0x166   :  { %884 = vst [vmem:[#allocation1 + $0x2] ss:$4 sm:$0xff] %v5471_v30 }
 0x167   :  { %885 = vst [vmem:[#allocation1 + $0x3] ss:$4 sm:$0xff] %v5474_v31 }
 0x169   :  { %v881_v58 = vld.sshfl [vmem:[#allocation1 + $0x20] sm:$0xff pattern:$0x73625140]  ;;  %4356 = vmatmul.msk.bf16.gmra.mxu2 %vm496_vm1, %v760_v8 }
 0x16a   :  { %886 = vst [vmem:[#allocation1 + $0x20] ss:$4 sm:$0xff] %v7107_v60  ;;  %v959_v33 = vpack.c.bf16 %v881_v58, %v880_v62  ;;  %v7112_v8 = vld [vmem:[#allocation39_spill] sm:$0xff]  ;;  %v7113_v58 = vld [vmem:[#allocation40_spill] sm:$0xff] }
 0x16b   :  { %887 = vst [vmem:[#allocation1 + $0x21] ss:$4 sm:$0xff] %v5488_v34 }
 0x16c   :  { %888 = vst [vmem:[#allocation1 + $0x22] ss:$4 sm:$0xff] %v5491_v35 }
 0x16d   :  { %889 = vst [vmem:[#allocation1 + $0x23] ss:$4 sm:$0xff] %v5494_v36 }
 0x16e   :  { %v890_v53 = vld.sshfl [vmem:[#allocation1] sm:$0xff pattern:$0x73625140] }
 0x16f   :  { %892 = vst [vmem:[#allocation1] ss:$4 sm:$0xff] %v7085_v4 }
 0x170   :  { %893 = vst [vmem:[#allocation1 + $0x1] ss:$4 sm:$0xff] %v5503_v39 }
 0x171   :  { %4359 = vmatmul.msk.bf16.gmra.mxu3 %vm496_vm1, %v959_v33  ;;  %894 = vst [vmem:[#allocation1 + $0x2] ss:$4 sm:$0xff] %v5507_v40 }
 0x172   :  { %895 = vst [vmem:[#allocation1 + $0x3] ss:$4 sm:$0xff] %v5510_v41 }
 0x174   :  { %v891_v57 = vld.sshfl [vmem:[#allocation1 + $0x20] sm:$0xff pattern:$0x73625140] }
 0x175   :  { %896 = vst [vmem:[#allocation1 + $0x20] ss:$4 sm:$0xff] %v5517_v43  ;;  %v960_v1 = vpack.c.bf16 %v891_v57, %v890_v53  ;;  %v7114_v53 = vld [vmem:[#allocation45_spill] sm:$0xff] }
 0x176   :  { %897 = vst [vmem:[#allocation1 + $0x21] ss:$4 sm:$0xff] %v7086_v48 }
 0x177   :  { %898 = vst [vmem:[#allocation1 + $0x22] ss:$4 sm:$0xff] %v5527_v45 }
 0x178   :  { %899 = vst [vmem:[#allocation1 + $0x23] ss:$4 sm:$0xff] %v5530_v46 }
 0x179   :  { %4357 = vmatmul.msk.bf16.gmra.mxu2 %vm496_vm1, %v761_v55  ;;  %v900_v59 = vld.sshfl [vmem:[#allocation1] sm:$0xff pattern:$0x73625140] }
 0x17a   :  { %902 = vst [vmem:[#allocation1] ss:$4 sm:$0xff] %v7087_v0  ;;  %v7115_v55 = vld [vmem:[#allocation46_spill] sm:$0xff] }
 0x17b   :  { %903 = vst [vmem:[#allocation1 + $0x1] ss:$4 sm:$0xff] %v5539_v49 }
 0x17c   :  { %904 = vst [vmem:[#allocation1 + $0x2] ss:$4 sm:$0xff] %v5543_v50 }
 0x17d   :  { %905 = vst [vmem:[#allocation1 + $0x3] ss:$4 sm:$0xff] %v5546_v51 }
 0x17f   :  { %v901_v42 = vld.sshfl [vmem:[#allocation1 + $0x20] sm:$0xff pattern:$0x73625140] }
 0x180   :  { %906 = vst [vmem:[#allocation1 + $0x20] ss:$4 sm:$0xff] %v7108_v56  ;;  %v961_v57 = vpack.c.bf16 %v901_v42, %v900_v59  ;;  %v5945_v59 = vpop.f32.mrf.mxu0 }
 0x181   :  { %4360 = vmatmul.msk.bf16.gmra.mxu3 %vm496_vm1, %v960_v1  ;;  %907 = vst [vmem:[#allocation1 + $0x21] ss:$4 sm:$0xff] %v7109_v63  ;;  %v7116_v1 = vld [vmem:[#allocation47_spill] sm:$0xff] }
 0x182   :  { %908 = vst [vmem:[#allocation1 + $0x22] ss:$4 sm:$0xff] %v7110_v2 }
 0x183   :  { %909 = vst [vmem:[#allocation1 + $0x23] ss:$4 sm:$0xff] %v7111_v6 }
 0x184   :  { %v910_v62 = vld.sshfl [vmem:[#allocation1] sm:$0xff pattern:$0x73625140]  ;;  %7120 = vst [vmem:[#allocation25_spill] sm:$0xff] %v5945_v59 }
 0x185   :  { %912 = vst [vmem:[#allocation1] ss:$4 sm:$0xff] %v7112_v8  ;;  %v7117_v8 = vld [vmem:[#allocation49_spill] sm:$0xff] }
 0x186   :  { %913 = vst [vmem:[#allocation1 + $0x1] ss:$4 sm:$0xff] %v7113_v58 }
 0x187   :  { %914 = vst [vmem:[#allocation1 + $0x2] ss:$4 sm:$0xff] %v7090_v7  ;;  %v7118_v7 = vld [vmem:[#allocation50_spill] sm:$0xff] }
 0x188   :  { %915 = vst [vmem:[#allocation1 + $0x3] ss:$4 sm:$0xff] %v7091_v44  ;;  %v5955_v59 = vpop.f32.mrf.mxu0 }
 0x189   :  { %7121 = vst [vmem:[#allocation57_spill] sm:$0xff] %v5955_v59 }
 0x18a   :  { %v911_v33 = vld.sshfl [vmem:[#allocation1 + $0x20] sm:$0xff pattern:$0x73625140] }
 0x18b   :  { %916 = vst [vmem:[#allocation1 + $0x20] ss:$4 sm:$0xff] %v7092_v38 }
 0x18c   :  { %917 = vst [vmem:[#allocation1 + $0x21] ss:$4 sm:$0xff] %v7114_v53  ;;  %v7119_v53 = vld [vmem:[#allocation53_spill] sm:$0xff] }
 0x18d   :  { %918 = vst [vmem:[#allocation1 + $0x22] ss:$4 sm:$0xff] %v7115_v55 }
 0x18e   :  { %919 = vst [vmem:[#allocation1 + $0x23] ss:$4 sm:$0xff] %v7116_v1 }
 0x18f   :  { %v920_v6 = vld.sshfl [vmem:[#allocation1] sm:$0xff pattern:$0x73625140] }
 0x190   :  { %922 = vst [vmem:[#allocation1] ss:$4 sm:$0xff] %v7117_v8 }
 0x191   :  { %4361 = vmatmul.msk.bf16.gmra.mxu3 %vm496_vm1, %v961_v57  ;;  %923 = vst [vmem:[#allocation1 + $0x1] ss:$4 sm:$0xff] %v5611_v5  ;;  %v962_v57 = vpack.c.bf16 %v911_v33, %v910_v62  ;;  %v7122_v62 = vmov 0.0  }
 0x192   :  { %924 = vst [vmem:[#allocation1 + $0x2] ss:$4 sm:$0xff] %v7118_v7 }
 0x193   :  { %925 = vst [vmem:[#allocation1 + $0x3] ss:$4 sm:$0xff] %v5618_v11 }
 0x195   :  { %v921_v58 = vld.sshfl [vmem:[#allocation1 + $0x20] sm:$0xff pattern:$0x73625140] }
 0x196   :  { %926 = vst [vmem:[#allocation1 + $0x20] ss:$4 sm:$0xff] %v7072_v61  ;;  %v963_v59 = vpack.c.bf16 %v921_v58, %v920_v6  ;;  %v7130_v58 = vld [vmem:[#allocation25_spill] sm:$0xff] }
 0x197   :  { %927 = vst [vmem:[#allocation1 + $0x21] ss:$4 sm:$0xff] %v7119_v53 }
 0x198   :  { %928 = vst [vmem:[#allocation1 + $0x22] ss:$4 sm:$0xff] %v5638_v47 }
 0x199   :  { %929 = vst [vmem:[#allocation1 + $0x23] ss:$4 sm:$0xff] %v5642_v37 }
 0x19a   :  { %v930_v42 = vld.sshfl [vmem:[#allocation1] sm:$0xff pattern:$0x73625140] }
 0x19b   :  { %932 = vst [vmem:[#allocation1] ss:$4 sm:$0xff] %v5648_v27 }
 0x19c   :  { %933 = vst [vmem:[#allocation1 + $0x1] ss:$4 sm:$0xff] %v5652_v3 }
 0x19d   :  { %934 = vst [vmem:[#allocation1 + $0x2] ss:$4 sm:$0xff] %v5656_v17 }
 0x19e   :  { %935 = vst [vmem:[#allocation1 + $0x3] ss:$4 sm:$0xff] %v5659_v22 }
 0x1a0   :  { %v931_v7 = vld.sshfl [vmem:[#allocation1 + $0x20] sm:$0xff pattern:$0x73625140] }
 0x1a1   :  { %4362 = vmatmul.msk.bf16.gmra.mxu3 %vm496_vm1, %v962_v57  ;;  %936 = vst [vmem:[#allocation1 + $0x20] ss:$4 sm:$0xff] %v7075_v54  ;;  %v5965_v57 = vpop.f32.mrf.mxu0 }
 0x1a2   :  { %937 = vst [vmem:[#allocation1 + $0x21] ss:$4 sm:$0xff] %v5764_v18 }
 0x1a3   :  { %938 = vst [vmem:[#allocation1 + $0x22] ss:$4 sm:$0xff] %v5866_v52 }
 0x1a4   :  { %939 = vst [vmem:[#allocation1 + $0x23] ss:$4 sm:$0xff] %v7122_v62 }
 0x1a5   :  { %v940_v33 = vld.sshfl [vmem:[#allocation1] sm:$0xff pattern:$0x73625140] }
 0x1a6   :  { %1063 = vst [vmem:[#allocation1] ss:$4 sm:$0xff] %v5396_v9 }
 0x1a7   :  { %1065 = vst [vmem:[#allocation1 + $0x1] ss:$4 sm:$0xff] %v5399_v10 }
 0x1a8   :  { %1067 = vst [vmem:[#allocation1 + $0x2] ss:$4 sm:$0xff] %v5403_v12 }
 0x1a9   :  { %1069 = vst [vmem:[#allocation1 + $0x3] ss:$4 sm:$0xff] %v5407_v13  ;;  %v5975_v12 = vpop.f32.mrf.mxu0 }
 0x1ab   :  { %v941_v22 = vld.sshfl [vmem:[#allocation1 + $0x20] sm:$0xff pattern:$0x73625140] }
 0x1ac   :  { %1071 = vst [vmem:[#allocation1 + $0x20] ss:$4 sm:$0xff] %v5414_v14 }
 0x1ad   :  { %1073 = vst [vmem:[#allocation1 + $0x21] ss:$4 sm:$0xff] %v5419_v15  ;;  %v964_v15 = vpack.c.bf16 %v931_v7, %v930_v42 }
 0x1ae   :  { %1075 = vst [vmem:[#allocation1 + $0x22] ss:$4 sm:$0xff] %v5422_v16 }
 0x1af   :  { %1077 = vst [vmem:[#allocation1 + $0x23] ss:$4 sm:$0xff] %v7080_v32 }
 0x1b0   :  { %v1078_v9 = vld.sshfl [vmem:[#allocation1] sm:$0xff pattern:$0x73625140] }
 0x1b1   :  { %4363 = vmatmul.msk.bf16.gmra.mxu3 %vm496_vm1, %v963_v59  ;;  %1080 = vst [vmem:[#allocation1] ss:$4 sm:$0xff] %v5431_v19  ;;  %v5985_v16 = vpop.f32.mrf.mxu0 }
 0x1b2   :  { %1081 = vst [vmem:[#allocation1 + $0x1] ss:$4 sm:$0xff] %v5435_v20 }
 0x1b3   :  { %1082 = vst [vmem:[#allocation1 + $0x2] ss:$4 sm:$0xff] %v5438_v21 }
 0x1b4   :  { %1083 = vst [vmem:[#allocation1 + $0x3] ss:$4 sm:$0xff] %v5445_v23 }
 0x1b6   :  { %v1079_v10 = vld.sshfl [vmem:[#allocation1 + $0x20] sm:$0xff pattern:$0x73625140] }
 0x1b7   :  { %v1166_v13 = vpack.c.bf16 %v1079_v10, %v1078_v9  ;;  %1084 = vst [vmem:[#allocation1 + $0x20] ss:$4 sm:$0xff] %v5452_v24 }
 0x1b8   :  { %1085 = vst [vmem:[#allocation1 + $0x21] ss:$4 sm:$0xff] %v5455_v25  ;;  %v965_v25 = vpack.c.bf16 %v941_v22, %v940_v33  ;;  %v6067_v33 = vld [vmem:[%s5228_s13] ss:$0 sm:$0xff]  ;;  %s7132_s13 = sld [smem:[#allocation10_spill]] }
 0x1b9   :  { %4366 = vmatmul.msk.bf16.vlgmr.msrb.gmra.mxu0 %vm496_vm1, %v1166_v13  ;;  %1086 = vst [vmem:[#allocation1 + $0x22] ss:$4 sm:$0xff] %v5458_v26  ;;  %v5995_v23 = vpop.f32.mrf.mxu0 }
 0x1ba   :  { %1087 = vst [vmem:[#allocation1 + $0x23] ss:$4 sm:$0xff] %v5463_v28 }
 0x1bb   :  { %v1088_v14 = vld.sshfl [vmem:[#allocation1] sm:$0xff pattern:$0x73625140] }
 0x1bc   :  { %1090 = vst [vmem:[#allocation1] ss:$4 sm:$0xff] %v5467_v29 }
 0x1bd   :  { %1091 = vst [vmem:[#allocation1 + $0x1] ss:$4 sm:$0xff] %v5471_v30 }
 0x1be   :  { %1092 = vst [vmem:[#allocation1 + $0x2] ss:$4 sm:$0xff] %v5474_v31  ;;  %v7123_v31 = vld [vmem:[#allocation37_spill] sm:$0xff] }
 0x1bf   :  { %1093 = vst [vmem:[#allocation1 + $0x3] ss:$4 sm:$0xff] %v7107_v60 }
 0x1c1   :  { %v1089_v19 = vld.sshfl [vmem:[#allocation1 + $0x20] sm:$0xff pattern:$0x73625140]  ;;  %4364 = vmatmul.msk.bf16.gmra.mxu3 %vm496_vm1, %v964_v15  ;;  %v6005_v28 = vpop.f32.mrf.mxu0  ;;  %v7131_v15 = vld [vmem:[#allocation57_spill] sm:$0xff] }
 0x1c2   :  { %1094 = vst [vmem:[#allocation1 + $0x20] ss:$4 sm:$0xff] %v5488_v34  ;;  %v1167_v20 = vpack.c.bf16 %v1089_v19, %v1088_v14  ;;  %v7124_v34 = vld [vmem:[#allocation39_spill] sm:$0xff]  ;;  %v6070_v14 = vld [vmem:[%s5233_s17] ss:$0 sm:$0xff]  ;;  %s7133_s17 = sld [smem:[#allocation7_spill]] }
 0x1c3   :  { %1095 = vst [vmem:[#allocation1 + $0x21] ss:$4 sm:$0xff] %v5491_v35 }
 0x1c4   :  { %1096 = vst [vmem:[#allocation1 + $0x22] ss:$4 sm:$0xff] %v5494_v36 }
 0x1c5   :  { %1097 = vst [vmem:[#allocation1 + $0x23] ss:$4 sm:$0xff] %v7085_v4 }
 0x1c6   :  { %v1098_v21 = vld.sshfl [vmem:[#allocation1] sm:$0xff pattern:$0x73625140] }
 0x1c7   :  { %1100 = vst [vmem:[#allocation1] ss:$4 sm:$0xff] %v5503_v39  ;;  %v7125_v39 = vld [vmem:[#allocation40_spill] sm:$0xff] }
 0x1c8   :  { %1101 = vst [vmem:[#allocation1 + $0x1] ss:$4 sm:$0xff] %v5507_v40  ;;  %v7126_v40 = vld [vmem:[#allocation41_spill] sm:$0xff] }
 0x1c9   :  { %4367 = vmatmul.msk.bf16.gmra.mxu0 %vm496_vm1, %v1167_v20  ;;  %1102 = vst [vmem:[#allocation1 + $0x2] ss:$4 sm:$0xff] %v5510_v41  ;;  %v6016_v35 = vpop.f32.mrf.mxu0 }
 0x1ca   :  { %1103 = vst [vmem:[#allocation1 + $0x3] ss:$4 sm:$0xff] %v5517_v43  ;;  %v7127_v43 = vld [vmem:[#allocation45_spill] sm:$0xff] }
 0x1cc   :  { %v1099_v24 = vld.sshfl [vmem:[#allocation1 + $0x20] sm:$0xff pattern:$0x73625140] }
 0x1cd   :  { %1104 = vst [vmem:[#allocation1 + $0x20] ss:$4 sm:$0xff] %v7086_v48  ;;  %v1168_v29 = vpack.c.bf16 %v1099_v24, %v1098_v21 }
 0x1ce   :  { %1105 = vst [vmem:[#allocation1 + $0x21] ss:$4 sm:$0xff] %v5527_v45 }
 0x1cf   :  { %1106 = vst [vmem:[#allocation1 + $0x22] ss:$4 sm:$0xff] %v5530_v46 }
 0x1d0   :  { %1107 = vst [vmem:[#allocation1 + $0x23] ss:$4 sm:$0xff] %v7087_v0 }
 0x1d1   :  { %4365 = vmatmul.msk.bf16.gmra.mxu3 %vm496_vm1, %v965_v25  ;;  %v1108_v26 = vld.sshfl [vmem:[#allocation1] sm:$0xff pattern:$0x73625140]  ;;  %v6026_v46 = vpop.f32.mrf.mxu0 }
 0x1d2   :  { %1110 = vst [vmem:[#allocation1] ss:$4 sm:$0xff] %v5539_v49 }
 0x1d3   :  { %1111 = vst [vmem:[#allocation1 + $0x1] ss:$4 sm:$0xff] %v5543_v50  ;;  %v7128_v50 = vld [vmem:[#allocation50_spill] sm:$0xff] }
 0x1d4   :  { %1112 = vst [vmem:[#allocation1 + $0x2] ss:$4 sm:$0xff] %v5546_v51 }
 0x1d5   :  { %1113 = vst [vmem:[#allocation1 + $0x3] ss:$4 sm:$0xff] %v7108_v56 }
 0x1d7   :  { %v1109_v30 = vld.sshfl [vmem:[#allocation1 + $0x20] sm:$0xff pattern:$0x73625140] }
 0x1d8   :  { %1114 = vst [vmem:[#allocation1 + $0x20] ss:$4 sm:$0xff] %v7109_v63  ;;  %v1169_v45 = vpack.c.bf16 %v1109_v30, %v1108_v26 }
 0x1d9   :  { %4368 = vmatmul.msk.bf16.gmra.mxu0 %vm496_vm1, %v1168_v29  ;;  %1115 = vst [vmem:[#allocation1 + $0x21] ss:$4 sm:$0xff] %v7110_v2  ;;  %v6037_v22 = vpop.f32.mrf.mxu0 }
 0x1da   :  { %1116 = vst [vmem:[#allocation1 + $0x22] ss:$4 sm:$0xff] %v7123_v31 }
 0x1db   :  { %1117 = vst [vmem:[#allocation1 + $0x23] ss:$4 sm:$0xff] %v7124_v34 }
 0x1dc   :  { %v1118_v36 = vld.sshfl [vmem:[#allocation1] sm:$0xff pattern:$0x73625140] }
 0x1dd   :  { %1120 = vst [vmem:[#allocation1] ss:$4 sm:$0xff] %v7125_v39 }
 0x1de   :  { %1121 = vst [vmem:[#allocation1 + $0x1] ss:$4 sm:$0xff] %v7126_v40 }
 0x1df   :  { %1122 = vst [vmem:[#allocation1 + $0x2] ss:$4 sm:$0xff] %v7091_v44 }
 0x1e0   :  { %1123 = vst [vmem:[#allocation1 + $0x3] ss:$4 sm:$0xff] %v7092_v38 }
 0x1e2   :  { %v1119_v41 = vld.sshfl [vmem:[#allocation1 + $0x20] sm:$0xff pattern:$0x73625140] }
 0x1e3   :  { %1124 = vst [vmem:[#allocation1 + $0x20] ss:$4 sm:$0xff] %v7127_v43  ;;  %v1170_v4 = vpack.c.bf16 %v1119_v41, %v1118_v36 }
 0x1e4   :  { %1125 = vst [vmem:[#allocation1 + $0x21] ss:$4 sm:$0xff] %v7115_v55  ;;  %v1007_v48 = vpop.f32.mrf.mxu3 }
 0x1e5   :  { %1126 = vst [vmem:[#allocation1 + $0x22] ss:$4 sm:$0xff] %v7116_v1 }
 0x1e6   :  { %1127 = vst [vmem:[#allocation1 + $0x23] ss:$4 sm:$0xff] %v7117_v8 }
 0x1e7   :  { %v1128_v49 = vld.sshfl [vmem:[#allocation1] sm:$0xff pattern:$0x73625140] }
 0x1e8   :  { %1130 = vst [vmem:[#allocation1] ss:$4 sm:$0xff] %v5611_v5 }
 0x1e9   :  { %4369 = vmatmul.msk.bf16.gmra.mxu0 %vm496_vm1, %v1169_v45  ;;  %1131 = vst [vmem:[#allocation1 + $0x1] ss:$4 sm:$0xff] %v7128_v50 }
 0x1ea   :  { %1132 = vst [vmem:[#allocation1 + $0x2] ss:$4 sm:$0xff] %v5618_v11  ;;  %v7129_v11 = vld [vmem:[#allocation55_spill] sm:$0xff] }
 0x1eb   :  { %1133 = vst [vmem:[#allocation1 + $0x3] ss:$4 sm:$0xff] %v7072_v61 }
 0x1ec   :  { %v1009_v38 = vpop.f32.mrf.mxu3 }
 0x1ed   :  { %v1129_v51 = vld.sshfl [vmem:[#allocation1 + $0x20] sm:$0xff pattern:$0x73625140] }
 0x1ee   :  { %1134 = vst [vmem:[#allocation1 + $0x20] ss:$4 sm:$0xff] %v7119_v53 }
 0x1ef   :  { %1135 = vst [vmem:[#allocation1 + $0x21] ss:$4 sm:$0xff] %v5638_v47  ;;  %v1171_v47 = vpack.c.bf16 %v1129_v51, %v1128_v49 }
 0x1f0   :  { %1136 = vst [vmem:[#allocation1 + $0x22] ss:$4 sm:$0xff] %v5642_v37 }
 0x1f1   :  { %1137 = vst [vmem:[#allocation1 + $0x23] ss:$4 sm:$0xff] %v5648_v27  ;;  %v6047_v27 = vpop.f32.mrf.mxu0 }
 0x1f2   :  { %v1138_v32 = vld.sshfl [vmem:[#allocation1] sm:$0xff pattern:$0x73625140] }
 0x1f3   :  { %1140 = vst [vmem:[#allocation1] ss:$4 sm:$0xff] %v5652_v3 }
 0x1f4   :  { %1141 = vst [vmem:[#allocation1 + $0x1] ss:$4 sm:$0xff] %v5656_v17  ;;  %v610_v17 = vpop.f32.mrf.mxu1  ;;  %v1012_v6 = vpop.f32.mrf.mxu3 }
 0x1f5   :  { %1142 = vst [vmem:[#allocation1 + $0x2] ss:$4 sm:$0xff] %v7129_v11  ;;  %v611_v53 = vadd.f32 %v610_v17, %v7130_v58 }
 0x1f6   :  { %1143 = vst [vmem:[#allocation1 + $0x3] ss:$4 sm:$0xff] %v7075_v54  ;;  %v799_v54 = vpop.f32.mrf.mxu2 }
 0x1f7   :  { %v839_v1 = vadd.f32 %v799_v54, %v611_v53 }
 0x1f8   :  { %v1139_v5 = vld.sshfl [vmem:[#allocation1 + $0x20] sm:$0xff pattern:$0x73625140] }
 0x1f9   :  { %4370 = vmatmul.msk.bf16.gmra.mxu0 %vm496_vm1, %v1170_v4  ;;  %1144 = vst [vmem:[#allocation1 + $0x20] ss:$4 sm:$0xff] %v5764_v18  ;;  %v6052_v61 = vpop.f32.mrf.mxu0  ;;  %v1172_v18 = vpack.c.bf16 %v1139_v5, %v1138_v32  ;;  %v1047_v42 = vadd.f32 %v1007_v48, %v839_v1 }
 0x1fa   :  { %1145 = vst [vmem:[#allocation1 + $0x21] ss:$4 sm:$0xff] %v5866_v52 }
 0x1fb   :  { %1146 = vst [vmem:[#allocation1 + $0x22] ss:$4 sm:$0xff] %v7122_v62 }
 0x1fc   :  { %1147 = vst [vmem:[#allocation1 + $0x23] ss:$4 sm:$0xff] %v7122_v62  ;;  %v612_v7 = vpop.f32.mrf.mxu1  ;;  %v1014_v9 = vpop.f32.mrf.mxu3 }
 0x1fd   :  { %v1148_v37 = vld.sshfl [vmem:[#allocation1] sm:$0xff pattern:$0x73625140]  ;;  %v613_v19 = vadd.f32 %v612_v7, %v7131_v15 }
 0x1fe   :  { %1497 = vst [vmem:[#allocation1] ss:$4 sm:$0xff] %v7122_v62  ;;  %v801_v44 = vpop.f32.mrf.mxu2 }
 0x1ff   :  { %1499 = vst [vmem:[#allocation1 + $0x1] ss:$4 sm:$0xff] %v7122_v62  ;;  %v840_v21 = vadd.f32 %v801_v44, %v613_v19 }
 0x201   :  { %v6055_v3 = vpop.f32.mrf.mxu0  ;;  %v1048_v26 = vadd.f32 %v1009_v38, %v840_v21 }
 0x203   :  { %v1149_v52 = vld.sshfl [vmem:[#allocation1 + $0x20] sm:$0xff pattern:$0x73625140] }
 0x204   :  { %v1173_v56 = vpack.c.bf16 %v1149_v52, %v1148_v37  ;;  %v615_v63 = vpop.f32.mrf.mxu1  ;;  %v1017_v41 = vpop.f32.mrf.mxu3 }
 0x205   :  { %v616_v43 = vadd.f32 %v615_v63, %v5965_v57 }
 0x206   :  { %v804_v2 = vpop.f32.mrf.mxu2 }
 0x207   :  { %v841_v51 = vadd.f32 %v804_v2, %v616_v43 }
 0x209   :  { %4371 = vmatmul.msk.bf16.gmra.mxu0 %vm496_vm1, %v1171_v47  ;;  %v6058_v0 = vpop.f32.mrf.mxu0  ;;  %v1049_v4 = vadd.f32 %v1012_v6, %v841_v51 }
 0x20c   :  { %v617_v55 = vpop.f32.mrf.mxu1  ;;  %v1019_v52 = vpop.f32.mrf.mxu3 }
 0x20d   :  { %v618_v48 = vadd.f32 %v617_v55, %v5975_v12 }
 0x20e   :  { %v806_v59 = vpop.f32.mrf.mxu2 }
 0x211   :  { %v6060_v60 = vpop.f32.mrf.mxu0 }
 0x214   :  { %v620_v25 = vpop.f32.mrf.mxu1  ;;  %v1022_v21 = vpop.f32.mrf.mxu3 }
 0x216   :  { %v809_v30 = vpop.f32.mrf.mxu2 }
 0x219   :  { %4372 = vmatmul.msk.bf16.gmra.mxu0 %vm496_vm1, %v1172_v18  ;;  %v6063_v8 = vpop.f32.mrf.mxu0 }
 0x21c   :  { %v622_v5 = vpop.f32.mrf.mxu1 }
 0x21e   :  { %v811_v54 = vpop.f32.mrf.mxu2 }
 0x226   :  { %v814_v19 = vpop.f32.mrf.mxu2 }
 0x229   :  { %4373 = vmatmul.msk.bf16.gmra.mxu0 %vm496_vm1, %v1173_v56  ;;  %v842_v56 = vadd.f32 %v806_v59, %v618_v48 }
 0x22b   :  { %v1050_v2 = vadd.f32 %v1014_v9, %v842_v56 }
 0x236   :  { %v1211_v10 = vpop.f32.mrf.mxu0 }
 0x237   :  { %v1251_v13 = vadd.f32 %v1211_v10, %v1047_v42  ;;  %v625_v42 = vpop.f32.mrf.mxu1  ;;  %v621_v10 = vadd.f32 %v620_v25, %v5985_v16 }
 0x239   :  { %v1271_v20 = vmul.f32 %v6067_v33, %v1251_v13 }
 0x23b   :  { %v1291_v24 = vadd.f32 %v6070_v14, %v1271_v20  ;;  %v843_v20 = vadd.f32 %v809_v30, %v621_v10 }
 0x23d   :  { %v1307_v29 = vmax.f32 %v1291_v24, 0.0  ;;  %v1051_v24 = vadd.f32 %v1017_v41, %v843_v20 }
 0x23e   :  { %v1213_v31 = vpop.f32.mrf.mxu0 }
 0x23f   :  { %v1339_v34 = vrot.slane %v1307_v29, 2  ;;  %v1340_v36 = vrot.slane %v1307_v29, 4  ;;  %v1341_v39 = vrot.slane %v1307_v29, 6  ;;  %v1252_v40 = vadd.f32 %v1213_v31, %v1048_v26  ;;  %v627_v43 = vpop.f32.mrf.mxu1 }
 0x240   :  { %v628_v10 = vadd.f32 %v627_v43, %v6016_v35 }
 0x241   :  { %v6076_v45 = vmax.f32 %v1307_v29, %v1339_v34  ;;  %v6078_v49 = vmax.f32 %v1340_v36, %v1341_v39  ;;  %v1272_v50 = vmul.f32 %v6067_v33, %v1252_v40  ;;  %v623_v36 = vadd.f32 %v622_v5, %v5995_v23  ;;  %v1024_v23 = vpop.f32.mrf.mxu3 }
 0x243   :  { %1501 = vst [vmem:[#allocation1 + $0x2] ss:$4 sm:$0xff] %v6076_v45  ;;  %v1292_v32 = vadd.f32 %v6070_v14, %v1272_v50  ;;  %v844_v51 = vadd.f32 %v811_v54, %v623_v36 }
 0x244   :  { %1503 = vst [vmem:[#allocation1 + $0x3] ss:$4 sm:$0xff] %v6078_v49 }
 0x245   :  { %v1308_v11 = vmax.f32 %v1292_v32, 0.0  ;;  %v816_v32 = vpop.f32.mrf.mxu2 }
 0x246   :  { %v1216_v37 = vpop.f32.mrf.mxu0 }
 0x247   :  { %v1342_v47 = vrot.slane %v1308_v11, 2  ;;  %v1343_v17 = vrot.slane %v1308_v11, 4  ;;  %v1344_v57 = vrot.slane %v1308_v11, 6  ;;  %v1253_v18 = vadd.f32 %v1216_v37, %v1049_v4 }
 0x248   :  { %v1052_v4 = vadd.f32 %v1019_v52, %v844_v51 }
 0x249   :  { %v6085_v7 = vmax.f32 %v1308_v11, %v1342_v47  ;;  %v6087_v44 = vmax.f32 %v1343_v17, %v1344_v57  ;;  %v1273_v38 = vmul.f32 %v6067_v33, %v1253_v18  ;;  %v626_v18 = vadd.f32 %v625_v42, %v6005_v28  ;;  %v1027_v42 = vpop.f32.mrf.mxu3 }
 0x24b   :  { %1505 = vst [vmem:[#allocation1 + $0x20] ss:$4 sm:$0xff] %v6085_v7  ;;  %v1293_v63 = vadd.f32 %v6070_v14, %v1273_v38  ;;  %v6108_v50 = vld.sshfl [vmem:[#allocation1] sm:$0xff pattern:$0x73625140]  ;;  %v845_v56 = vadd.f32 %v814_v19, %v626_v18 }
 0x24c   :  { %1507 = vst [vmem:[#allocation1 + $0x21] ss:$4 sm:$0xff] %v6087_v44 }
 0x24d   :  { %v1309_v6 = vmax.f32 %v1293_v63, 0.0  ;;  %v630_v63 = vpop.f32.mrf.mxu1 }
 0x24e   :  { %v1218_v58 = vpop.f32.mrf.mxu0  ;;  %v631_v43 = vadd.f32 %v630_v63, %v6026_v46 }
 0x24f   :  { %v1345_v53 = vrot.slane %v1309_v6, 2  ;;  %v1346_v1 = vrot.slane %v1309_v6, 4  ;;  %v1347_v12 = vrot.slane %v1309_v6, 6  ;;  %v1254_v55 = vadd.f32 %v1218_v58, %v1050_v2  ;;  %v819_v58 = vpop.f32.mrf.mxu2 }
 0x250   :  { %v1053_v2 = vadd.f32 %v1022_v21, %v845_v56 }
 0x251   :  { %v6094_v13 = vmax.f32 %v1309_v6, %v1345_v53  ;;  %v6096_v15 = vmax.f32 %v1346_v1, %v1347_v12  ;;  %v1274_v59 = vmul.f32 %v6067_v33, %v1254_v55 }
 0x253   :  { %1509 = vst [vmem:[#allocation1 + $0x22] ss:$4 sm:$0xff] %v6094_v13  ;;  %v1294_v9 = vadd.f32 %v6070_v14, %v1274_v59 }
 0x254   :  { %1511 = vst [vmem:[#allocation1 + $0x23] ss:$4 sm:$0xff] %v6096_v15 }
 0x255   :  { %v1310_v26 = vmax.f32 %v1294_v9, 0.0 }
 0x256   :  { %v1221_v29 = vpop.f32.mrf.mxu0 }
 0x257   :  { %v1348_v31 = vrot.slane %v1310_v26, 2  ;;  %v1349_v16 = vrot.slane %v1310_v26, 4  ;;  %v1350_v25 = vrot.slane %v1310_v26, 6  ;;  %v1255_v34 = vadd.f32 %v1221_v29, %v1051_v24 }
 0x258   :  { %v846_v24 = vadd.f32 %v816_v32, %v628_v10 }
 0x259   :  { %v6103_v39 = vmax.f32 %v1310_v26, %v1348_v31  ;;  %v6105_v40 = vmax.f32 %v1349_v16, %v1350_v25  ;;  %v1275_v30 = vmul.f32 %v6067_v33, %v1255_v34  ;;  %v632_v31 = vpop.f32.mrf.mxu1 }
 0x25a   :  { %v1054_v26 = vadd.f32 %v1024_v23, %v846_v24  ;;  %v633_v56 = vadd.f32 %v632_v31, %v6037_v22 }
 0x25b   :  { %1514 = vst [vmem:[#allocation1] ss:$4 sm:$0xff] %v6103_v39  ;;  %v1295_v41 = vadd.f32 %v6070_v14, %v1275_v30  ;;  %v6128_v9 = vld.sshfl [vmem:[#allocation1 + $0x20] sm:$0xff pattern:$0x73625140]  ;;  %v821_v30 = vpop.f32.mrf.mxu2 }
 0x25c   :  { %1515 = vst [vmem:[#allocation1 + $0x1] ss:$4 sm:$0xff] %v6105_v40 }
 0x25d   :  { %v1311_v11 = vmax.f32 %v1295_v41, 0.0 }
 0x25e   :  { %v1223_v5 = vpop.f32.mrf.mxu0 }
 0x25f   :  { %v1351_v37 = vrot.slane %v1311_v11, 2  ;;  %v1352_v47 = vrot.slane %v1311_v11, 4  ;;  %v1353_v17 = vrot.slane %v1311_v11, 6  ;;  %v1256_v57 = vadd.f32 %v1223_v5, %v1052_v4  ;;  %v1029_v4 = vpop.f32.mrf.mxu3 }
 0x261   :  { %v6114_v48 = vmax.f32 %v1311_v11, %v1351_v37  ;;  %v6116_v54 = vmax.f32 %v1352_v47, %v1353_v17  ;;  %v1276_v38 = vmul.f32 %v6067_v33, %v1256_v57  ;;  %v847_v11 = vadd.f32 %v819_v58, %v631_v43 }
 0x263   :  { %1516 = vst [vmem:[#allocation1 + $0x2] ss:$4 sm:$0xff] %v6114_v48  ;;  %v1296_v52 = vadd.f32 %v6070_v14, %v1276_v38  ;;  %v1055_v5 = vadd.f32 %v1027_v42, %v847_v11  ;;  %v635_v38 = vpop.f32.mrf.mxu1 }
 0x264   :  { %1517 = vst [vmem:[#allocation1 + $0x3] ss:$4 sm:$0xff] %v6116_v54 }
 0x265   :  { %v1312_v6 = vmax.f32 %v1296_v52, 0.0 }
 0x266   :  { %v1226_v53 = vpop.f32.mrf.mxu0 }
 0x267   :  { %v1354_v1 = vrot.slane %v1312_v6, 2  ;;  %v1355_v28 = vrot.slane %v1312_v6, 4  ;;  %v1356_v12 = vrot.slane %v1312_v6, 6  ;;  %v1257_v55 = vadd.f32 %v1226_v53, %v1053_v2 }
 0x268   :  { %v848_v53 = vadd.f32 %v821_v30, %v633_v56 }
 0x269   :  { %v6123_v59 = vmax.f32 %v1312_v6, %v1354_v1  ;;  %v6125_v19 = vmax.f32 %v1355_v28, %v1356_v12  ;;  %v1277_v20 = vmul.f32 %v6067_v33, %v1257_v55  ;;  %v824_v6 = vpop.f32.mrf.mxu2  ;;  %v1032_v28 = vpop.f32.mrf.mxu3 }
 0x26a   :  { %v1056_v12 = vadd.f32 %v1029_v4, %v848_v53 }
 0x26b   :  { %1518 = vst [vmem:[#allocation1 + $0x20] ss:$4 sm:$0xff] %v6123_v59  ;;  %v1297_v21 = vadd.f32 %v6070_v14, %v1277_v20  ;;  %v6148_v58 = vld.sshfl [vmem:[#allocation1] sm:$0xff pattern:$0x73625140] }
 0x26c   :  { %1519 = vst [vmem:[#allocation1 + $0x21] ss:$4 sm:$0xff] %v6125_v19 }
 0x26d   :  { %v1313_v29 = vmax.f32 %v1297_v21, 0.0  ;;  %v636_v21 = vadd.f32 %v635_v38, %v6047_v27 }
 0x26e   :  { %v1228_v16 = vpop.f32.mrf.mxu0 }
 0x26f   :  { %v1357_v35 = vrot.slane %v1313_v29, 2  ;;  %v1358_v25 = vrot.slane %v1313_v29, 4  ;;  %v1359_v34 = vrot.slane %v1313_v29, 6  ;;  %v1258_v36 = vadd.f32 %v1228_v16, %v1054_v26  ;;  %v637_v16 = vpop.f32.mrf.mxu1 }
 0x271   :  { %v6134_v51 = vmax.f32 %v1313_v29, %v1357_v35  ;;  %v6136_v41 = vmax.f32 %v1358_v25, %v1359_v34  ;;  %v1278_v32 = vmul.f32 %v6067_v33, %v1258_v36  ;;  %v849_v35 = vadd.f32 %v824_v6, %v636_v21  ;;  %v826_v34 = vpop.f32.mrf.mxu2  ;;  %v1034_v43 = vpop.f32.mrf.mxu3 }
 0x273   :  { %1520 = vst [vmem:[#allocation1 + $0x22] ss:$4 sm:$0xff] %v6134_v51  ;;  %v1298_v23 = vadd.f32 %v6070_v14, %v1278_v32  ;;  %v1057_v36 = vadd.f32 %v1032_v28, %v849_v35 }
 0x274   :  { %1521 = vst [vmem:[#allocation1 + $0x23] ss:$4 sm:$0xff] %v6136_v41 }
 0x275   :  { %v1314_v37 = vmax.f32 %v1298_v23, 0.0 }
 0x276   :  { %v1231_v47 = vpop.f32.mrf.mxu0 }
 0x277   :  { %v1360_v17 = vrot.slane %v1314_v37, 2  ;;  %v1361_v57 = vrot.slane %v1314_v37, 4  ;;  %v1362_v46 = vrot.slane %v1314_v37, 6  ;;  %v1259_v18 = vadd.f32 %v1231_v47, %v1055_v5  ;;  %v640_v38 = vpop.f32.mrf.mxu1 }
 0x278   :  { %v638_v5 = vadd.f32 %v637_v16, %v6052_v61 }
 0x279   :  { %v6143_v52 = vmax.f32 %v1314_v37, %v1360_v17  ;;  %v6145_v63 = vmax.f32 %v1361_v57, %v1362_v46  ;;  %v1279_v2 = vmul.f32 %v6067_v33, %v1259_v18  ;;  %v829_v6 = vpop.f32.mrf.mxu2 }
 0x27a   :  { %v850_v46 = vadd.f32 %v826_v34, %v638_v5 }
 0x27b   :  { %1524 = vst [vmem:[#allocation1] ss:$4 sm:$0xff] %v6143_v52  ;;  %v1299_v1 = vadd.f32 %v6070_v14, %v1279_v2  ;;  %v6168_v57 = vld.sshfl [vmem:[#allocation1 + $0x20] sm:$0xff pattern:$0x73625140] }
 0x27c   :  { %1525 = vst [vmem:[#allocation1 + $0x1] ss:$4 sm:$0xff] %v6145_v63  ;;  %v1058_v56 = vadd.f32 %v1034_v43, %v850_v46 }
 0x27d   :  { %v1315_v55 = vmax.f32 %v1299_v1, 0.0 }
 0x27e   :  { %v1233_v22 = vpop.f32.mrf.mxu0 }
 0x27f   :  { %v1363_v42 = vrot.slane %v1315_v55, 2  ;;  %v1364_v10 = vrot.slane %v1315_v55, 4  ;;  %v1365_v20 = vrot.slane %v1315_v55, 6  ;;  %v1260_v24 = vadd.f32 %v1233_v22, %v1056_v12  ;;  %v642_v35 = vpop.f32.mrf.mxu1 }
 0x280   :  { %v641_v22 = vadd.f32 %v640_v38, %v6055_v3 }
 0x281   :  { %v6154_v26 = vmax.f32 %v1315_v55, %v1363_v42  ;;  %v6156_v29 = vmax.f32 %v1364_v10, %v1365_v20  ;;  %v1280_v31 = vmul.f32 %v6067_v33, %v1260_v24  ;;  %v1037_v55 = vpop.f32.mrf.mxu3  ;;  %v831_v43 = vpop.f32.mrf.mxu2 }
 0x282   :  { %v851_v24 = vadd.f32 %v829_v6, %v641_v22 }
 0x283   :  { %1526 = vst [vmem:[#allocation1 + $0x2] ss:$4 sm:$0xff] %v6154_v26  ;;  %v1300_v25 = vadd.f32 %v6070_v14, %v1280_v31 }
 0x284   :  { %1527 = vst [vmem:[#allocation1 + $0x3] ss:$4 sm:$0xff] %v6156_v29  ;;  %v1059_v31 = vadd.f32 %v1037_v55, %v851_v24 }
 0x285   :  { %v1316_v30 = vmax.f32 %v1300_v25, 0.0 }
 0x286   :  { %v1236_v32 = vpop.f32.mrf.mxu0 }
 0x287   :  { %v1366_v27 = vrot.slane %v1316_v30, 2  ;;  %v1367_v4 = vrot.slane %v1316_v30, 4  ;;  %v1368_v11 = vrot.slane %v1316_v30, 6  ;;  %v1261_v23 = vadd.f32 %v1236_v32, %v1057_v36  ;;  %v645_v55 = vpop.f32.mrf.mxu1 }
 0x288   :  { %v643_v32 = vadd.f32 %v642_v35, %v6058_v0 }
 0x289   :  { %v6163_v37 = vmax.f32 %v1316_v30, %v1366_v27  ;;  %v6165_v47 = vmax.f32 %v1367_v4, %v1368_v11  ;;  %v1281_v17 = vmul.f32 %v6067_v33, %v1261_v23  ;;  %v1039_v23 = vpop.f32.mrf.mxu3  ;;  %v834_v22 = vpop.f32.mrf.mxu2 }
 0x28b   :  { %1528 = vst [vmem:[#allocation1 + $0x20] ss:$4 sm:$0xff] %v6163_v37  ;;  %v1301_v18 = vadd.f32 %v6070_v14, %v1281_v17  ;;  %v6188_v5 = vld.sshfl [vmem:[#allocation1] sm:$0xff pattern:$0x73625140]  ;;  %v852_v17 = vadd.f32 %v831_v43, %v643_v32 }
 0x28c   :  { %1529 = vst [vmem:[#allocation1 + $0x21] ss:$4 sm:$0xff] %v6165_v47 }
 0x28d   :  { %v1317_v2 = vmax.f32 %v1301_v18, 0.0  ;;  %v1060_v18 = vadd.f32 %v1039_v23, %v852_v17 }
 0x28e   :  { %v1238_v61 = vpop.f32.mrf.mxu0 }
 0x28f   :  { %v1369_v53 = vrot.slane %v1317_v2, 2  ;;  %v1370_v1 = vrot.slane %v1317_v2, 4  ;;  %v1371_v28 = vrot.slane %v1317_v2, 6  ;;  %v1262_v12 = vadd.f32 %v1238_v61, %v1058_v56 }
 0x291   :  { %v6174_v42 = vmax.f32 %v1317_v2, %v1369_v53  ;;  %v6176_v10 = vmax.f32 %v1370_v1, %v1371_v28  ;;  %v1282_v20 = vmul.f32 %v6067_v33, %v1262_v12 }
 0x293   :  { %1530 = vst [vmem:[#allocation1 + $0x22] ss:$4 sm:$0xff] %v6174_v42  ;;  %v1302_v21 = vadd.f32 %v6070_v14, %v1282_v20  ;;  %v646_v20 = vadd.f32 %v645_v55, %v6060_v60  ;;  %v836_v55 = vpop.f32.mrf.mxu2 }
 0x294   :  { %1531 = vst [vmem:[#allocation1 + $0x23] ss:$4 sm:$0xff] %v6176_v10 }
 0x295   :  { %v1318_v16 = vmax.f32 %v1302_v21, 0.0  ;;  %v1042_v21 = vpop.f32.mrf.mxu3 }
 0x296   :  { %v1241_v25 = vpop.f32.mrf.mxu0 }
 0x297   :  { %v1372_v34 = vrot.slane %v1318_v16, 2  ;;  %v1373_v36 = vrot.slane %v1318_v16, 4  ;;  %v1374_v3 = vrot.slane %v1318_v16, 6  ;;  %v1263_v30 = vadd.f32 %v1241_v25, %v1059_v31 }
 0x298   :  { %v853_v31 = vadd.f32 %v834_v22, %v646_v20 }
 0x299   :  { %v6183_v27 = vmax.f32 %v1318_v16, %v1372_v34  ;;  %v6185_v4 = vmax.f32 %v1373_v36, %v1374_v3  ;;  %v1283_v11 = vmul.f32 %v6067_v33, %v1263_v30 }
 0x29a   :  { %v1061_v34 = vadd.f32 %v1042_v21, %v853_v31 }
 0x29b   :  { %1534 = vst [vmem:[#allocation1] ss:$4 sm:$0xff] %v6183_v27  ;;  %v1303_v46 = vadd.f32 %v6070_v14, %v1283_v11  ;;  %v6204_v3 = vld.sshfl [vmem:[#allocation1 + $0x20] sm:$0xff pattern:$0x73625140] }
 0x29c   :  { %1535 = vst [vmem:[#allocation1 + $0x1] ss:$4 sm:$0xff] %v6185_v4 }
 0x29d   :  { %v1319_v38 = vmax.f32 %v1303_v46, 0.0  ;;  %v1044_v20 = vpop.f32.mrf.mxu3 }
 0x29e   :  { %v1243_v56 = vpop.f32.mrf.mxu0 }
 0x29f   :  { %v1375_v0 = vrot.slane %v1319_v38, 2  ;;  %v1376_v2 = vrot.slane %v1319_v38, 4  ;;  %v1377_v6 = vrot.slane %v1319_v38, 6  ;;  %v1264_v61 = vadd.f32 %v1243_v56, %v1060_v18 }
 0x2a1   :  { %v6193_v53 = vmax.f32 %v1319_v38, %v1375_v0  ;;  %v6195_v1 = vmax.f32 %v1376_v2, %v1377_v6  ;;  %v1284_v28 = vmul.f32 %v6067_v33, %v1264_v61 }
 0x2a3   :  { %1536 = vst [vmem:[#allocation1 + $0x2] ss:$4 sm:$0xff] %v6193_v53  ;;  %v1304_v12 = vadd.f32 %v6070_v14, %v1284_v28  ;;  %v647_v28 = vpop.f32.mrf.mxu1 }
 0x2a4   :  { %1537 = vst [vmem:[#allocation1 + $0x3] ss:$4 sm:$0xff] %v6195_v1  ;;  %v648_v22 = vadd.f32 %v647_v28, %v6063_v8 }
 0x2a5   :  { %v1320_v24 = vmax.f32 %v1304_v12, 0.0 }
 0x2a6   :  { %v1246_v30 = vpop.f32.mrf.mxu0 }
 0x2a7   :  { %v1378_v16 = vrot.slane %v1320_v24, 2  ;;  %v1379_v35 = vrot.slane %v1320_v24, 4  ;;  %v1380_v25 = vrot.slane %v1320_v24, 6  ;;  %v1265_v32 = vadd.f32 %v1246_v30, %v1061_v34 }
 0x2a9   :  { %v6202_v36 = vmax.f32 %v1320_v24, %v1378_v16  ;;  %v6210_v60 = vmax.f32 %v1379_v35, %v1380_v25  ;;  %v1285_v11 = vmul.f32 %v6067_v33, %v1265_v32  ;;  %v854_v24 = vadd.f32 %v836_v55, %v648_v22 }
 0x2ab   :  { %v6206_v43 = vld.sshfl [vmem:[#allocation1] sm:$0xff pattern:$0x73625140]  ;;  %1538 = vst [vmem:[#allocation1 + $0x20] ss:$4 sm:$0xff] %v6202_v36  ;;  %v1305_v23 = vadd.f32 %v6070_v14, %v1285_v11  ;;  %v1062_v35 = vadd.f32 %v1044_v20, %v854_v24 }
 0x2ac   :  { %1553 = vst [vmem:[#allocation1] ss:$4 sm:$0xff] %v7122_v62 }
 0x2ad   :  { %1555 = vst [vmem:[#allocation1 + $0x1] ss:$4 sm:$0xff] %v6076_v45  ;;  %v1321_v17 = vmax.f32 %v1305_v23, 0.0 }
 0x2ae   :  { %1557 = vst [vmem:[#allocation1 + $0x2] ss:$4 sm:$0xff] %v6078_v49  ;;  %v1248_v31 = vpop.f32.mrf.mxu0 }
 0x2af   :  { %1559 = vst [vmem:[#allocation1 + $0x3] ss:$4 sm:$0xff] %v6085_v7  ;;  %v1381_v46 = vrot.slane %v1321_v17, 2  ;;  %v1382_v18 = vrot.slane %v1321_v17, 4  ;;  %v1383_v38 = vrot.slane %v1321_v17, 6  ;;  %v1266_v8 = vadd.f32 %v1248_v31, %v1062_v35  ;;  %v4810_v35 = vld [vmem:[%s5238_s21 + $0x38] sm:$0xff] }
 0x2b0   :  { %1539 = vst [vmem:[#allocation1 + $0x21] ss:$4 sm:$0xff] %v6210_v60  ;;  %1949 = vmatpush.bf16.msrb.mxu1 %v4810_v35 }
 0x2b1   :  { %v6219_v0 = vmax.f32 %v1321_v17, %v1381_v46  ;;  %v6222_v2 = vmax.f32 %v1382_v18, %v1383_v38  ;;  %v1286_v34 = vmul.f32 %v6067_v33, %v1266_v8 }
 0x2b3   :  { %1540 = vst [vmem:[#allocation1 + $0x22] ss:$4 sm:$0xff] %v6219_v0  ;;  %v1306_v32 = vadd.f32 %v6070_v14, %v1286_v34 }
 0x2b4   :  { %1541 = vst [vmem:[#allocation1 + $0x23] ss:$4 sm:$0xff] %v6222_v2 }
 0x2b6   :  { %v1568_v56 = vld.sshfl [vmem:[#allocation1] sm:$0xff pattern:$0x73625140] }
 0x2b7   :  { %1570 = vst [vmem:[#allocation1] ss:$4 sm:$0xff] %v6105_v40 }
 0x2b8   :  { %1571 = vst [vmem:[#allocation1 + $0x1] ss:$4 sm:$0xff] %v6114_v48 }
 0x2b9   :  { %1572 = vst [vmem:[#allocation1 + $0x2] ss:$4 sm:$0xff] %v6116_v54 }
 0x2ba   :  { %1573 = vst [vmem:[#allocation1 + $0x3] ss:$4 sm:$0xff] %v6123_v59 }
 0x2bb   :  { %v6232_v61 = vld.sshfl [vmem:[#allocation1 + $0x20] sm:$0xff pattern:$0x73625140] }
 0x2bc   :  { %1561 = vst [vmem:[#allocation1 + $0x20] ss:$4 sm:$0xff] %v6087_v44 }
 0x2bd   :  { %1563 = vst [vmem:[#allocation1 + $0x21] ss:$4 sm:$0xff] %v6094_v13 }
 0x2be   :  { %1565 = vst [vmem:[#allocation1 + $0x22] ss:$4 sm:$0xff] %v6096_v15 }
 0x2bf   :  { %1567 = vst [vmem:[#allocation1 + $0x23] ss:$4 sm:$0xff] %v6103_v39 }
 0x2c1   :  { %v6228_v6 = vld.sshfl [vmem:[#allocation1] sm:$0xff pattern:$0x73625140] }
 0x2c2   :  { %1580 = vst [vmem:[#allocation1] ss:$4 sm:$0xff] %v6145_v63 }
 0x2c3   :  { %1581 = vst [vmem:[#allocation1 + $0x1] ss:$4 sm:$0xff] %v6154_v26 }
 0x2c4   :  { %1582 = vst [vmem:[#allocation1 + $0x2] ss:$4 sm:$0xff] %v6156_v29 }
 0x2c5   :  { %1583 = vst [vmem:[#allocation1 + $0x3] ss:$4 sm:$0xff] %v6163_v37 }
 0x2c6   :  { %v1569_v21 = vld.sshfl [vmem:[#allocation1 + $0x20] sm:$0xff pattern:$0x73625140] }
 0x2c7   :  { %1574 = vst [vmem:[#allocation1 + $0x20] ss:$4 sm:$0xff] %v6125_v19  ;;  %v4946_v16 = vpack.i.bf16 %v1569_v21, %v1568_v56 }
 0x2c8   :  { %1575 = vst [vmem:[#allocation1 + $0x21] ss:$4 sm:$0xff] %v6134_v51 }
 0x2c9   :  { %1576 = vst [vmem:[#allocation1 + $0x22] ss:$4 sm:$0xff] %v6136_v41  ;;  %4947 = vrot.lane.b32.xlu0 %v4946_v16, %s5201_s0  ;;  %v4812_v16 = vld [vmem:[%s5238_s21 + $0x48] sm:$0xff] }
 0x2ca   :  { %1577 = vst [vmem:[#allocation1 + $0x23] ss:$4 sm:$0xff] %v6143_v52  ;;  %1984 = vmatpush.bf16.msrb.mxu2 %v4812_v16 }
 0x2cc   :  { %v6240_v12 = vld.sshfl [vmem:[#allocation1] sm:$0xff pattern:$0x73625140] }
 0x2cd   :  { %1591 = vst [vmem:[#allocation1 + $0x1] ss:$4 sm:$0xff] %v6193_v53 }
 0x2ce   :  { %1592 = vst [vmem:[#allocation1 + $0x2] ss:$4 sm:$0xff] %v6195_v1 }
 0x2cf   :  { %1590 = vst [vmem:[#allocation1] ss:$4 sm:$0xff] %v6185_v4 }
 0x2d0   :  { %1593 = vst [vmem:[#allocation1 + $0x3] ss:$4 sm:$0xff] %v6202_v36 }
 0x2d1   :  { %v6259_v30 = vld.sshfl [vmem:[#allocation1 + $0x20] sm:$0xff pattern:$0x73625140] }
 0x2d2   :  { %1584 = vst [vmem:[#allocation1 + $0x20] ss:$4 sm:$0xff] %v6165_v47 }
 0x2d3   :  { %1585 = vst [vmem:[#allocation1 + $0x21] ss:$4 sm:$0xff] %v6174_v42 }
 0x2d4   :  { %1586 = vst [vmem:[#allocation1 + $0x22] ss:$4 sm:$0xff] %v6176_v10 }
 0x2d5   :  { %1587 = vst [vmem:[#allocation1 + $0x23] ss:$4 sm:$0xff] %v6183_v27 }
 0x2d7   :  { %v6252_v25 = vld.sshfl [vmem:[#allocation1] sm:$0xff pattern:$0x73625140] }
 0x2d8   :  { %1625 = vst [vmem:[#allocation1] ss:$4 sm:$0xff] %v6076_v45  ;;  %v6266_v45 = vmax.f32 %v1306_v32, 0.0 }
 0x2d9   :  { %1627 = vst [vmem:[#allocation1 + $0x1] ss:$4 sm:$0xff] %v6078_v49 }
 0x2da   :  { %1629 = vst [vmem:[#allocation1 + $0x2] ss:$4 sm:$0xff] %v6085_v7  ;;  %v1384_v11 = vrot.slane %v6266_v45, 2  ;;  %v1385_v24 = vrot.slane %v6266_v45, 4  ;;  %v1386_v21 = vrot.slane %v6266_v45, 6 }
 0x2db   :  { %1631 = vst [vmem:[#allocation1 + $0x3] ss:$4 sm:$0xff] %v6087_v44 }
 0x2dc   :  { %v1589_v14 = vld.sshfl [vmem:[#allocation1 + $0x20] sm:$0xff pattern:$0x73625140]  ;;  %v6276_v23 = vmax.f32 %v6266_v45, %v1384_v11  ;;  %v6323_v8 = vmax.f32 %v1385_v24, %v1386_v21  ;;  %v4808_v45 = vld [vmem:[%s5238_s21 + $0x28] sm:$0xff] }
 0x2dd   :  { %1595 = vst [vmem:[#allocation1 + $0x21] ss:$4 sm:$0xff] %v6219_v0  ;;  %v4976_v55 = vpack.i.bf16 %v1589_v14, %v6240_v12 }
 0x2de   :  { %1596 = vst [vmem:[#allocation1 + $0x22] ss:$4 sm:$0xff] %v6222_v2 }
 0x2df   :  { %1594 = vst [vmem:[#allocation1 + $0x20] ss:$4 sm:$0xff] %v6210_v60 }
 0x2e0   :  { %1597 = vst [vmem:[#allocation1 + $0x23] ss:$4 sm:$0xff] %v6276_v23 }
 0x2e2   :  { %v1640_v33 = vld.sshfl [vmem:[#allocation1] sm:$0xff pattern:$0x73625140] }
 0x2e3   :  { %1642 = vst [vmem:[#allocation1] ss:$4 sm:$0xff] %v6114_v48 }
 0x2e4   :  { %1643 = vst [vmem:[#allocation1 + $0x1] ss:$4 sm:$0xff] %v6116_v54 }
 0x2e5   :  { %1644 = vst [vmem:[#allocation1 + $0x2] ss:$4 sm:$0xff] %v6123_v59 }
 0x2e6   :  { %1645 = vst [vmem:[#allocation1 + $0x3] ss:$4 sm:$0xff] %v6125_v19 }
 0x2e7   :  { %v1599_v46 = vld.sshfl [vmem:[#allocation1 + $0x20] sm:$0xff pattern:$0x73625140] }
 0x2e8   :  { %1633 = vst [vmem:[#allocation1 + $0x20] ss:$4 sm:$0xff] %v6094_v13 }
 0x2e9   :  { %1635 = vst [vmem:[#allocation1 + $0x21] ss:$4 sm:$0xff] %v6096_v15 }
 0x2ea   :  { %1637 = vst [vmem:[#allocation1 + $0x22] ss:$4 sm:$0xff] %v6103_v39 }
 0x2eb   :  { %1639 = vst [vmem:[#allocation1 + $0x23] ss:$4 sm:$0xff] %v6105_v40 }
 0x2ed   :  { %v1650_v17 = vld.sshfl [vmem:[#allocation1] sm:$0xff pattern:$0x73625140] }
 0x2ee   :  { %1652 = vst [vmem:[#allocation1] ss:$4 sm:$0xff] %v6154_v26 }
 0x2ef   :  { %1653 = vst [vmem:[#allocation1 + $0x1] ss:$4 sm:$0xff] %v6156_v29 }
 0x2f0   :  { %1654 = vst [vmem:[#allocation1 + $0x2] ss:$4 sm:$0xff] %v6163_v37 }
 0x2f1   :  { %1655 = vst [vmem:[#allocation1 + $0x3] ss:$4 sm:$0xff] %v6165_v47 }
 0x2f2   :  { %v1641_v38 = vld.sshfl [vmem:[#allocation1 + $0x20] sm:$0xff pattern:$0x73625140] }
 0x2f3   :  { %1646 = vst [vmem:[#allocation1 + $0x20] ss:$4 sm:$0xff] %v6134_v51  ;;  %v4951_v56 = vpack.i.bf16 %v1641_v38, %v1640_v33  ;;  %v4961_v38 = vpack.i.bf16 %v6259_v30, %v6228_v6 }
 0x2f4   :  { %1647 = vst [vmem:[#allocation1 + $0x21] ss:$4 sm:$0xff] %v6136_v41 }
 0x2f5   :  { %1648 = vst [vmem:[#allocation1 + $0x22] ss:$4 sm:$0xff] %v6143_v52  ;;  %4952 = vrot.lane.b32.xlu0 %v4951_v56, %s5202_s5 }
 0x2f6   :  { %1649 = vst [vmem:[#allocation1 + $0x23] ss:$4 sm:$0xff] %v6145_v63 }
 0x2f8   :  { %v6288_v18 = vld.sshfl [vmem:[#allocation1] sm:$0xff pattern:$0x73625140] }
 0x2f9   :  { %1662 = vst [vmem:[#allocation1] ss:$4 sm:$0xff] %v6193_v53 }
 0x2fa   :  { %1663 = vst [vmem:[#allocation1 + $0x1] ss:$4 sm:$0xff] %v6195_v1 }
 0x2fb   :  { %1664 = vst [vmem:[#allocation1 + $0x2] ss:$4 sm:$0xff] %v6202_v36 }
 0x2fc   :  { %1665 = vst [vmem:[#allocation1 + $0x3] ss:$4 sm:$0xff] %v6210_v60 }
 0x2fd   :  { %v1651_v22 = vld.sshfl [vmem:[#allocation1 + $0x20] sm:$0xff pattern:$0x73625140]  ;;  %4977 = vrot.lane.b32.xlu0 %v4976_v55, %s5201_s0 }
 0x2fe   :  { %1656 = vst [vmem:[#allocation1 + $0x20] ss:$4 sm:$0xff] %v6174_v42  ;;  %v4966_v20 = vpack.i.bf16 %v1651_v22, %v1650_v17  ;;  %v4811_v17 = vld [vmem:[%s5238_s21 + $0x40] sm:$0xff] }
 0x2ff   :  { %1657 = vst [vmem:[#allocation1 + $0x21] ss:$4 sm:$0xff] %v6176_v10  ;;  %1985 = vmatpush.bf16.msrb.mxu2 %v4811_v17 }
 0x300   :  { %1658 = vst [vmem:[#allocation1 + $0x22] ss:$4 sm:$0xff] %v6183_v27  ;;  %4967 = vrot.lane.b32.xlu2 %v4966_v20, %s5202_s5 }
 0x301   :  { %1659 = vst [vmem:[#allocation1 + $0x23] ss:$4 sm:$0xff] %v6185_v4 }
 0x303   :  { %v6299_v28 = vld.sshfl [vmem:[#allocation1] sm:$0xff pattern:$0x73625140] }
 0x304   :  { %1696 = vst [vmem:[#allocation1] ss:$4 sm:$0xff] %v6078_v49  ;;  %v4991_v49 = vpack.i.bf16 %v1599_v46, %v6252_v25  ;;  %v4809_v25 = vld [vmem:[%s5238_s21 + $0x30] sm:$0xff] }
 0x305   :  { %1698 = vst [vmem:[#allocation1 + $0x1] ss:$4 sm:$0xff] %v6085_v7  ;;  %1950 = vmatpush.bf16.msrb.mxu1 %v4809_v25 }
 0x306   :  { %1700 = vst [vmem:[#allocation1 + $0x2] ss:$4 sm:$0xff] %v6087_v44  ;;  %4992 = vrot.lane.b32.xlu0 %v4991_v49, %s5201_s0 }
 0x307   :  { %1702 = vst [vmem:[#allocation1 + $0x3] ss:$4 sm:$0xff] %v6094_v13 }
 0x308   :  { %v1661_v31 = vld.sshfl [vmem:[#allocation1 + $0x20] sm:$0xff pattern:$0x73625140] }
 0x309   :  { %1666 = vst [vmem:[#allocation1 + $0x20] ss:$4 sm:$0xff] %v6219_v0  ;;  %1951 = vmatpush.bf16.msrb.mxu1 %v4808_v45 }
 0x30a   :  { %1667 = vst [vmem:[#allocation1 + $0x21] ss:$4 sm:$0xff] %v6222_v2 }
 0x30b   :  { %1668 = vst [vmem:[#allocation1 + $0x22] ss:$4 sm:$0xff] %v6276_v23 }
 0x30c   :  { %1669 = vst [vmem:[#allocation1 + $0x23] ss:$4 sm:$0xff] %v6323_v8 }
 0x30e   :  { %v1711_v12 = vld.sshfl [vmem:[#allocation1] sm:$0xff pattern:$0x73625140] }
 0x30f   :  { %1713 = vst [vmem:[#allocation1] ss:$4 sm:$0xff] %v6116_v54 }
 0x310   :  { %1714 = vst [vmem:[#allocation1 + $0x1] ss:$4 sm:$0xff] %v6123_v59 }
 0x311   :  { %1715 = vst [vmem:[#allocation1 + $0x2] ss:$4 sm:$0xff] %v6125_v19 }
 0x312   :  { %1716 = vst [vmem:[#allocation1 + $0x3] ss:$4 sm:$0xff] %v6134_v51 }
 0x313   :  { %v1671_v32 = vld.sshfl [vmem:[#allocation1 + $0x20] sm:$0xff pattern:$0x73625140] }
 0x314   :  { %1704 = vst [vmem:[#allocation1 + $0x20] ss:$4 sm:$0xff] %v6096_v15  ;;  %v4996_v30 = vpack.i.bf16 %v1671_v32, %v6299_v28 }
 0x315   :  { %1706 = vst [vmem:[#allocation1 + $0x21] ss:$4 sm:$0xff] %v6103_v39 }
 0x316   :  { %1708 = vst [vmem:[#allocation1 + $0x22] ss:$4 sm:$0xff] %v6105_v40 }
 0x317   :  { %1710 = vst [vmem:[#allocation1 + $0x23] ss:$4 sm:$0xff] %v6114_v48 }
 0x319   :  { %v1721_v34 = vld.sshfl [vmem:[#allocation1] sm:$0xff pattern:$0x73625140] }
 0x31a   :  { %1723 = vst [vmem:[#allocation1] ss:$4 sm:$0xff] %v6156_v29 }
 0x31b   :  { %1724 = vst [vmem:[#allocation1 + $0x1] ss:$4 sm:$0xff] %v6163_v37 }
 0x31c   :  { %1725 = vst [vmem:[#allocation1 + $0x2] ss:$4 sm:$0xff] %v6165_v47 }
 0x31d   :  { %1726 = vst [vmem:[#allocation1 + $0x3] ss:$4 sm:$0xff] %v6174_v42 }
 0x31e   :  { %v1712_v11 = vld.sshfl [vmem:[#allocation1 + $0x20] sm:$0xff pattern:$0x73625140] }
 0x31f   :  { %v4956_v14 = vpack.i.bf16 %v1712_v11, %v1711_v12  ;;  %1717 = vst [vmem:[#allocation1 + $0x20] ss:$4 sm:$0xff] %v6136_v41 }
 0x320   :  { %1718 = vst [vmem:[#allocation1 + $0x21] ss:$4 sm:$0xff] %v6143_v52 }
 0x321   :  { %4957 = vrot.lane.b32.xlu1 %v4956_v14, %s5203_s9  ;;  %1719 = vst [vmem:[#allocation1 + $0x22] ss:$4 sm:$0xff] %v6145_v63 }
 0x322   :  { %1720 = vst [vmem:[#allocation1 + $0x23] ss:$4 sm:$0xff] %v6154_v26 }
 0x324   :  { %v1731_v33 = vld.sshfl [vmem:[#allocation1] sm:$0xff pattern:$0x73625140] }
 0x325   :  { %1734 = vst [vmem:[#allocation1 + $0x1] ss:$4 sm:$0xff] %v6202_v36 }
 0x326   :  { %1735 = vst [vmem:[#allocation1 + $0x2] ss:$4 sm:$0xff] %v6210_v60 }
 0x327   :  { %1733 = vst [vmem:[#allocation1] ss:$4 sm:$0xff] %v6195_v1 }
 0x328   :  { %1736 = vst [vmem:[#allocation1 + $0x3] ss:$4 sm:$0xff] %v6219_v0 }
 0x329   :  { %4962 = vrot.lane.b32.xlu1 %v4961_v38, %s5201_s0  ;;  %v1722_v56 = vld.sshfl [vmem:[#allocation1 + $0x20] sm:$0xff pattern:$0x73625140] }
 0x32a   :  { %v4971_v55 = vpack.i.bf16 %v1722_v56, %v1721_v34  ;;  %1727 = vst [vmem:[#allocation1 + $0x20] ss:$4 sm:$0xff] %v6176_v10 }
 0x32b   :  { %1728 = vst [vmem:[#allocation1 + $0x21] ss:$4 sm:$0xff] %v6183_v27 }
 0x32c   :  { %4972 = vrot.lane.b32.xlu2 %v4971_v55, %s5203_s9  ;;  %1729 = vst [vmem:[#allocation1 + $0x22] ss:$4 sm:$0xff] %v6185_v4 }
 0x32d   :  { %1730 = vst [vmem:[#allocation1 + $0x23] ss:$4 sm:$0xff] %v6193_v53 }
 0x32f   :  { %v1741_v46 = vld.sshfl [vmem:[#allocation1] sm:$0xff pattern:$0x73625140] }
 0x330   :  { %1767 = vst [vmem:[#allocation1] ss:$4 sm:$0xff] %v6085_v7  ;;  %v4807_v7 = vld [vmem:[%s5238_s21 + $0x20] sm:$0xff] }
 0x331   :  { %1769 = vst [vmem:[#allocation1 + $0x1] ss:$4 sm:$0xff] %v6087_v44  ;;  %v4981_v44 = vpack.i.bf16 %v1661_v31, %v6288_v18  ;;  %1952 = vmatpush.bf16.msrb.mxu1 %v4807_v7 }
 0x332   :  { %1771 = vst [vmem:[#allocation1 + $0x2] ss:$4 sm:$0xff] %v6094_v13 }
 0x333   :  { %1773 = vst [vmem:[#allocation1 + $0x3] ss:$4 sm:$0xff] %v6096_v15  ;;  %4982 = vrot.lane.b32.xlu1 %v4981_v44, %s5202_s5 }
 0x334   :  { %v1732_v15 = vld.sshfl [vmem:[#allocation1 + $0x20] sm:$0xff pattern:$0x73625140] }
 0x335   :  { %v4986_v6 = vpack.i.bf16 %v1732_v15, %v1731_v33  ;;  %1737 = vst [vmem:[#allocation1 + $0x20] ss:$4 sm:$0xff] %v6222_v2 }
 0x336   :  { %1738 = vst [vmem:[#allocation1 + $0x21] ss:$4 sm:$0xff] %v6276_v23 }
 0x337   :  { %4987 = vrot.lane.b32.xlu2 %v4986_v6, %s5203_s9  ;;  %1739 = vst [vmem:[#allocation1 + $0x22] ss:$4 sm:$0xff] %v6323_v8 }
 0x338   :  { %1740 = vst [vmem:[#allocation1 + $0x23] ss:$4 sm:$0xff] %v7122_v62 }
 0x33a   :  { %v1782_v13 = vld.sshfl [vmem:[#allocation1] sm:$0xff pattern:$0x73625140] }
 0x33b   :  { %1784 = vst [vmem:[#allocation1] ss:$4 sm:$0xff] %v6123_v59  ;;  %4997 = vrot.lane.b32.xlu1 %v4996_v30, %s5202_s5 }
 0x33c   :  { %1785 = vst [vmem:[#allocation1 + $0x1] ss:$4 sm:$0xff] %v6125_v19  ;;  %v4806_v19 = vld [vmem:[%s5238_s21 + $0x18] sm:$0xff] }
 0x33d   :  { %1786 = vst [vmem:[#allocation1 + $0x2] ss:$4 sm:$0xff] %v6134_v51  ;;  %1953 = vmatpush.bf16.msrb.mxu1 %v4806_v19 }
 0x33e   :  { %1787 = vst [vmem:[#allocation1 + $0x3] ss:$4 sm:$0xff] %v6136_v41 }
 0x33f   :  { %v1742_v51 = vld.sshfl [vmem:[#allocation1 + $0x20] sm:$0xff pattern:$0x73625140] }
 0x340   :  { %v5001_v41 = vpack.i.bf16 %v1742_v51, %v1741_v46  ;;  %1775 = vst [vmem:[#allocation1 + $0x20] ss:$4 sm:$0xff] %v6103_v39 }
 0x341   :  { %1777 = vst [vmem:[#allocation1 + $0x21] ss:$4 sm:$0xff] %v6105_v40  ;;  %v4805_v40 = vld [vmem:[%s5238_s21 + $0x10] sm:$0xff] }
 0x342   :  { %5002 = vrot.lane.b32.xlu2 %v5001_v41, %s5203_s9  ;;  %1779 = vst [vmem:[#allocation1 + $0x22] ss:$4 sm:$0xff] %v6114_v48  ;;  %1954 = vmatpush.bf16.msrb.mxu1 %v4805_v40 }
 0x343   :  { %1781 = vst [vmem:[#allocation1 + $0x23] ss:$4 sm:$0xff] %v6116_v54 }
 0x345   :  { %v1792_v59 = vld.sshfl [vmem:[#allocation1] sm:$0xff pattern:$0x73625140] }
 0x346   :  { %1794 = vst [vmem:[#allocation1] ss:$4 sm:$0xff] %v6163_v37 }
 0x347   :  { %1795 = vst [vmem:[#allocation1 + $0x1] ss:$4 sm:$0xff] %v6165_v47 }
 0x348   :  { %1796 = vst [vmem:[#allocation1 + $0x2] ss:$4 sm:$0xff] %v6174_v42 }
 0x349   :  { %1797 = vst [vmem:[#allocation1 + $0x3] ss:$4 sm:$0xff] %v6176_v10 }
 0x34a   :  { %v1783_v47 = vld.sshfl [vmem:[#allocation1 + $0x20] sm:$0xff pattern:$0x73625140] }
 0x34b   :  { %v1850_v39 = vpack.c.bf16 %v1783_v47, %v1782_v13  ;;  %1788 = vst [vmem:[#allocation1 + $0x20] ss:$4 sm:$0xff] %v6143_v52 }
 0x34c   :  { %1789 = vst [vmem:[#allocation1 + $0x21] ss:$4 sm:$0xff] %v6145_v63  ;;  %v4804_v63 = vld [vmem:[%s5238_s21 + $0x8] sm:$0xff] }
 0x34d   :  { %4414 = vmatmul.msk.bf16.vlgmr.msrb.gmra.mxu2 %vm1822_vm2, %v1850_v39  ;;  %1790 = vst [vmem:[#allocation1 + $0x22] ss:$4 sm:$0xff] %v6154_v26  ;;  %1955 = vmatpush.bf16.msrb.mxu1 %v4804_v63 }
 0x34e   :  { %1791 = vst [vmem:[#allocation1 + $0x23] ss:$4 sm:$0xff] %v6156_v29  ;;  %v4803_v29 = vld [vmem:[%s5238_s21] sm:$0xff]  ;;  %s7134_s21 = sld [smem:[#allocation9_spill]] }
 0x350   :  { %v1802_v37 = vld.sshfl [vmem:[#allocation1] sm:$0xff pattern:$0x73625140] }
 0x351   :  { %1804 = vst [vmem:[#allocation1] ss:$4 sm:$0xff] %v6202_v36  ;;  %1956 = vmatpush.bf16.msrb.mxu1 %v4803_v29 }
 0x352   :  { %1805 = vst [vmem:[#allocation1 + $0x1] ss:$4 sm:$0xff] %v6210_v60 }
 0x353   :  { %1806 = vst [vmem:[#allocation1 + $0x2] ss:$4 sm:$0xff] %v6219_v0 }
 0x354   :  { %1807 = vst [vmem:[#allocation1 + $0x3] ss:$4 sm:$0xff] %v6222_v2 }
 0x355   :  { %v1793_v54 = vld.sshfl [vmem:[#allocation1 + $0x20] sm:$0xff pattern:$0x73625140] }
 0x356   :  { %1798 = vst [vmem:[#allocation1 + $0x20] ss:$4 sm:$0xff] %v6183_v27  ;;  %v1852_v52 = vpack.c.bf16 %v1793_v54, %v1792_v59 }
 0x357   :  { %1799 = vst [vmem:[#allocation1 + $0x21] ss:$4 sm:$0xff] %v6185_v4  ;;  %v4948_v4 = vpop.permute.xlu0 %4947 }
 0x358   :  { %1800 = vst [vmem:[#allocation1 + $0x22] ss:$4 sm:$0xff] %v6193_v53  ;;  %v4949_v36 = vunpack.i.l.bf16 %v4948_v4 }
 0x359   :  { %1801 = vst [vmem:[#allocation1 + $0x23] ss:$4 sm:$0xff] %v6195_v1  ;;  %v4950_v1 = vunpack.i.h.bf16 %v4948_v4 }
 0x35a   :  { %v1823_v18 = vsel %vm1822_vm2, %v6108_v50, %v4949_v36  ;;  %v4968_v21 = vpop.permute.xlu2 %4967 }
 0x35b   :  { %v1812_v48 = vld.sshfl [vmem:[#allocation1] sm:$0xff pattern:$0x73625140]  ;;  %v4970_v25 = vunpack.i.h.bf16 %v4968_v21  ;;  %v4969_v34 = vunpack.i.l.bf16 %v4968_v21 }
 0x35c   :  { %2125 = vst [vmem:[#allocation1] ss:$4 sm:$0xff] %v7122_v62 }
 0x35d   :  { %2127 = vst [vmem:[#allocation1 + $0x1] ss:$4 sm:$0xff] %v7122_v62  ;;  %4415 = vmatmul.msk.bf16.gmra.mxu2 %vm1822_vm2, %v1852_v52 }
 0x360   :  { %v1803_v26 = vld.sshfl [vmem:[#allocation1 + $0x20] sm:$0xff pattern:$0x73625140] }
 0x361   :  { %1808 = vst [vmem:[#allocation1 + $0x20] ss:$4 sm:$0xff] %v6276_v23  ;;  %v1854_v42 = vpack.c.bf16 %v1803_v26, %v1802_v37  ;;  %v1824_v23 = vsel %vm1822_vm2, %v6128_v9, %v4950_v1 }
 0x362   :  { %1809 = vst [vmem:[#allocation1 + $0x21] ss:$4 sm:$0xff] %v6323_v8 }
 0x363   :  { %1810 = vst [vmem:[#allocation1 + $0x22] ss:$4 sm:$0xff] %v7122_v62 }
 0x364   :  { %1811 = vst [vmem:[#allocation1 + $0x23] ss:$4 sm:$0xff] %v7122_v62 }
 0x367   :  { %v4953_v53 = vpop.permute.xlu0 %4952 }
 0x368   :  { %v4955_v60 = vunpack.i.h.bf16 %v4953_v53  ;;  %v4954_v0 = vunpack.i.l.bf16 %v4953_v53 }
 0x36a   :  { %v1833_v20 = vsel %vm1831_vm3, %v1824_v23, %v4955_v60  ;;  %v1832_v49 = vsel %vm1831_vm3, %v1823_v18, %v4954_v0  ;;  %v6442_v0 = vld [vmem:[%s5243_s25] ss:$0 sm:$0xff]  ;;  %s7135_s25 = sld [smem:[#allocation8_spill]] }
 0x36b   :  { %v1813_v10 = vld.sshfl [vmem:[#allocation1 + $0x20] sm:$0xff pattern:$0x73625140] }
 0x36c   :  { %v1856_v27 = vpack.c.bf16 %v1813_v10, %v1812_v48  ;;  %v6445_v23 = vld [vmem:[%s5248_s29] ss:$0 sm:$0xff]  ;;  %s7136_s29 = sld [smem:[#allocation11_spill]] }
 0x36d   :  { %4416 = vmatmul.msk.bf16.gmra.mxu2 %vm1822_vm2, %v1854_v42 }
 0x36f   :  { %v4978_v56 = vpop.permute.xlu0 %4977 }
 0x370   :  { %v4980_v55 = vunpack.i.h.bf16 %v4978_v56  ;;  %v4979_v7 = vunpack.i.l.bf16 %v4978_v56 }
 0x372   :  { %v1828_v15 = vsel %vm1822_vm2, %v6204_v3, %v4980_v55  ;;  %v1827_v6 = vsel %vm1822_vm2, %v6188_v5, %v4979_v7 }
 0x378   :  { %v4993_v39 = vpop.permute.xlu0 %4992 }
 0x379   :  { %v4995_v48 = vunpack.i.h.bf16 %v4993_v39  ;;  %v4994_v54 = vunpack.i.l.bf16 %v4993_v39 }
 0x37b   :  { %v1830_v63 = vsel %vm1822_vm2, %v6232_v61, %v4995_v48  ;;  %v1829_v26 = vsel %vm1822_vm2, %v6206_v43, %v4994_v54 }
 0x37d   :  { %4417 = vmatmul.msk.bf16.gmra.mxu2 %vm1822_vm2, %v1856_v27 }
 0x386   :  { %v4973_v32 = vpop.permute.xlu2 %4972 }
 0x387   :  { %v4975_v11 = vunpack.i.h.bf16 %v4973_v32  ;;  %v4974_v14 = vunpack.i.l.bf16 %v4973_v32 }
 0x391   :  { %v4988_v13 = vpop.permute.xlu2 %4987 }
 0x392   :  { %v4990_v19 = vunpack.i.h.bf16 %v4988_v13  ;;  %v4989_v51 = vunpack.i.l.bf16 %v4988_v13 }
 0x393   :  { %v4958_v2 = vpop.permute.xlu1 %4957 }
 0x394   :  { %v4960_v28 = vunpack.i.h.bf16 %v4958_v2  ;;  %v4959_v22 = vunpack.i.l.bf16 %v4958_v2 }
 0x396   :  { %v1841_v12 = vsel %vm1840_vm4, %v1832_v49, %v4959_v22  ;;  %v1842_v24 = vsel %vm1840_vm4, %v1833_v20, %v4960_v28 }
 0x397   :  { %v1849_v31 = vpack.c.bf16 %v1842_v24, %v1841_v12 }
 0x399   :  { %1957 = vmatmul.bf16.vlgmr.msrb.gmra.mxu1 %v1849_v31 }
 0x39b   :  { %v4963_v16 = vpop.permute.xlu1 %4962 }
 0x39c   :  { %v4965_v35 = vunpack.i.h.bf16 %v4963_v16  ;;  %v4964_v8 = vunpack.i.l.bf16 %v4963_v16  ;;  %v5003_v5 = vpop.permute.xlu2 %5002 }
 0x39d   :  { %v5005_v10 = vunpack.i.h.bf16 %v5003_v5  ;;  %v5004_v27 = vunpack.i.l.bf16 %v5003_v5 }
 0x39e   :  { %v1826_v9 = vsel %vm1822_vm2, %v6168_v57, %v4965_v35  ;;  %v1825_v50 = vsel %vm1822_vm2, %v6148_v58, %v4964_v8 }
 0x39f   :  { %v1834_v45 = vsel %vm1831_vm3, %v1825_v50, %v4969_v34  ;;  %v1835_v33 = vsel %vm1831_vm3, %v1826_v9, %v4970_v25 }
 0x3a0   :  { %v1843_v17 = vsel %vm1840_vm4, %v1834_v45, %v4974_v14  ;;  %v1844_v46 = vsel %vm1840_vm4, %v1835_v33, %v4975_v11 }
 0x3a1   :  { %v1851_v38 = vpack.c.bf16 %v1844_v46, %v1843_v17 }
 0x3a5   :  { %v4983_v57 = vpop.permute.xlu1 %4982 }
 0x3a6   :  { %v4985_v58 = vunpack.i.h.bf16 %v4983_v57  ;;  %v4984_v44 = vunpack.i.l.bf16 %v4983_v57 }
 0x3a8   :  { %v1836_v30 = vsel %vm1831_vm3, %v1827_v6, %v4984_v44  ;;  %v1837_v59 = vsel %vm1831_vm3, %v1828_v15, %v4985_v58 }
 0x3a9   :  { %1962 = vmatmul.bf16.gmra.mxu1 %v1851_v38  ;;  %v1845_v41 = vsel %vm1840_vm4, %v1836_v30, %v4989_v51  ;;  %v1846_v37 = vsel %vm1840_vm4, %v1837_v59, %v4990_v19 }
 0x3aa   :  { %v1853_v47 = vpack.c.bf16 %v1846_v37, %v1845_v41 }
 0x3ad   :  { %v4998_v40 = vpop.permute.xlu1 %4997 }
 0x3ae   :  { %v5000_v3 = vunpack.i.h.bf16 %v4998_v40  ;;  %v4999_v52 = vunpack.i.l.bf16 %v4998_v40 }
 0x3b0   :  { %v1838_v29 = vsel %vm1831_vm3, %v1829_v26, %v4999_v52  ;;  %v1839_v42 = vsel %vm1831_vm3, %v1830_v63, %v5000_v3 }
 0x3b1   :  { %v1847_v4 = vsel %vm1840_vm4, %v1838_v29, %v5004_v27  ;;  %v1848_v53 = vsel %vm1840_vm4, %v1839_v42, %v5005_v10 }
 0x3b2   :  { %v1855_v1 = vpack.c.bf16 %v1848_v53, %v1847_v4 }
 0x3b9   :  { %1967 = vmatmul.bf16.gmra.mxu1 %v1853_v47 }
 0x3c9   :  { %1972 = vmatmul.bf16.gmra.mxu1 %v1855_v1 }
 0x3d0   :  { %v1987_v36 = vpop.f32.mrf.mxu2 }
 0x3d8   :  { %v1989_v60 = vpop.f32.mrf.mxu2 }
 0x3e0   :  { %v1992_v28 = vpop.f32.mrf.mxu2 }
 0x3e8   :  { %v1994_v50 = vpop.f32.mrf.mxu2 }
 0x3f0   :  { %v1997_v44 = vpop.f32.mrf.mxu2 }
 0x3f8   :  { %v1999_v54 = vpop.f32.mrf.mxu2 }
 0x416   :  { %v1958_v61 = vpop.f32.mrf.mxu1 }
 0x417   :  { %v1988_v2 = vadd.f32 %v1987_v36, %v1958_v61  ;;  %v2002_v36 = vpop.f32.mrf.mxu2 }
 0x419   :  { %v2011_v43 = vmul.f32 %v6442_v0, %v1988_v2 }
 0x41b   :  { %v2023_v18 = vadd.f32 %v6445_v23, %v2011_v43 }
 0x41d   :  { %v2031_v22 = vmax.f32 %v2023_v18, 0.0 }
 0x41e   :  { %v1960_v20 = vpop.f32.mrf.mxu1 }
 0x41f   :  { %v2047_v49 = vrot.slane %v2031_v22, 2  ;;  %v2048_v12 = vrot.slane %v2031_v22, 4  ;;  %v2049_v24 = vrot.slane %v2031_v22, 6  ;;  %v1990_v21 = vadd.f32 %v1989_v60, %v1960_v20 }
 0x421   :  { %v6449_v31 = vmax.f32 %v2031_v22, %v2047_v49  ;;  %v6451_v16 = vmax.f32 %v2048_v12, %v2049_v24  ;;  %v2012_v35 = vmul.f32 %v6442_v0, %v1990_v21 }
 0x423   :  { %2129 = vst [vmem:[#allocation1 + $0x2] ss:$4 sm:$0xff] %v6449_v31  ;;  %v2024_v8 = vadd.f32 %v6445_v23, %v2012_v35 }
 0x424   :  { %2131 = vst [vmem:[#allocation1 + $0x3] ss:$4 sm:$0xff] %v6451_v16 }
 0x425   :  { %v2032_v9 = vmax.f32 %v2024_v8, 0.0  ;;  %v2004_v8 = vpop.f32.mrf.mxu2 }
 0x426   :  { %v1963_v25 = vpop.f32.mrf.mxu1 }
 0x427   :  { %v2050_v34 = vrot.slane %v2032_v9, 2  ;;  %v2051_v32 = vrot.slane %v2032_v9, 4  ;;  %v2052_v45 = vrot.slane %v2032_v9, 6  ;;  %v1993_v33 = vadd.f32 %v1992_v28, %v1963_v25 }
 0x429   :  { %v6457_v11 = vmax.f32 %v2032_v9, %v2050_v34  ;;  %v6459_v14 = vmax.f32 %v2051_v32, %v2052_v45  ;;  %v2013_v17 = vmul.f32 %v6442_v0, %v1993_v33 }
 0x42b   :  { %2133 = vst [vmem:[#allocation1 + $0x20] ss:$4 sm:$0xff] %v6457_v11  ;;  %v2025_v46 = vadd.f32 %v6445_v23, %v2013_v17  ;;  %v6478_v3 = vld.sshfl [vmem:[#allocation1] sm:$0xff pattern:$0x73625140] }
 0x42c   :  { %2135 = vst [vmem:[#allocation1 + $0x21] ss:$4 sm:$0xff] %v6459_v14 }
 0x42d   :  { %v2033_v38 = vmax.f32 %v2025_v46, 0.0 }
 0x42e   :  { %v1965_v56 = vpop.f32.mrf.mxu1 }
 0x42f   :  { %v2053_v57 = vrot.slane %v2033_v38, 2  ;;  %v2054_v55 = vrot.slane %v2033_v38, 4  ;;  %v2055_v7 = vrot.slane %v2033_v38, 6  ;;  %v1995_v58 = vadd.f32 %v1994_v50, %v1965_v56 }
 0x431   :  { %v6465_v13 = vmax.f32 %v2033_v38, %v2053_v57  ;;  %v6467_v15 = vmax.f32 %v2054_v55, %v2055_v7  ;;  %v2014_v6 = vmul.f32 %v6442_v0, %v1995_v58  ;;  %v4820_v38 = vld [vmem:[%s5253_s3 + $0x38] sm:$0xff] }
 0x432   :  { %2408 = vmatpush.bf16.msrb.mxu3 %v4820_v38 }
 0x433   :  { %2137 = vst [vmem:[#allocation1 + $0x22] ss:$4 sm:$0xff] %v6465_v13  ;;  %v2026_v30 = vadd.f32 %v6445_v23, %v2014_v6 }
 0x434   :  { %2139 = vst [vmem:[#allocation1 + $0x23] ss:$4 sm:$0xff] %v6467_v15 }
 0x435   :  { %v2034_v59 = vmax.f32 %v2026_v30, 0.0 }
 0x436   :  { %v1968_v19 = vpop.f32.mrf.mxu1 }
 0x437   :  { %v2056_v51 = vrot.slane %v2034_v59, 2  ;;  %v2057_v41 = vrot.slane %v2034_v59, 4  ;;  %v2058_v37 = vrot.slane %v2034_v59, 6  ;;  %v1998_v47 = vadd.f32 %v1997_v44, %v1968_v19 }
 0x439   :  { %v6473_v39 = vmax.f32 %v2034_v59, %v2056_v51  ;;  %v6475_v40 = vmax.f32 %v2057_v41, %v2058_v37  ;;  %v2015_v48 = vmul.f32 %v6442_v0, %v1998_v47 }
 0x43b   :  { %2142 = vst [vmem:[#allocation1] ss:$4 sm:$0xff] %v6473_v39  ;;  %v2027_v52 = vadd.f32 %v6445_v23, %v2015_v48  ;;  %v6494_v49 = vld.sshfl [vmem:[#allocation1 + $0x20] sm:$0xff pattern:$0x73625140] }
 0x43c   :  { %2143 = vst [vmem:[#allocation1 + $0x1] ss:$4 sm:$0xff] %v6475_v40 }
 0x43d   :  { %v2035_v5 = vmax.f32 %v2027_v52, 0.0  ;;  %v4817_v52 = vld [vmem:[%s5253_s3 + $0x20] sm:$0xff] }
 0x43e   :  { %v1970_v63 = vpop.f32.mrf.mxu1 }
 0x43f   :  { %v2059_v26 = vrot.slane %v2035_v5, 2  ;;  %v2060_v29 = vrot.slane %v2035_v5, 4  ;;  %v2061_v42 = vrot.slane %v2035_v5, 6  ;;  %v2000_v10 = vadd.f32 %v1999_v54, %v1970_v63  ;;  %v4816_v63 = vld [vmem:[%s5253_s3 + $0x18] sm:$0xff] }
 0x441   :  { %v6483_v27 = vmax.f32 %v2035_v5, %v2059_v26  ;;  %v6485_v4 = vmax.f32 %v2060_v29, %v2061_v42  ;;  %v2016_v53 = vmul.f32 %v6442_v0, %v2000_v10  ;;  %v4815_v29 = vld [vmem:[%s5253_s3 + $0x10] sm:$0xff]  ;;  %v4814_v10 = vld [vmem:[%s5253_s3 + $0x8] sm:$0xff] }
 0x443   :  { %2144 = vst [vmem:[#allocation1 + $0x2] ss:$4 sm:$0xff] %v6483_v27  ;;  %v2028_v1 = vadd.f32 %v6445_v23, %v2016_v53 }
 0x444   :  { %2145 = vst [vmem:[#allocation1 + $0x3] ss:$4 sm:$0xff] %v6485_v4 }
 0x445   :  { %v2036_v60 = vmax.f32 %v2028_v1, 0.0 }
 0x446   :  { %v1973_v61 = vpop.f32.mrf.mxu1 }
 0x447   :  { %v2062_v2 = vrot.slane %v2036_v60, 2  ;;  %v2003_v43 = vadd.f32 %v2002_v36, %v1973_v61  ;;  %v2063_v18 = vrot.slane %v2036_v60, 4  ;;  %v2064_v28 = vrot.slane %v2036_v60, 6 }
 0x449   :  { %v6491_v22 = vmax.f32 %v2036_v60, %v2062_v2  ;;  %v2017_v20 = vmul.f32 %v6442_v0, %v2003_v43  ;;  %v6501_v21 = vmax.f32 %v2063_v18, %v2064_v28 }
 0x44b   :  { %v6496_v12 = vld.sshfl [vmem:[#allocation1] sm:$0xff pattern:$0x73625140]  ;;  %v2029_v24 = vadd.f32 %v6445_v23, %v2017_v20  ;;  %2146 = vst [vmem:[#allocation1 + $0x20] ss:$4 sm:$0xff] %v6491_v22 }
 0x44c   :  { %2157 = vst [vmem:[#allocation1] ss:$4 sm:$0xff] %v7122_v62 }
 0x44d   :  { %2159 = vst [vmem:[#allocation1 + $0x1] ss:$4 sm:$0xff] %v6449_v31  ;;  %v2037_v35 = vmax.f32 %v2029_v24, 0.0 }
 0x44e   :  { %2161 = vst [vmem:[#allocation1 + $0x2] ss:$4 sm:$0xff] %v6451_v16  ;;  %v1975_v9 = vpop.f32.mrf.mxu1 }
 0x44f   :  { %2163 = vst [vmem:[#allocation1 + $0x3] ss:$4 sm:$0xff] %v6457_v11  ;;  %v2065_v50 = vrot.slane %v2037_v35, 2  ;;  %v2066_v25 = vrot.slane %v2037_v35, 4  ;;  %v2067_v34 = vrot.slane %v2037_v35, 6  ;;  %v2005_v32 = vadd.f32 %v2004_v8, %v1975_v9 }
 0x450   :  { %2147 = vst [vmem:[#allocation1 + $0x21] ss:$4 sm:$0xff] %v6501_v21 }
 0x451   :  { %v6507_v45 = vmax.f32 %v2037_v35, %v2065_v50  ;;  %v6509_v33 = vmax.f32 %v2066_v25, %v2067_v34  ;;  %v2018_v17 = vmul.f32 %v6442_v0, %v2005_v32 }
 0x453   :  { %v2030_v46 = vadd.f32 %v6445_v23, %v2018_v17  ;;  %2148 = vst [vmem:[#allocation1 + $0x22] ss:$4 sm:$0xff] %v6507_v45 }
 0x454   :  { %2149 = vst [vmem:[#allocation1 + $0x23] ss:$4 sm:$0xff] %v6509_v33 }
 0x455   :  { %v2038_v0 = vmax.f32 %v2030_v46, 0.0 }
 0x456   :  { %v2172_v56 = vld.sshfl [vmem:[#allocation1] sm:$0xff pattern:$0x73625140] }
 0x457   :  { %2174 = vst [vmem:[#allocation1] ss:$4 sm:$0xff] %v6475_v40  ;;  %v2068_v55 = vrot.slane %v2038_v0, 2  ;;  %v2069_v51 = vrot.slane %v2038_v0, 4  ;;  %v2070_v41 = vrot.slane %v2038_v0, 6 }
 0x458   :  { %2175 = vst [vmem:[#allocation1 + $0x1] ss:$4 sm:$0xff] %v6483_v27 }
 0x459   :  { %2176 = vst [vmem:[#allocation1 + $0x2] ss:$4 sm:$0xff] %v6485_v4  ;;  %v6531_v44 = vmax.f32 %v2038_v0, %v2068_v55  ;;  %v2110_v48 = vmax.f32 %v2069_v51, %v2070_v41  ;;  %v5052_v51 = vld [vmem:[%s5258_s8] ss:$0 sm:$0xff]  ;;  %s7138_s8 = sld [smem:[#allocation13_spill]] }
 0x45a   :  { %2177 = vst [vmem:[#allocation1 + $0x3] ss:$4 sm:$0xff] %v6491_v22 }
 0x45b   :  { %v6520_v57 = vld.sshfl [vmem:[#allocation1 + $0x20] sm:$0xff pattern:$0x73625140] }
 0x45c   :  { %2165 = vst [vmem:[#allocation1 + $0x20] ss:$4 sm:$0xff] %v6459_v14 }
 0x45d   :  { %2167 = vst [vmem:[#allocation1 + $0x21] ss:$4 sm:$0xff] %v6465_v13 }
 0x45e   :  { %2169 = vst [vmem:[#allocation1 + $0x22] ss:$4 sm:$0xff] %v6467_v15 }
 0x45f   :  { %2171 = vst [vmem:[#allocation1 + $0x23] ss:$4 sm:$0xff] %v6473_v39 }
 0x461   :  { %v2182_v23 = vld.sshfl [vmem:[#allocation1] sm:$0xff pattern:$0x73625140] }
 0x462   :  { %2197 = vst [vmem:[#allocation1] ss:$4 sm:$0xff] %v6449_v31  ;;  %v4819_v31 = vld [vmem:[%s5253_s3 + $0x30] sm:$0xff] }
 0x463   :  { %2199 = vst [vmem:[#allocation1 + $0x1] ss:$4 sm:$0xff] %v6451_v16  ;;  %2409 = vmatpush.bf16.msrb.mxu3 %v4819_v31 }
 0x464   :  { %2201 = vst [vmem:[#allocation1 + $0x2] ss:$4 sm:$0xff] %v6457_v11 }
 0x465   :  { %2203 = vst [vmem:[#allocation1 + $0x3] ss:$4 sm:$0xff] %v6459_v14 }
 0x466   :  { %v2173_v7 = vld.sshfl [vmem:[#allocation1 + $0x20] sm:$0xff pattern:$0x73625140] }
 0x467   :  { %v5006_v58 = vpack.i.bf16 %v2173_v7, %v2172_v56  ;;  %2178 = vst [vmem:[#allocation1 + $0x20] ss:$4 sm:$0xff] %v6501_v21 }
 0x468   :  { %2179 = vst [vmem:[#allocation1 + $0x21] ss:$4 sm:$0xff] %v6507_v45 }
 0x469   :  { %5007 = vrot.lane.b32.xlu0 %v5006_v58, %s5201_s0  ;;  %2180 = vst [vmem:[#allocation1 + $0x22] ss:$4 sm:$0xff] %v6509_v33 }
 0x46a   :  { %2181 = vst [vmem:[#allocation1 + $0x23] ss:$4 sm:$0xff] %v6531_v44 }
 0x46c   :  { %v2212_v6 = vld.sshfl [vmem:[#allocation1] sm:$0xff pattern:$0x73625140] }
 0x46d   :  { %2214 = vst [vmem:[#allocation1] ss:$4 sm:$0xff] %v6483_v27 }
 0x46e   :  { %2215 = vst [vmem:[#allocation1 + $0x1] ss:$4 sm:$0xff] %v6485_v4 }
 0x46f   :  { %2216 = vst [vmem:[#allocation1 + $0x2] ss:$4 sm:$0xff] %v6491_v22 }
 0x470   :  { %2217 = vst [vmem:[#allocation1 + $0x3] ss:$4 sm:$0xff] %v6501_v21 }
 0x471   :  { %v2183_v30 = vld.sshfl [vmem:[#allocation1 + $0x20] sm:$0xff pattern:$0x73625140] }
 0x472   :  { %v5021_v59 = vpack.i.bf16 %v2183_v30, %v2182_v23  ;;  %2205 = vst [vmem:[#allocation1 + $0x20] ss:$4 sm:$0xff] %v6465_v13 }
 0x473   :  { %2207 = vst [vmem:[#allocation1 + $0x21] ss:$4 sm:$0xff] %v6467_v15 }
 0x474   :  { %5022 = vrot.lane.b32.xlu0 %v5021_v59, %s5201_s0  ;;  %2209 = vst [vmem:[#allocation1 + $0x22] ss:$4 sm:$0xff] %v6473_v39 }
 0x475   :  { %2211 = vst [vmem:[#allocation1 + $0x23] ss:$4 sm:$0xff] %v6475_v40 }
 0x477   :  { %v2222_v19 = vld.sshfl [vmem:[#allocation1] sm:$0xff pattern:$0x73625140] }
 0x478   :  { %2236 = vst [vmem:[#allocation1] ss:$4 sm:$0xff] %v6451_v16  ;;  %v4818_v16 = vld [vmem:[%s5253_s3 + $0x28] sm:$0xff] }
 0x479   :  { %2238 = vst [vmem:[#allocation1 + $0x1] ss:$4 sm:$0xff] %v6457_v11  ;;  %2410 = vmatpush.bf16.msrb.mxu3 %v4818_v16 }
 0x47a   :  { %2240 = vst [vmem:[#allocation1 + $0x2] ss:$4 sm:$0xff] %v6459_v14 }
 0x47b   :  { %2242 = vst [vmem:[#allocation1 + $0x3] ss:$4 sm:$0xff] %v6465_v13 }
 0x47c   :  { %v2213_v37 = vld.sshfl [vmem:[#allocation1 + $0x20] sm:$0xff pattern:$0x73625140] }
 0x47d   :  { %v5011_v47 = vpack.i.bf16 %v2213_v37, %v2212_v6  ;;  %2218 = vst [vmem:[#allocation1 + $0x20] ss:$4 sm:$0xff] %v6507_v45  ;;  %2411 = vmatpush.bf16.msrb.mxu3 %v4817_v52 }
 0x47e   :  { %2219 = vst [vmem:[#allocation1 + $0x21] ss:$4 sm:$0xff] %v6509_v33 }
 0x47f   :  { %5012 = vrot.lane.b32.xlu1 %v5011_v47, %s5202_s5  ;;  %2220 = vst [vmem:[#allocation1 + $0x22] ss:$4 sm:$0xff] %v6531_v44  ;;  %v5053_v47 = vld [vmem:[%s5263_s14] ss:$0 sm:$0xff]  ;;  %s7139_s14 = sld [smem:[#allocation14_spill]] }
 0x480   :  { %2221 = vst [vmem:[#allocation1 + $0x23] ss:$4 sm:$0xff] %v2110_v48 }
 0x481   :  { %2412 = vmatpush.bf16.msrb.mxu3 %v4816_v63 }
 0x482   :  { %v2251_v54 = vld.sshfl [vmem:[#allocation1] sm:$0xff pattern:$0x73625140] }
 0x483   :  { %2253 = vst [vmem:[#allocation1] ss:$4 sm:$0xff] %v6485_v4 }
 0x484   :  { %2254 = vst [vmem:[#allocation1 + $0x1] ss:$4 sm:$0xff] %v6491_v22 }
 0x485   :  { %2255 = vst [vmem:[#allocation1 + $0x2] ss:$4 sm:$0xff] %v6501_v21  ;;  %2413 = vmatpush.bf16.msrb.mxu3 %v4815_v29 }
 0x486   :  { %2256 = vst [vmem:[#allocation1 + $0x3] ss:$4 sm:$0xff] %v6507_v45 }
 0x487   :  { %v2223_v5 = vld.sshfl [vmem:[#allocation1 + $0x20] sm:$0xff pattern:$0x73625140] }
 0x488   :  { %v5026_v26 = vpack.i.bf16 %v2223_v5, %v2222_v19  ;;  %2244 = vst [vmem:[#allocation1 + $0x20] ss:$4 sm:$0xff] %v6467_v15 }
 0x489   :  { %2246 = vst [vmem:[#allocation1 + $0x21] ss:$4 sm:$0xff] %v6473_v39  ;;  %2414 = vmatpush.bf16.msrb.mxu3 %v4814_v10 }
 0x48a   :  { %5027 = vrot.lane.b32.xlu1 %v5026_v26, %s5202_s5  ;;  %2248 = vst [vmem:[#allocation1 + $0x22] ss:$4 sm:$0xff] %v6475_v40 }
 0x48b   :  { %2250 = vst [vmem:[#allocation1 + $0x23] ss:$4 sm:$0xff] %v6483_v27 }
 0x48d   :  { %v2261_v42 = vld.sshfl [vmem:[#allocation1] sm:$0xff pattern:$0x73625140] }
 0x48e   :  { %2275 = vst [vmem:[#allocation1] ss:$4 sm:$0xff] %v6457_v11 }
 0x48f   :  { %2277 = vst [vmem:[#allocation1 + $0x1] ss:$4 sm:$0xff] %v6459_v14 }
 0x490   :  { %2279 = vst [vmem:[#allocation1 + $0x2] ss:$4 sm:$0xff] %v6465_v13 }
 0x491   :  { %2281 = vst [vmem:[#allocation1 + $0x3] ss:$4 sm:$0xff] %v6467_v15 }
 0x492   :  { %v2252_v53 = vld.sshfl [vmem:[#allocation1 + $0x20] sm:$0xff pattern:$0x73625140] }
 0x493   :  { %v5016_v1 = vpack.i.bf16 %v2252_v53, %v2251_v54  ;;  %2257 = vst [vmem:[#allocation1 + $0x20] ss:$4 sm:$0xff] %v6509_v33 }
 0x494   :  { %2258 = vst [vmem:[#allocation1 + $0x21] ss:$4 sm:$0xff] %v6531_v44 }
 0x495   :  { %5017 = vrot.lane.b32.xlu2 %v5016_v1, %s5203_s9  ;;  %2259 = vst [vmem:[#allocation1 + $0x22] ss:$4 sm:$0xff] %v2110_v48 }
 0x496   :  { %2260 = vst [vmem:[#allocation1 + $0x23] ss:$4 sm:$0xff] %v7122_v62 }
 0x498   :  { %v2290_v11 = vld.sshfl [vmem:[#allocation1] sm:$0xff pattern:$0x73625140] }
 0x499   :  { %2292 = vst [vmem:[#allocation1] ss:$4 sm:$0xff] %v6491_v22 }
 0x49a   :  { %2293 = vst [vmem:[#allocation1 + $0x1] ss:$4 sm:$0xff] %v6501_v21 }
 0x49b   :  { %2294 = vst [vmem:[#allocation1 + $0x2] ss:$4 sm:$0xff] %v6507_v45 }
 0x49c   :  { %2295 = vst [vmem:[#allocation1 + $0x3] ss:$4 sm:$0xff] %v6509_v33 }
 0x49d   :  { %v2262_v14 = vld.sshfl [vmem:[#allocation1 + $0x20] sm:$0xff pattern:$0x73625140] }
 0x49e   :  { %v5031_v13 = vpack.i.bf16 %v2262_v14, %v2261_v42  ;;  %2283 = vst [vmem:[#allocation1 + $0x20] ss:$4 sm:$0xff] %v6473_v39  ;;  %v4813_v39 = vld [vmem:[%s5253_s3] sm:$0xff] }
 0x49f   :  { %2285 = vst [vmem:[#allocation1 + $0x21] ss:$4 sm:$0xff] %v6475_v40  ;;  %2415 = vmatpush.bf16.msrb.mxu3 %v4813_v39  ;;  %v4822_v40 = vld [vmem:[%s5253_s3 + $0x48] sm:$0xff] }
 0x4a0   :  { %5032 = vrot.lane.b32.xlu2 %v5031_v13, %s5203_s9  ;;  %2287 = vst [vmem:[#allocation1 + $0x22] ss:$4 sm:$0xff] %v6483_v27  ;;  %v4821_v27 = vld [vmem:[%s5253_s3 + $0x40] sm:$0xff]  ;;  %s7137_s3 = sld [smem:[#allocation12_spill]] }
 0x4a1   :  { %2289 = vst [vmem:[#allocation1 + $0x23] ss:$4 sm:$0xff] %v6485_v4 }
 0x4a3   :  { %v2300_v15 = vld.sshfl [vmem:[#allocation1] sm:$0xff pattern:$0x73625140]  ;;  %2433 = vmatpush.bf16.msra.mxu3 %v4822_v40 }
 0x4a4   :  { %2508 = vst [vmem:[#allocation1] ss:$4 sm:$0xff] %v7122_v62 }
 0x4a5   :  { %2510 = vst [vmem:[#allocation1 + $0x1] ss:$4 sm:$0xff] %v7122_v62 }
 0x4a7   :  { %2434 = vmatpush.bf16.msra.mxu3 %v4821_v27 }
 0x4a8   :  { %v2291_v36 = vld.sshfl [vmem:[#allocation1 + $0x20] sm:$0xff pattern:$0x73625140] }
 0x4a9   :  { %2296 = vst [vmem:[#allocation1 + $0x20] ss:$4 sm:$0xff] %v6531_v44  ;;  %v2319_v31 = vpack.c.bf16 %v2291_v36, %v2290_v11 }
 0x4aa   :  { %2297 = vst [vmem:[#allocation1 + $0x21] ss:$4 sm:$0xff] %v2110_v48 }
 0x4ab   :  { %2298 = vst [vmem:[#allocation1 + $0x22] ss:$4 sm:$0xff] %v7122_v62 }
 0x4ac   :  { %2299 = vst [vmem:[#allocation1 + $0x23] ss:$4 sm:$0xff] %v7122_v62 }
 0x4db   :  { %v5008_v4 = vpop.permute.xlu0 %5007 }
 0x4dc   :  { %v5010_v60 = vunpack.i.h.bf16 %v5008_v4  ;;  %v5009_v61 = vunpack.i.l.bf16 %v5008_v4 }
 0x4de   :  { %v2307_v22 = vsel %vm1822_vm2, %v6494_v49, %v5010_v60  ;;  %v2306_v20 = vsel %vm1822_vm2, %v6478_v3, %v5009_v61 }
 0x4e6   :  { %v5023_v34 = vpop.permute.xlu0 %5022 }
 0x4e7   :  { %v5025_v32 = vunpack.i.h.bf16 %v5023_v34  ;;  %v5024_v45 = vunpack.i.l.bf16 %v5023_v34 }
 0x4e9   :  { %v2309_v3 = vsel %vm1822_vm2, %v6520_v57, %v5025_v32  ;;  %v2308_v38 = vsel %vm1822_vm2, %v6496_v12, %v5024_v45  ;;  %v2301_v57 = vld.sshfl [vmem:[#allocation1 + $0x20] sm:$0xff pattern:$0x73625140]  ;;  %v4841_v32 = vld [vmem:[%s5268_s19 + $0x90] sm:$0xff] }
 0x4ea   :  { %v2321_v6 = vpack.c.bf16 %v2301_v57, %v2300_v15  ;;  %v4836_v57 = vld [vmem:[%s5268_s19 + $0x68] sm:$0xff] }
 0x4ef   :  { %v5018_v2 = vpop.permute.xlu2 %5017 }
 0x4f0   :  { %v5020_v24 = vunpack.i.h.bf16 %v5018_v2  ;;  %v5019_v21 = vunpack.i.l.bf16 %v5018_v2 }
 0x4f1   :  { %v5013_v43 = vpop.permute.xlu1 %5012 }
 0x4f2   :  { %v5015_v18 = vunpack.i.h.bf16 %v5013_v43  ;;  %v5014_v28 = vunpack.i.l.bf16 %v5013_v43 }
 0x4f4   :  { %v2311_v35 = vsel %vm1831_vm3, %v2307_v22, %v5015_v18  ;;  %v2310_v8 = vsel %vm1831_vm3, %v2306_v20, %v5014_v28 }
 0x4f5   :  { %v2314_v9 = vsel %vm1840_vm4, %v2310_v8, %v5019_v21  ;;  %v2315_v50 = vsel %vm1840_vm4, %v2311_v35, %v5020_v24 }
 0x4f6   :  { %v2318_v25 = vpack.c.bf16 %v2315_v50, %v2314_v9  ;;  %v4842_v50 = vld [vmem:[%s5268_s19 + $0x98] sm:$0xff] }
 0x4f8   :  { %2416 = vmatmul.bf16.vlgmr.msrb.gmra.mxu3 %v2318_v25 }
 0x4f9   :  { %2815 = vmatpush.bf16.msrb.mxu3 %v4842_v50  ;;  %v4583_v50 = vld [vmem:[%s5283_s6 + $0x50] sm:$0xf] }
 0x4fa   :  { %v5033_v46 = vpop.permute.xlu2 %5032 }
 0x4fb   :  { %v5035_v23 = vunpack.i.h.bf16 %v5033_v46  ;;  %v5034_v55 = vunpack.i.l.bf16 %v5033_v46  ;;  %v4839_v46 = vld [vmem:[%s5268_s19 + $0x80] sm:$0xff] }
 0x4fc   :  { %v5028_v33 = vpop.permute.xlu1 %5027 }
 0x4fd   :  { %v5030_v49 = vunpack.i.h.bf16 %v5028_v33  ;;  %v5029_v17 = vunpack.i.l.bf16 %v5028_v33  ;;  %2816 = vmatpush.bf16.msrb.mxu3 %v4841_v32 }
 0x4ff   :  { %v2312_v56 = vsel %vm1831_vm3, %v2308_v38, %v5029_v17  ;;  %v2313_v0 = vsel %vm1831_vm3, %v2309_v3, %v5030_v49  ;;  %v4840_v49 = vld [vmem:[%s5268_s19 + $0x88] sm:$0xff] }
 0x500   :  { %v2316_v7 = vsel %vm1840_vm4, %v2312_v56, %v5034_v55  ;;  %v2317_v58 = vsel %vm1840_vm4, %v2313_v0, %v5035_v23  ;;  %v4838_v55 = vld [vmem:[%s5268_s19 + $0x78] sm:$0xff] }
 0x501   :  { %v2320_v44 = vpack.c.bf16 %v2317_v58, %v2316_v7  ;;  %2817 = vmatpush.bf16.msrb.mxu3 %v4840_v49  ;;  %v4830_v7 = vld [vmem:[%s5268_s19 + $0x38] sm:$0xff]  ;;  %2797 = vmatpush.bf16.msra.mxu2 %v4838_v55  ;;  %v4837_v58 = vld [vmem:[%s5268_s19 + $0x70] sm:$0xff]  ;;  %v4575_v49 = vld [vmem:[%s5283_s6 + $0x40] sm:$0xf] }
 0x502   :  { %2783 = vmatpush.bf16.msra.mxu1 %v4830_v7  ;;  %v4849_v55 = vld [vmem:[%s5283_s6 + $0x34] sm:$0xf] }
 0x505   :  { %2818 = vmatpush.bf16.msrb.mxu3 %v4839_v46  ;;  %2798 = vmatpush.bf16.msra.mxu2 %v4837_v58  ;;  %v4851_v46 = vld [vmem:[%s5283_s6 + $0x44] sm:$0xf] }
 0x508   :  { %2421 = vmatmul.bf16.gmra.mxu3 %v2320_v44  ;;  %v4829_v44 = vld [vmem:[%s5268_s19 + $0x30] sm:$0xff] }
 0x509   :  { %2784 = vmatpush.bf16.msra.mxu1 %v4829_v44  ;;  %2799 = vmatpush.bf16.msra.mxu2 %v4836_v57  ;;  %v4569_v44 = vld [vmem:[%s5283_s6 + $0x38] sm:$0xf0]  ;;  %v4559_v57 = vld [vmem:[%s5283_s6 + $0x20] sm:$0xf] }
 0x518   :  { %4458 = vmatmul.msk.bf16.vlgmr.msra.gmra.mxu3 %vm1822_vm2, %v2319_v31 }
 0x528   :  { %4459 = vmatmul.msk.bf16.gmra.mxu3 %vm1822_vm2, %v2321_v6  ;;  %v4828_v6 = vld [vmem:[%s5268_s19 + $0x28] sm:$0xff] }
 0x529   :  { %2785 = vmatpush.bf16.msra.mxu1 %v4828_v6  ;;  %v4848_v6 = vld [vmem:[%s5283_s6 + $0x24] sm:$0xf0] }
 0x57b   :  { %v2417_v12 = vpop.f32.mrf.mxu3 }
 0x583   :  { %v2419_v30 = vpop.f32.mrf.mxu3 }
 0x58b   :  { %v2422_v59 = vpop.f32.mrf.mxu3 }
 0x593   :  { %v2424_v19 = vpop.f32.mrf.mxu3 }
 0x59b   :  { %v2436_v41 = vpop.f32.mrf.mxu3 }
 0x59c   :  { %v2437_v37 = vadd.f32 %v2436_v41, %v2417_v12 }
 0x59e   :  { %v2450_v48 = vmul.f32 %v5052_v51, %v2437_v37  ;;  %v4825_v37 = vld [vmem:[%s5268_s19 + $0x10] sm:$0xff] }
 0x5a0   :  { %v2458_v16 = vadd.f32 %v5053_v47, %v2450_v48 }
 0x5a2   :  { %v2462_v54 = vmax.f32 %v2458_v16, 0.0  ;;  %v4824_v16 = vld [vmem:[%s5268_s19 + $0x8] sm:$0xff] }
 0x5a3   :  { %v2438_v52 = vpop.f32.mrf.mxu3 }
 0x5a4   :  { %v2470_v5 = vrot.slane %v2462_v54, 2  ;;  %v2471_v63 = vrot.slane %v2462_v54, 4  ;;  %v2472_v26 = vrot.slane %v2462_v54, 6  ;;  %v2439_v29 = vadd.f32 %v2438_v52, %v2419_v30  ;;  %v4835_v30 = vld [vmem:[%s5268_s19 + $0x60] sm:$0xff] }
 0x5a5   :  { %2800 = vmatpush.bf16.msra.mxu2 %v4835_v30  ;;  %v4560_v30 = vor.u32 %v4848_v6, %v4559_v57 }
 0x5a6   :  { %v2494_v42 = vmax.f32 %v2462_v54, %v2470_v5  ;;  %v2495_v10 = vmax.f32 %v2471_v63, %v2472_v26  ;;  %v2451_v53 = vmul.f32 %v5052_v51, %v2439_v29  ;;  %v4823_v63 = vld [vmem:[%s5268_s19] sm:$0xff]  ;;  %v4832_v26 = vld [vmem:[%s5268_s19 + $0x48] sm:$0xff] }
 0x5a7   :  { %v4831_v29 = vld [vmem:[%s5268_s19 + $0x40] sm:$0xff] }
 0x5a8   :  { %2512 = vst [vmem:[#allocation1 + $0x2] ss:$4 sm:$0xff] %v2494_v42  ;;  %v2459_v1 = vadd.f32 %v5053_v47, %v2451_v53 }
 0x5a9   :  { %2514 = vst [vmem:[#allocation1 + $0x3] ss:$4 sm:$0xff] %v2495_v10 }
 0x5aa   :  { %v2463_v11 = vmax.f32 %v2459_v1, 0.0 }
 0x5ab   :  { %v2441_v14 = vpop.f32.mrf.mxu3 }
 0x5ac   :  { %v2473_v13 = vrot.slane %v2463_v11, 2  ;;  %v2474_v15 = vrot.slane %v2463_v11, 4  ;;  %v2475_v36 = vrot.slane %v2463_v11, 6  ;;  %v2442_v39 = vadd.f32 %v2441_v14, %v2422_v59  ;;  %v4827_v59 = vld [vmem:[%s5268_s19 + $0x20] sm:$0xff] }
 0x5ad   :  { %2786 = vmatpush.bf16.msra.mxu1 %v4827_v59  ;;  %v4561_v59 = vld [vmem:[%s5283_s6 + $0x28] sm:$0xf0] }
 0x5ae   :  { %v6614_v40 = vmax.f32 %v2463_v11, %v2473_v13  ;;  %v6616_v27 = vmax.f32 %v2474_v15, %v2475_v36  ;;  %v2452_v4 = vmul.f32 %v5052_v51, %v2442_v39 }
 0x5b0   :  { %2516 = vst [vmem:[#allocation1 + $0x20] ss:$4 sm:$0xff] %v6614_v40  ;;  %v2460_v60 = vadd.f32 %v5053_v47, %v2452_v4  ;;  %v6619_v61 = vld.sshfl [vmem:[#allocation1] sm:$0xff pattern:$0x73625140]  ;;  %v5204_v4 = vmov 0  }
 0x5b1   :  { %2518 = vst [vmem:[#allocation1 + $0x21] ss:$4 sm:$0xff] %v6616_v27  ;;  %5047 = vset.pattern.permute.xlu1 %v5204_v4  ;;  %5046 = vset.pattern.permute.xlu0 %v5204_v4 }
 0x5b2   :  { %v2464_v2 = vmax.f32 %v2460_v60, 0.0  ;;  %2528 = vst [vmem:[#allocation1] ss:$4 sm:$0xff] %v7122_v62  ;;  %v6675_v60 = vld [vmem:[%s5293_s20] sm:$0xff] }
 0x5b3   :  { %v2443_v43 = vpop.f32.mrf.mxu3  ;;  %2530 = vst [vmem:[#allocation1 + $0x1] ss:$4 sm:$0xff] %v2494_v42 }
 0x5b4   :  { %v2476_v18 = vrot.slane %v2464_v2, 2  ;;  %v2477_v28 = vrot.slane %v2464_v2, 4  ;;  %v2478_v22 = vrot.slane %v2464_v2, 6  ;;  %v2444_v20 = vadd.f32 %v2443_v43, %v2424_v19  ;;  %2532 = vst [vmem:[#allocation1 + $0x2] ss:$4 sm:$0xff] %v2495_v10  ;;  %v4834_v19 = vld [vmem:[%s5268_s19 + $0x58] sm:$0xff] }
 0x5b5   :  { %2534 = vst [vmem:[#allocation1 + $0x3] ss:$4 sm:$0xff] %v6614_v40  ;;  %2801 = vmatpush.bf16.msra.mxu2 %v4834_v19  ;;  %v4857_v43 = vld [vmem:[%s5283_s6 + $0x74] sm:$0xf]  ;;  %v4551_v19 = vld [vmem:[%s5283_s6 + $0x10] sm:$0xf] }
 0x5b6   :  { %v2498_v24 = vmax.f32 %v2464_v2, %v2476_v18  ;;  %v2499_v21 = vmax.f32 %v2477_v28, %v2478_v22  ;;  %v2453_v35 = vmul.f32 %v5052_v51, %v2444_v20  ;;  %v4826_v51 = vld [vmem:[%s5268_s19 + $0x18] sm:$0xff]  ;;  %v4591_v20 = vld [vmem:[%s5283_s6 + $0x60] sm:$0xf] }
 0x5b7   :  { %2787 = vmatpush.bf16.msra.mxu1 %v4826_v51  ;;  %v4858_v2 = vld [vmem:[%s5283_s6 + $0x74] sm:$0xf0]  ;;  %v4601_v28 = vld [vmem:[%s5283_s6 + $0x78] sm:$0xf0] }
 0x5b8   :  { %2520 = vst [vmem:[#allocation1 + $0x22] ss:$4 sm:$0xff] %v2498_v24  ;;  %v2461_v8 = vadd.f32 %v5053_v47, %v2453_v35  ;;  %v4833_v47 = vld [vmem:[%s5268_s19 + $0x50] sm:$0xff]  ;;  %v4604_v22 = vor.u32 %v4857_v43, %v4601_v28  ;;  %v4846_v51 = vld [vmem:[%s5283_s6 + $0x14] sm:$0xf0]  ;;  %s7140_s19 = sld [smem:[#allocation15_spill]] }
 0x5b9   :  { %2522 = vst [vmem:[#allocation1 + $0x23] ss:$4 sm:$0xff] %v2499_v21  ;;  %2802 = vmatpush.bf16.msra.mxu2 %v4833_v47  ;;  %v4553_v47 = vld [vmem:[%s5283_s6 + $0x18] sm:$0xf0] }
 0x5ba   :  { %v2465_v9 = vmax.f32 %v2461_v8, 0.0  ;;  %v4593_v8 = vld [vmem:[%s5283_s6 + $0x68] sm:$0xf0] }
 0x5bb   :  { %2788 = vmatpush.bf16.msra.mxu1 %v4825_v37  ;;  %v4845_v37 = vld [vmem:[%s5283_s6 + $0x14] sm:$0xf] }
 0x5bc   :  { %v2479_v25 = vrot.slane %v2465_v9, 2  ;;  %v2543_v34 = vld.sshfl [vmem:[#allocation1] sm:$0xff pattern:$0x73625140]  ;;  %v2480_v3 = vrot.slane %v2465_v9, 4  ;;  %v2481_v38 = vrot.slane %v2465_v9, 6 }
 0x5bd   :  { %2552 = vst [vmem:[#allocation1] ss:$4 sm:$0xff] %v2494_v42  ;;  %2803 = vmatpush.bf16.msra.mxu2 %v4832_v26 }
 0x5be   :  { %2554 = vst [vmem:[#allocation1 + $0x1] ss:$4 sm:$0xff] %v2495_v10  ;;  %v2500_v45 = vmax.f32 %v2465_v9, %v2479_v25  ;;  %v2501_v23 = vmax.f32 %v2480_v3, %v2481_v38  ;;  %v4854_v25 = vld [vmem:[%s5283_s6 + $0x54] sm:$0xf0]  ;;  %v4577_v38 = vld [vmem:[%s5283_s6 + $0x48] sm:$0xf0] }
 0x5bf   :  { %2556 = vst [vmem:[#allocation1 + $0x2] ss:$4 sm:$0xff] %v6614_v40  ;;  %2789 = vmatpush.bf16.msra.mxu1 %v4824_v16  ;;  %v4584_v32 = vor.u32 %v4854_v25, %v4583_v50  ;;  %v4556_v16 = vor.u32 %v4845_v37, %v4553_v47 }
 0x5c0   :  { %v6627_v33 = vld.sshfl [vmem:[#allocation1 + $0x20] sm:$0xff pattern:$0x73625140]  ;;  %2558 = vst [vmem:[#allocation1 + $0x3] ss:$4 sm:$0xff] %v6616_v27 }
 0x5c1   :  { %2536 = vst [vmem:[#allocation1 + $0x20] ss:$4 sm:$0xff] %v6616_v27  ;;  %2804 = vmatpush.bf16.msra.mxu2 %v4831_v29 }
 0x5c2   :  { %2538 = vst [vmem:[#allocation1 + $0x21] ss:$4 sm:$0xff] %v2498_v24 }
 0x5c3   :  { %2540 = vst [vmem:[#allocation1 + $0x22] ss:$4 sm:$0xff] %v2499_v21  ;;  %2790 = vmatpush.bf16.msra.mxu1 %v4823_v63  ;;  %v4545_v63 = vld [vmem:[%s5283_s6 + $0x8] sm:$0xf0] }
 0x5c4   :  { %2542 = vst [vmem:[#allocation1 + $0x23] ss:$4 sm:$0xff] %v2500_v45 }
 0x5c5   :  { %2986 = vmatpush.bf16.msrb.mxu2 %v4604_v22 }
 0x5c7   :  { %v6632_v17 = vld.sshfl [vmem:[#allocation1] sm:$0xff pattern:$0x73625140] }
 0x5c8   :  { %2571 = vst [vmem:[#allocation1] ss:$4 sm:$0xff] %v2495_v10 }
 0x5c9   :  { %2573 = vst [vmem:[#allocation1 + $0x1] ss:$4 sm:$0xff] %v6614_v40 }
 0x5ca   :  { %2575 = vst [vmem:[#allocation1 + $0x2] ss:$4 sm:$0xff] %v6616_v27 }
 0x5cb   :  { %v2544_v56 = vld.sshfl [vmem:[#allocation1 + $0x20] sm:$0xff pattern:$0x73625140]  ;;  %2577 = vst [vmem:[#allocation1 + $0x3] ss:$4 sm:$0xff] %v2498_v24 }
 0x5cc   :  { %v5041_v0 = vpack.i.bf16 %v2544_v56, %v2543_v34  ;;  %2560 = vst [vmem:[#allocation1 + $0x20] ss:$4 sm:$0xff] %v2498_v24  ;;  %v4853_v34 = vld [vmem:[%s5283_s6 + $0x54] sm:$0xf]  ;;  %v4580_v56 = vor.u32 %v4851_v46, %v4577_v38 }
 0x5cd   :  { %2562 = vst [vmem:[#allocation1 + $0x21] ss:$4 sm:$0xff] %v2499_v21 }
 0x5ce   :  { %5042 = vrot.lane.b32.xlu1 %v5041_v0, %s5202_s5  ;;  %2564 = vst [vmem:[#allocation1 + $0x22] ss:$4 sm:$0xff] %v2500_v45  ;;  %v4567_v0 = vld [vmem:[%s5283_s6 + $0x30] sm:$0xf] }
 0x5cf   :  { %2566 = vst [vmem:[#allocation1 + $0x23] ss:$4 sm:$0xff] %v2501_v23 }
 0x5d2   :  { %v2586_v31 = vld.sshfl [vmem:[#allocation1] sm:$0xff pattern:$0x73625140] }
 0x5d3   :  { %2594 = vst [vmem:[#allocation1] ss:$4 sm:$0xff] %v6614_v40 }
 0x5d4   :  { %2596 = vst [vmem:[#allocation1 + $0x1] ss:$4 sm:$0xff] %v6616_v27  ;;  %v6669_v27 = vld [vmem:[%s5293_s20 + $0x8] sm:$0xff]  ;;  %s7143_s20 = sld [smem:[#allocation16_spill]] }
 0x5d5   :  { %2598 = vst [vmem:[#allocation1 + $0x2] ss:$4 sm:$0xff] %v2498_v24  ;;  %3059 = vmatpush.bf16.msra.mxu3 %v6669_v27  ;;  %v4856_v24 = vld [vmem:[%s5283_s6 + $0x64] sm:$0xf0] }
 0x5d6   :  { %v2568_v12 = vld.sshfl [vmem:[#allocation1 + $0x20] sm:$0xff pattern:$0x73625140]  ;;  %2600 = vst [vmem:[#allocation1 + $0x3] ss:$4 sm:$0xff] %v2499_v21  ;;  %v4592_v35 = vor.u32 %v4856_v24, %v4591_v20 }
 0x5d7   :  { %2579 = vst [vmem:[#allocation1 + $0x20] ss:$4 sm:$0xff] %v2499_v21  ;;  %v4855_v21 = vld [vmem:[%s5283_s6 + $0x64] sm:$0xf] }
 0x5d8   :  { %2581 = vst [vmem:[#allocation1 + $0x21] ss:$4 sm:$0xff] %v2500_v45  ;;  %v4596_v9 = vor.u32 %v4855_v21, %v4593_v8 }
 0x5d9   :  { %2583 = vst [vmem:[#allocation1 + $0x22] ss:$4 sm:$0xff] %v2501_v23  ;;  %3060 = vmatpush.bf16.msra.mxu3 %v6675_v60 }
 0x5da   :  { %2585 = vst [vmem:[#allocation1 + $0x23] ss:$4 sm:$0xff] %v7122_v62  ;;  %2987 = vmatpush.bf16.msrb.mxu2 %v4596_v9 }
 0x5dd   :  { %v2609_v54 = vld.sshfl [vmem:[#allocation1] sm:$0xff pattern:$0x73625140] }
 0x5e1   :  { %v2587_v41 = vld.sshfl [vmem:[#allocation1 + $0x20] sm:$0xff pattern:$0x73625140] }
 0x5e2   :  { %v5036_v48 = vpack.i.bf16 %v2587_v41, %v2586_v31  ;;  %2602 = vst [vmem:[#allocation1 + $0x20] ss:$4 sm:$0xff] %v2500_v45  ;;  %v4585_v45 = vld [vmem:[%s5283_s6 + $0x58] sm:$0xf0]  ;;  %v4572_v31 = vor.u32 %v4849_v55, %v4569_v44 }
 0x5e3   :  { %2604 = vst [vmem:[#allocation1 + $0x21] ss:$4 sm:$0xff] %v2501_v23  ;;  %v4850_v23 = vld [vmem:[%s5283_s6 + $0x34] sm:$0xf0] }
 0x5e4   :  { %5037 = vrot.lane.b32.xlu0 %v5036_v48, %s5202_s5  ;;  %2606 = vst [vmem:[#allocation1 + $0x22] ss:$4 sm:$0xff] %v7122_v62  ;;  %v4568_v58 = vor.u32 %v4850_v23, %v4567_v0  ;;  %v4552_v48 = vor.u32 %v4846_v51, %v4551_v19 }
 0x5e5   :  { %2608 = vst [vmem:[#allocation1 + $0x23] ss:$4 sm:$0xff] %v7122_v62 }
 0x5ec   :  { %v2610_v52 = vld.sshfl [vmem:[#allocation1 + $0x20] sm:$0xff pattern:$0x73625140] }
 0x5ed   :  { %v2619_v5 = vpack.c.bf16 %v2610_v52, %v2609_v54  ;;  %v4543_v54 = vld [vmem:[%s5283_s6] sm:$0xf]  ;;  %v4844_v52 = vld [vmem:[%s5283_s6 + $0x4] sm:$0xf0] }
 0x5ef   :  { %4540 = vmatmul.msk.bf16.vlgmr.msrb.gmra.mxu3 %vm1831_vm3, %v2619_v5  ;;  %v4843_v5 = vld [vmem:[%s5283_s6 + $0x4] sm:$0xf] }
 0x5ff   :  { %3061 = vmatmul.bf16.vlgmr.msra.gmra.mxu3 %v5204_v4 }
 0x640   :  { %v5043_v42 = vpop.permute.xlu1 %5042 }
 0x641   :  { %v5045_v10 = vunpack.i.h.bf16 %v5043_v42  ;;  %v5044_v53 = vunpack.i.l.bf16 %v5043_v42  ;;  %v4544_v42 = vor.u32 %v4844_v52, %v4543_v54 }
 0x643   :  { %v2614_v62 = vsel %vm1831_vm3, %v6627_v33, %v5045_v10  ;;  %v2613_v1 = vsel %vm1831_vm3, %v6619_v61, %v5044_v53  ;;  %v4599_v61 = vld [vmem:[%s5283_s6 + $0x70] sm:$0xf]  ;;  %v4588_v33 = vor.u32 %v4853_v34, %v4585_v45  ;;  %v4548_v53 = vor.u32 %v4843_v5, %v4545_v63 }
 0x644   :  { %v2617_v11 = vpack.c.bf16 %v2614_v62, %v2613_v1  ;;  %v4600_v18 = vor.u32 %v4858_v2, %v4599_v61  ;;  %v5054_v1 = vld [vmem:[%s5273_s24] ss:$0 sm:$0xff]  ;;  %s7141_s24 = sld [smem:[#allocation18_spill]] }
 0x645   :  { %2988 = vmatpush.bf16.msrb.mxu2 %v4588_v33 }
 0x646   :  { %2791 = vmatmul.bf16.vlgmr.msra.gmra.mxu1 %v2617_v11  ;;  %v4862_v11 = vld [vmem:[%s7132_s13 + $0x8] sm:$0xff] }
 0x647   :  { %2973 = vmatpush.bf16.msrb.mxu1 %v4600_v18  ;;  %3087 = vmatpush.bf16.msrb.mxu3 %v4862_v11 }
 0x648   :  { %3408 = vmatpush.bf16.msra.mxu0 %v4862_v11 }
 0x649   :  { %2989 = vmatpush.bf16.msrb.mxu2 %v4580_v56  ;;  %v2887_v56 = vld [vmem:[%s7135_s25] sm:$0x3] }
 0x64a   :  { %v2890_v0 = vperm.slane %v2887_v56, 1  ;;  %v2889_v23 = vperm.slane %v2887_v56, 0 }
 0x64b   :  { %2974 = vmatpush.bf16.msrb.mxu1 %v4592_v35 }
 0x64d   :  { %2990 = vmatpush.bf16.msrb.mxu2 %v4572_v31 }
 0x64f   :  { %2975 = vmatpush.bf16.msrb.mxu1 %v4584_v32 }
 0x656   :  { %v5038_v14 = vpop.permute.xlu0 %5037 }
 0x657   :  { %v5040_v13 = vunpack.i.h.bf16 %v5038_v14  ;;  %v5039_v15 = vunpack.i.l.bf16 %v5038_v14 }
 0x659   :  { %v2616_v36 = vsel %vm1831_vm3, %v2568_v12, %v5040_v13  ;;  %v2615_v39 = vsel %vm1831_vm3, %v6632_v17, %v5039_v15  ;;  %v4852_v17 = vld [vmem:[%s5283_s6 + $0x44] sm:$0xf0]  ;;  %v4847_v12 = vld [vmem:[%s5283_s6 + $0x24] sm:$0xf]  ;;  %v5055_v13 = vld [vmem:[%s7133_s17] ss:$0 sm:$0xff] }
 0x65a   :  { %v2618_v40 = vpack.c.bf16 %v2616_v36, %v2615_v39  ;;  %v4576_v3 = vor.u32 %v4852_v17, %v4575_v49  ;;  %v4564_v41 = vor.u32 %v4847_v12, %v4561_v59  ;;  %v4861_v15 = vld [vmem:[%s7132_s13] sm:$0xff]  ;;  %s7142_s6 = sld [smem:[#allocation21_spill]] }
 0x65b   :  { %v6716_v36 = vld [vmem:[%s7134_s21] ss:$0 sm:$0xff]  ;;  %3088 = vmatpush.bf16.msrb.mxu3 %v4861_v15  ;;  %3409 = vmatpush.bf16.msra.mxu0 %v4861_v15 }
 0x65c   :  { %2805 = vmatmul.bf16.vlgmr.msra.gmra.mxu2 %v2618_v40  ;;  %2976 = vmatpush.bf16.msrb.mxu1 %v4576_v3 }
 0x65d   :  { %2991 = vmatpush.bf16.msrb.mxu2 %v4564_v41 }
 0x65e   :  { %3089 = vmatmul.bf16.vlgmr.msrb.gmra.mxu3 %v5204_v4 }
 0x65f   :  { %3391 = vmatpush.bf16.msra.mxu3 %v6669_v27 }
 0x660   :  { %2977 = vmatpush.bf16.msrb.mxu1 %v4568_v58 }
 0x661   :  { %2992 = vmatpush.bf16.msrb.mxu2 %v4556_v16 }
 0x663   :  { %3392 = vmatpush.bf16.msra.mxu3 %v6675_v60 }
 0x664   :  { %2978 = vmatpush.bf16.msrb.mxu1 %v4560_v30 }
 0x665   :  { %2993 = vmatpush.bf16.msrb.mxu2 %v4548_v53 }
 0x668   :  { %2979 = vmatpush.bf16.msrb.mxu1 %v4552_v48 }
 0x669   :  { %3249 = vmatpush.bf16.msra.mxu2 %v4862_v11 }
 0x66c   :  { %2980 = vmatpush.bf16.msrb.mxu1 %v4544_v42 }
 0x66d   :  { %3250 = vmatpush.bf16.msra.mxu2 %v4861_v15 }
 0x670   :  { %3232 = vmatpush.bf16.msra.mxu1 %v6669_v27 }
 0x672   :  { %v2820_v7 = vpop.f32.mrf.mxu3 }
 0x674   :  { %3233 = vmatpush.bf16.msra.mxu1 %v6675_v60 }
 0x67a   :  { %v2822_v29 = vpop.f32.mrf.mxu3 }
 0x682   :  { %v3062_v61 = vpop.f32.mrf.mxu3 }
 0x683   :  { %v6720_v18 = vadd.f32 %v6716_v36, %v3062_v61 }
 0x685   :  { %3115 = vrot.lane.b32.xlu2 %v6720_v18, %s5202_s5 }
 0x68a   :  { %v3064_v34 = vpop.f32.mrf.mxu3 }
 0x6c3   :  { %v2792_v26 = vpop.f32.mrf.mxu1 }
 0x6cb   :  { %v2794_v2 = vpop.f32.mrf.mxu1 }
 0x6df   :  { %v2806_v10 = vpop.f32.mrf.mxu2  ;;  %v3116_v53 = vpop.permute.xlu2 %3115 }
 0x6e0   :  { %v2807_v62 = vadd.f32 %v2806_v10, %v2792_v26 }
 0x6e1   :  { %v3090_v37 = vpop.f32.mrf.mxu3 }
 0x6e2   :  { %v2821_v14 = vadd.f32 %v2820_v7, %v2807_v62 }
 0x6e4   :  { %v2829_v39 = vmul.f32 %v5054_v1, %v2821_v14 }
 0x6e6   :  { %v2835_v40 = vadd.f32 %v5055_v13, %v2829_v39 }
 0x6e7   :  { %v2808_v43 = vpop.f32.mrf.mxu2 }
 0x6e8   :  { %v2837_v28 = vmax.f32 %v2835_v40, 0.0  ;;  %v2809_v22 = vadd.f32 %v2808_v43, %v2794_v2 }
 0x6e9   :  { %v3092_v48 = vpop.f32.mrf.mxu3 }
 0x6ea   :  { %v2841_v20 = vrot.slane %v2837_v28, 2  ;;  %v2842_v24 = vrot.slane %v2837_v28, 4  ;;  %v2843_v21 = vrot.slane %v2837_v28, 6  ;;  %v2823_v35 = vadd.f32 %v2822_v29, %v2809_v22 }
 0x6ec   :  { %v2853_v8 = vmax.f32 %v2837_v28, %v2841_v20  ;;  %v2854_v9 = vmax.f32 %v2842_v24, %v2843_v21  ;;  %v2830_v50 = vmul.f32 %v5054_v1, %v2823_v35 }
 0x6ee   :  { %2861 = vst [vmem:[#allocation1] ss:$4 sm:$0xff] %v2853_v8  ;;  %v2836_v25 = vadd.f32 %v5055_v13, %v2830_v50  ;;  %v6736_v13 = vld [vmem:[%s7136_s29] ss:$0 sm:$0xff] }
 0x6ef   :  { %2863 = vst [vmem:[#allocation1 + $0x1] ss:$4 sm:$0xff] %v2854_v9 }
 0x6f0   :  { %v2838_v32 = vmax.f32 %v2836_v25, 0.0 }
 0x6f2   :  { %v2844_v45 = vrot.slane %v2838_v32, 2  ;;  %v2845_v33 = vrot.slane %v2838_v32, 4  ;;  %v2846_v49 = vrot.slane %v2838_v32, 6 }
 0x6f4   :  { %v2855_v17 = vmax.f32 %v2838_v32, %v2844_v45  ;;  %v2856_v46 = vmax.f32 %v2845_v33, %v2846_v49 }
 0x6f6   :  { %2865 = vst [vmem:[#allocation1 + $0x2] ss:$4 sm:$0xff] %v2855_v17 }
 0x6f7   :  { %2867 = vst [vmem:[#allocation1 + $0x3] ss:$4 sm:$0xff] %v2856_v46 }
 0x6fe   :  { %v2868_v4 = vld.sshfl [vmem:[#allocation1] sm:$0xff pattern:$0x73625140] }
 0x6ff   :  { %v2870_v3 = vpack.c.bf16 %v2868_v4, %v2868_v4 }
 0x701   :  { %2981 = vmatmul.bf16.vlgmr.msrb.gmra.mxu1 %v2870_v3  ;;  %2994 = vmatmul.bf16.vlgmr.msrb.gmra.mxu2 %v2870_v3 }
 0x702   :  { %3565 = vmatpush.bf16.msrb.mxu2 %v4862_v11  ;;  %3548 = vmatpush.bf16.msrb.mxu1 %v6669_v27 }
 0x706   :  { %3566 = vmatpush.bf16.msrb.mxu2 %v4861_v15  ;;  %3549 = vmatpush.bf16.msrb.mxu1 %v6675_v60  ;;  %v3091_v15 = vadd.f32 %v6736_v13, %v3090_v37 }
 0x77e   :  { %v2982_v38 = vpop.f32.mrf.mxu1 }
 0x77f   :  { %v2983_v44 = vadd.f32 %v2982_v38, %v2889_v23 }
 0x784   :  { %v2995_v55 = vpop.f32.mrf.mxu2 }
 0x785   :  { %v2996_v7 = vadd.f32 %v2995_v55, %v2890_v0 }
 0x786   :  { %v2984_v58 = vpop.f32.mrf.mxu1 }
 0x787   :  { %v3001_v31 = vrot.slane %v2996_v7, 6 }
 0x789   :  { %v3002_v27 = vsel %vm521_vm0, %v2983_v44, %v3001_v31  ;;  %v3004_v57 = vsel %vm3003_vm6, %v2983_v44, %v3001_v31  ;;  %v3007_v6 = vsel %vm3006_vm7, %v2983_v44, %v3001_v31  ;;  %v3010_v60 = vsel %vm3009_vm8, %v3001_v31, %v2983_v44 }
 0x78a   :  { %v3005_v12 = vrot.slane %v3004_v57, 2  ;;  %v3008_v30 = vrot.slane %v3007_v6, 4  ;;  %v3011_v59 = vrot.slane %v3010_v60, 6  ;;  %3018 = vst.msk [vmem:[#allocation2] sm:$0xf] %vm3017_vm9, %v3002_v27 }
 0x78c   :  { %3019 = vst.msk [vmem:[#allocation2 + $0x4] sm:$0xf] %vm3017_vm9, %v3005_v12  ;;  %v2997_v19 = vpop.f32.mrf.mxu2 }
 0x78d   :  { %3020 = vst.msk [vmem:[#allocation2 + $0x8] sm:$0xf] %vm3017_vm9, %v3008_v30 }
 0x78e   :  { %3021 = vst.msk [vmem:[#allocation2 + $0xc] sm:$0xf] %vm3017_vm9, %v3011_v59 }
 0x791   :  { %v3032_v51 = vld [vmem:[#allocation2] sm:$0xf] }
 0x792   :  { %v3094_v41 = vadd.f32 %v6720_v18, %v3032_v51 }
 0x794   :  { %v4621_v47 = vmul.f32 -1.442695, %v3094_v41 }
 0x795   :  { %v3034_v43 = vld [vmem:[#allocation2 + $0xc] sm:$0xf] }
 0x796   :  { %5065 = vpow2.f32 %v4621_v47  ;;  %v3158_v0 = vrot.slane %v3034_v43, 2 }
 0x79c   :  { %v5066_v16 = vpop.eup %5065 }
 0x79d   :  { %v3098_v54 = vadd.f32 1.0, %v5066_v16 }
 0x79f   :  { %5067 = vrcp.f32 %v3098_v54  ;;  %v3110_v26 = vand.u32 2147483648, %v3098_v54  ;;  %v3108_v42 = vand.u32 2147483647, %v3098_v54  ;;  %vm3104_vm11 = vweird.f32 %v3098_v54 }
 0x7a1   :  { %v3111_v62 = vor.u32 1.1754944e-38, %v3110_v26  ;;  %vm3109_vm13 = vcmp.eq.f32.partialorder %v3108_v42, 8.507059e+37 }
 0x7a5   :  { %v5068_v52 = vpop.eup %5067 }
 0x7a6   :  { %v3100_v5 = vmul.f32 %v5068_v52, %v3098_v54  ;;  %vm3105_vm10 = vweird.f32 %v5068_v52 }
 0x7a7   :  { %vm3106_vm12 = vmor %vm3104_vm11, %vm3105_vm10 }
 0x7a8   :  { %v3101_v63 = vsub.f32 1.0, %v3100_v5 }
 0x7aa   :  { %v3102_v29 = vmul.f32 %v5068_v52, %v3101_v63 }
 0x7ac   :  { %v3103_v10 = vadd.f32 %v5068_v52, %v3102_v29 }
 0x7ae   :  { %v3107_v1 = vsel %vm3106_vm12, %v5068_v52, %v3103_v10 }
 0x7af   :  { %v3112_v11 = vsel %vm3109_vm13, %v3111_v62, %v3107_v1 }
 0x7b0   :  { %v3118_v14 = vmul.f32 %v3116_v53, %v3112_v11  ;;  %v3125_v9 = vsub.f32 1.0, %v3112_v11  ;;  %v3131_v25 = vmul.f32 0.0, %v3112_v11 }
 0x7b2   :  { %3120 = vrot.lane.b32.xlu0 %v3118_v14, %s5202_s5  ;;  %v6763_v14 = vld [vmem:[#allocation2 + $0x8] sm:$0xf] }
 0x7ba   :  { %3134 = vrot.lane.b32.xlu0 %v3091_v15, %s5203_s9 }
 0x824   :  { %v3121_v39 = vpop.permute.xlu0 %3120 }
 0x825   :  { %v3123_v40 = vadd.f32 %v3121_v39, %v3032_v51 }
 0x827   :  { %5069 = vtanh.f32 %v3123_v40 }
 0x82c   :  { %v3135_v2 = vpop.permute.xlu0 %3134 }
 0x82d   :  { %v5070_v61 = vpop.eup %5069  ;;  %v3137_v18 = vadd.f32 %v3135_v2, %v3034_v43  ;;  %v3160_v23 = vadd.f32 %v3158_v0, %v3135_v2 }
 0x82e   :  { %3127 = vrot.lane.b32.xlu1 %v5070_v61, %s5203_s9 }
 0x82f   :  { %v4622_v28 = vmul.f32 -1.442695, %v3137_v18  ;;  %v4623_v55 = vmul.f32 -1.442695, %v3160_v23 }
 0x831   :  { %5071 = vpow2.f32 %v4622_v28 }
 0x836   :  { %3180 = vrot.lane.b32.xlu1 %v3091_v15, %s5201_s0  ;;  %v3216_v15 = vld [vmem:[#allocation2 + $0x4] sm:$0xf] }
 0x837   :  { %v5072_v22 = vpop.eup %5071 }
 0x838   :  { %v3141_v20 = vadd.f32 1.0, %v5072_v22 }
 0x83a   :  { %5073 = vrcp.f32 %v3141_v20  ;;  %v3153_v45 = vand.u32 2147483648, %v3141_v20  ;;  %vm3147_vm15 = vweird.f32 %v3141_v20  ;;  %v3151_v49 = vand.u32 2147483647, %v3141_v20 }
 0x83b   :  { %5075 = vpow2.f32 %v4623_v55 }
 0x83c   :  { %v3154_v4 = vor.u32 1.1754944e-38, %v3153_v45  ;;  %vm3152_vm4 = vcmp.eq.f32.partialorder %v3151_v49, 8.507059e+37 }
 0x840   :  { %v5074_v24 = vpop.eup %5073 }
 0x841   :  { %v3143_v21 = vmul.f32 %v5074_v24, %v3141_v20  ;;  %vm3148_vm14 = vweird.f32 %v5074_v24  ;;  %v5076_v7 = vpop.eup %5075 }
 0x842   :  { %vm3149_vm1 = vmor %vm3147_vm15, %vm3148_vm14  ;;  %v3164_v44 = vadd.f32 1.0, %v5076_v7 }
 0x843   :  { %v3144_v35 = vsub.f32 1.0, %v3143_v21 }
 0x844   :  { %5077 = vrcp.f32 %v3164_v44  ;;  %v3176_v59 = vand.u32 2147483648, %v3164_v44  ;;  %vm3170_vm6 = vweird.f32 %v3164_v44  ;;  %v3174_v51 = vand.u32 2147483647, %v3164_v44 }
 0x845   :  { %v3145_v8 = vmul.f32 %v5074_v24, %v3144_v35 }
 0x846   :  { %v3177_v47 = vor.u32 1.1754944e-38, %v3176_v59  ;;  %vm3175_vm8 = vcmp.eq.f32.partialorder %v3174_v51, 8.507059e+37 }
 0x847   :  { %v3146_v32 = vadd.f32 %v5074_v24, %v3145_v8 }
 0x849   :  { %v3150_v46 = vsel %vm3149_vm1, %v5074_v24, %v3146_v32 }
 0x84a   :  { %v3155_v38 = vsel %vm3152_vm4, %v3154_v4, %v3150_v46  ;;  %v5078_v31 = vpop.eup %5077 }
 0x84b   :  { %v3166_v27 = vmul.f32 %v5078_v31, %v3164_v44  ;;  %vm3171_vm5 = vweird.f32 %v5078_v31 }
 0x84c   :  { %vm3172_vm7 = vmor %vm3170_vm6, %vm3171_vm5 }
 0x84d   :  { %v3167_v57 = vsub.f32 1.0, %v3166_v27 }
 0x84f   :  { %v3168_v6 = vmul.f32 %v5078_v31, %v3167_v57 }
 0x851   :  { %v3169_v12 = vadd.f32 %v5078_v31, %v3168_v6 }
 0x853   :  { %v3173_v37 = vsel %vm3172_vm7, %v5078_v31, %v3169_v12 }
 0x854   :  { %v3178_v48 = vsel %vm3175_vm8, %v3177_v47, %v3173_v37 }
 0x855   :  { %v3194_v16 = vsub.f32 1.0, %v3178_v48  ;;  %v3196_v5 = vmul.f32 0.0, %v3178_v48 }
 0x8a0   :  { %v3128_v50 = vpop.permute.xlu1 %3127 }
 0x8a1   :  { %v3130_v34 = vmul.f32 %v3128_v50, %v3125_v9 }
 0x8a3   :  { %v6742_v33 = vadd.f32 %v3131_v25, %v3130_v34 }
 0x8a5   :  { %3199 = vst [vmem:[#allocation1] ss:$4 sm:$0xff] %v6742_v33  ;;  %v3219_v17 = vpack.c.bf16 %v6742_v33, %v6742_v33 }
 0x8a7   :  { %3221 = vrot.lane.b32.xlu2 %v3219_v17, %s5203_s9 }
 0x8a8   :  { %v3181_v3 = vpop.permute.xlu1 %3180 }
 0x8a9   :  { %v3183_v56 = vmul.f32 %v3181_v3, %v3155_v38 }
 0x8ab   :  { %3189 = vrot.lane.b32.xlu0 %v3183_v56, %s5201_s0 }
 0x8ac   :  { %v6753_v26 = vld.sshfl [vmem:[#allocation1] sm:$0xff pattern:$0x73625140] }
 0x8af   :  { %3184 = vrot.lane.b32.xlu2 %v3034_v43, %s5203_s9 }
 0x901   :  { %v3222_v58 = vpop.permute.xlu2 %3221 }
 0x902   :  { %4624 = vmatmul.msk.bf16.vlgmr.msra.gmra.mxu1 %vm1822_vm2, %v3222_v58 }
 0x909   :  { %v3185_v60 = vpop.permute.xlu2 %3184 }
 0x90a   :  { %v3186_v30 = vrot.slane %v3185_v60, 2 }
 0x91d   :  { %v3190_v19 = vpop.permute.xlu0 %3189 }
 0x91e   :  { %v3192_v41 = vadd.f32 %v3190_v19, %v3186_v30 }
 0x920   :  { %5079 = vtanh.f32 %v3192_v41  ;;  %v3320_v41 = vrot.slane %v6763_v14, 2 }
 0x926   :  { %v5080_v54 = vpop.eup %5079 }
 0x927   :  { %v3195_v52 = vmul.f32 %v5080_v54, %v3194_v16 }
 0x929   :  { %v6751_v63 = vadd.f32 %v3196_v5, %v3195_v52 }
 0x92b   :  { %v3239_v29 = vpack.c.bf16 %v6751_v63, %v6751_v63  ;;  %3207 = vst [vmem:[#allocation1] ss:$4 sm:$0xff] %v6751_v63 }
 0x92d   :  { %4625 = vmatmul.msk.bf16.vlgmr.msra.gmra.mxu2 %vm1822_vm2, %v3239_v29 }
 0x932   :  { %v6774_v27 = vld.sshfl [vmem:[#allocation1] sm:$0xff pattern:$0x73625140] }
 0x97f   :  { %v3235_v42 = vpop.f32.mrf.mxu1 }
 0x980   :  { %v3236_v10 = vadd.f32 %v6716_v36, %v3235_v42 }
 0x982   :  { %3277 = vrot.lane.b32.xlu1 %v3236_v10, %s5202_s5  ;;  %v3256_v39 = vadd.f32 %v3236_v10, %v3216_v15 }
 0x984   :  { %v4626_v40 = vmul.f32 -1.442695, %v3256_v39 }
 0x986   :  { %5081 = vpow2.f32 %v4626_v40 }
 0x987   :  { %v3237_v53 = vpop.f32.mrf.mxu1 }
 0x98c   :  { %v5082_v61 = vpop.eup %5081 }
 0x98d   :  { %v3260_v2 = vadd.f32 1.0, %v5082_v61 }
 0x98f   :  { %5083 = vrcp.f32 %v3260_v2  ;;  %v3272_v24 = vand.u32 2147483648, %v3260_v2  ;;  %vm3266_vm10 = vweird.f32 %v3260_v2  ;;  %v3270_v21 = vand.u32 2147483647, %v3260_v2 }
 0x991   :  { %v3273_v8 = vor.u32 1.1754944e-38, %v3272_v24  ;;  %vm3271_vm12 = vcmp.eq.f32.partialorder %v3270_v21, 8.507059e+37 }
 0x995   :  { %v5084_v43 = vpop.eup %5083 }
 0x996   :  { %v3262_v18 = vmul.f32 %v5084_v43, %v3260_v2  ;;  %vm3267_vm9 = vweird.f32 %v5084_v43 }
 0x997   :  { %vm3268_vm11 = vmor %vm3266_vm10, %vm3267_vm9 }
 0x998   :  { %v3263_v28 = vsub.f32 1.0, %v3262_v18 }
 0x99a   :  { %v3264_v22 = vmul.f32 %v5084_v43, %v3263_v28 }
 0x99c   :  { %v3265_v20 = vadd.f32 %v5084_v43, %v3264_v22 }
 0x99e   :  { %v3269_v35 = vsel %vm3268_vm11, %v5084_v43, %v3265_v20 }
 0x99f   :  { %v3274_v9 = vsel %vm3271_vm12, %v3273_v8, %v3269_v35 }
 0x9a0   :  { %v3287_v23 = vsub.f32 1.0, %v3274_v9  ;;  %v3293_v7 = vmul.f32 %v3274_v9, %v6742_v33 }
 0x9b0   :  { %v3252_v62 = vpop.f32.mrf.mxu2 }
 0x9b1   :  { %v3253_v1 = vadd.f32 %v6736_v13, %v3252_v62 }
 0x9b3   :  { %3296 = vrot.lane.b32.xlu1 %v3253_v1, %s5203_s9 }
 0x9b8   :  { %v3254_v11 = vpop.f32.mrf.mxu2 }
 0x9bb   :  { %3346 = vrot.lane.b32.xlu1 %v6763_v14, %s5203_s9 }
 0x9f4   :  { %v3278_v50 = vpop.permute.xlu1 %3277 }
 0x9f5   :  { %v3280_v25 = vmul.f32 %v3278_v50, %v3274_v9 }
 0x9f7   :  { %3282 = vrot.lane.b32.xlu2 %v3280_v25, %s5202_s5  ;;  %v3377_v25 = vld [vmem:[#allocation2 + $0x4] sm:$0xf] }
 0xa25   :  { %v3297_v49 = vpop.permute.xlu1 %3296 }
 0xa26   :  { %v3299_v17 = vadd.f32 %v3297_v49, %v6763_v14  ;;  %v3322_v37 = vadd.f32 %v3320_v41, %v3297_v49 }
 0xa28   :  { %v4627_v46 = vmul.f32 -1.442695, %v3299_v17  ;;  %v4628_v47 = vmul.f32 -1.442695, %v3322_v37 }
 0xa2d   :  { %v3347_v10 = vpop.permute.xlu1 %3346 }
 0xa2e   :  { %v3348_v62 = vrot.slane %v3347_v10, 2 }
 0xa51   :  { %v3283_v34 = vpop.permute.xlu2 %3282 }
 0xa52   :  { %v3285_v32 = vadd.f32 %v3283_v34, %v3216_v15  ;;  %v3376_v34 = vld [vmem:[#allocation2 + $0x8] sm:$0xf] }
 0xa54   :  { %5085 = vtanh.f32 %v3285_v32 }
 0xa55   :  { %5087 = vpow2.f32 %v4627_v46 }
 0xa5a   :  { %v5086_v45 = vpop.eup %5085 }
 0xa5b   :  { %3289 = vrot.lane.b32.xlu0 %v5086_v45, %s5203_s9  ;;  %v5088_v4 = vpop.eup %5087 }
 0xa5c   :  { %v3303_v3 = vadd.f32 1.0, %v5088_v4 }
 0xa5e   :  { %5089 = vrcp.f32 %v3303_v3  ;;  %v3315_v60 = vand.u32 2147483648, %v3303_v3  ;;  %vm3309_vm14 = vweird.f32 %v3303_v3  ;;  %v3313_v12 = vand.u32 2147483647, %v3303_v3 }
 0xa5f   :  { %5091 = vpow2.f32 %v4628_v47 }
 0xa60   :  { %v3316_v59 = vor.u32 1.1754944e-38, %v3315_v60  ;;  %vm3314_vm1 = vcmp.eq.f32.partialorder %v3313_v12, 8.507059e+37 }
 0xa63   :  { %3342 = vrot.lane.b32.xlu0 %v3253_v1, %s5201_s0 }
 0xa64   :  { %v5090_v38 = vpop.eup %5089 }
 0xa65   :  { %v3305_v56 = vmul.f32 %v5090_v38, %v3303_v3  ;;  %vm3310_vm13 = vweird.f32 %v5090_v38  ;;  %v5092_v48 = vpop.eup %5091 }
 0xa66   :  { %vm3311_vm15 = vmor %vm3309_vm14, %vm3310_vm13  ;;  %v3326_v16 = vadd.f32 1.0, %v5092_v48 }
 0xa67   :  { %v3306_v0 = vsub.f32 1.0, %v3305_v56 }
 0xa68   :  { %5093 = vrcp.f32 %v3326_v16  ;;  %v3338_v1 = vand.u32 2147483648, %v3326_v16  ;;  %vm3332_vm5 = vweird.f32 %v3326_v16  ;;  %v3336_v14 = vand.u32 2147483647, %v3326_v16 }
 0xa69   :  { %v3307_v44 = vmul.f32 %v5090_v38, %v3306_v0 }
 0xa6a   :  { %v3339_v40 = vor.u32 1.1754944e-38, %v3338_v1  ;;  %vm3337_vm7 = vcmp.eq.f32.partialorder %v3336_v14, 8.507059e+37 }
 0xa6b   :  { %v3308_v6 = vadd.f32 %v5090_v38, %v3307_v44 }
 0xa6d   :  { %v3312_v33 = vsel %vm3311_vm15, %v5090_v38, %v3308_v6 }
 0xa6e   :  { %v3317_v19 = vsel %vm3314_vm1, %v3316_v59, %v3312_v33  ;;  %v5094_v54 = vpop.eup %5093 }
 0xa6f   :  { %v3328_v52 = vmul.f32 %v5094_v54, %v3326_v16  ;;  %vm3333_vm4 = vweird.f32 %v5094_v54 }
 0xa70   :  { %vm3334_vm6 = vmor %vm3332_vm5, %vm3333_vm4 }
 0xa71   :  { %v3329_v5 = vsub.f32 1.0, %v3328_v52 }
 0xa73   :  { %v3330_v42 = vmul.f32 %v5094_v54, %v3329_v5 }
 0xa75   :  { %v3331_v53 = vadd.f32 %v5094_v54, %v3330_v42 }
 0xa77   :  { %v3335_v39 = vsel %vm3334_vm6, %v5094_v54, %v3331_v53 }
 0xa78   :  { %v3340_v61 = vsel %vm3337_vm7, %v3339_v40, %v3335_v39  ;;  %vm3213_vm7 = vcmask 517376  }
 0xa79   :  { %v3356_v2 = vsub.f32 1.0, %v3340_v61  ;;  %v3358_v28 = vmul.f32 %v3340_v61, %v6751_v63 }
 0xacd   :  { %v3290_v55 = vpop.permute.xlu0 %3289 }
 0xace   :  { %v3292_v58 = vmul.f32 %v3290_v55, %v3287_v23 }
 0xad0   :  { %v6772_v31 = vadd.f32 %v3293_v7, %v3292_v58 }
 0xad2   :  { %v3378_v57 = vpack.c.bf16 %v6772_v31, %v6772_v31  ;;  %3361 = vst [vmem:[#allocation1] ss:$4 sm:$0xff] %v6772_v31 }
 0xad4   :  { %3380 = vrot.lane.b32.xlu2 %v3378_v57, %s5203_s9 }
 0xad5   :  { %v3343_v30 = vpop.permute.xlu0 %3342 }
 0xad6   :  { %v3345_v51 = vmul.f32 %v3343_v30, %v3317_v19 }
 0xad9   :  { %v6786_v20 = vld.sshfl [vmem:[#allocation1] sm:$0xff pattern:$0x73625140] }
 0xadc   :  { %3351 = vrot.lane.b32.xlu2 %v3345_v51, %s5201_s0 }
 0xb2e   :  { %v3381_v29 = vpop.permute.xlu2 %3380 }
 0xb2f   :  { %4629 = vmatmul.msk.bf16.vlgmr.msra.gmra.mxu3 %vm1822_vm2, %v3381_v29 }
 0xb36   :  { %v3352_v11 = vpop.permute.xlu2 %3351 }
 0xb37   :  { %v3354_v15 = vadd.f32 %v3352_v11, %v3348_v62  ;;  %v3479_v62 = vrot.slane %v3377_v25, 2 }
 0xb39   :  { %5095 = vtanh.f32 %v3354_v15 }
 0xb3f   :  { %v5096_v43 = vpop.eup %5095 }
 0xb40   :  { %v3357_v18 = vmul.f32 %v5096_v43, %v3356_v2 }
 0xb42   :  { %v6784_v22 = vadd.f32 %v3358_v28, %v3357_v18 }
 0xb44   :  { %v3398_v24 = vpack.c.bf16 %v6784_v22, %v6784_v22  ;;  %3369 = vst [vmem:[#allocation1] ss:$4 sm:$0xff] %v6784_v22 }
 0xb46   :  { %4630 = vmatmul.msk.bf16.vlgmr.msra.gmra.mxu0 %vm1822_vm2, %v3398_v24 }
 0xbb2   :  { %v3394_v21 = vpop.f32.mrf.mxu3 }
 0xbb3   :  { %v3395_v35 = vadd.f32 %v6716_v36, %v3394_v21 }
 0xbb5   :  { %3436 = vrot.lane.b32.xlu0 %v3395_v35, %s5202_s5  ;;  %v3415_v32 = vadd.f32 %v3395_v35, %v3376_v34 }
 0xbb7   :  { %v4631_v45 = vmul.f32 -1.442695, %v3415_v32 }
 0xbb9   :  { %5097 = vpow2.f32 %v4631_v45 }
 0xbba   :  { %v3396_v8 = vpop.f32.mrf.mxu3 }
 0xbbb   :  { %v3370_v8 = vld.sshfl [vmem:[#allocation1] sm:$0xff pattern:$0x73625140] }
 0xbbf   :  { %v5098_v49 = vpop.eup %5097 }
 0xbc0   :  { %v3419_v17 = vadd.f32 1.0, %v5098_v49 }
 0xbc2   :  { %5099 = vrcp.f32 %v3419_v17  ;;  %v3431_v0 = vand.u32 2147483648, %v3419_v17  ;;  %vm3425_vm9 = vweird.f32 %v3419_v17  ;;  %v3429_v23 = vand.u32 2147483647, %v3419_v17 }
 0xbc3   :  { %v3411_v9 = vpop.f32.mrf.mxu0 }
 0xbc4   :  { %v3412_v63 = vadd.f32 %v6736_v13, %v3411_v9  ;;  %v3432_v7 = vor.u32 1.1754944e-38, %v3431_v0  ;;  %vm3430_vm11 = vcmp.eq.f32.partialorder %v3429_v23, 8.507059e+37 }
 0xbc6   :  { %3455 = vrot.lane.b32.xlu2 %v3412_v63, %s5203_s9 }
 0xbc8   :  { %v5100_v46 = vpop.eup %5099 }
 0xbc9   :  { %v3421_v4 = vmul.f32 %v5100_v46, %v3419_v17  ;;  %vm3426_vm8 = vweird.f32 %v5100_v46 }
 0xbca   :  { %vm3427_vm10 = vmor %vm3425_vm9, %vm3426_vm8 }
 0xbcb   :  { %v3413_v50 = vpop.f32.mrf.mxu0  ;;  %v3422_v3 = vsub.f32 1.0, %v3421_v4 }
 0xbcd   :  { %v3423_v38 = vmul.f32 %v5100_v46, %v3422_v3 }
 0xbce   :  { %3505 = vrot.lane.b32.xlu2 %v3377_v25, %s5203_s9 }
 0xbcf   :  { %v3424_v56 = vadd.f32 %v5100_v46, %v3423_v38 }
 0xbd1   :  { %v3428_v55 = vsel %vm3427_vm10, %v5100_v46, %v3424_v56 }
 0xbd2   :  { %v3433_v58 = vsel %vm3430_vm11, %v3432_v7, %v3428_v55 }
 0xbd3   :  { %v3446_v2 = vsub.f32 1.0, %v3433_v58  ;;  %v3452_v18 = vmul.f32 %v3433_v58, %v6772_v31 }
 0xc20   :  { %v3456_v6 = vpop.permute.xlu2 %3455 }
 0xc21   :  { %v3458_v60 = vadd.f32 %v3456_v6, %v3377_v25  ;;  %v3481_v1 = vadd.f32 %v3479_v62, %v3456_v6 }
 0xc23   :  { %v4632_v12 = vmul.f32 -1.442695, %v3458_v60  ;;  %v4633_v11 = vmul.f32 -1.442695, %v3481_v1 }
 0xc25   :  { %5101 = vpow2.f32 %v4632_v12 }
 0xc27   :  { %v3437_v44 = vpop.permute.xlu0 %3436 }
 0xc28   :  { %v3439_v57 = vmul.f32 %v3437_v44, %v3433_v58  ;;  %v3506_v35 = vpop.permute.xlu2 %3505  ;;  %v6820_v44 = vld [vmem:[#allocation2] sm:$0xf] }
 0xc29   :  { %v3507_v50 = vrot.slane %v3506_v35, 2 }
 0xc2a   :  { %3441 = vrot.lane.b32.xlu1 %v3439_v57, %s5202_s5 }
 0xc2b   :  { %v5102_v33 = vpop.eup %5101 }
 0xc2c   :  { %v3462_v30 = vadd.f32 1.0, %v5102_v33 }
 0xc2e   :  { %5103 = vrcp.f32 %v3462_v30  ;;  %v3474_v54 = vand.u32 2147483648, %v3462_v30  ;;  %vm3468_vm13 = vweird.f32 %v3462_v30  ;;  %v3472_v52 = vand.u32 2147483647, %v3462_v30 }
 0xc30   :  { %v3475_v29 = vor.u32 1.1754944e-38, %v3474_v54  ;;  %vm3473_vm15 = vcmp.eq.f32.partialorder %v3472_v52, 8.507059e+37 }
 0xc32   :  { %3501 = vrot.lane.b32.xlu1 %v3412_v63, %s5201_s0 }
 0xc34   :  { %v5104_v59 = vpop.eup %5103 }
 0xc35   :  { %v3464_v19 = vmul.f32 %v5104_v59, %v3462_v30  ;;  %vm3469_vm12 = vweird.f32 %v5104_v59  ;;  %v6833_v30 = vld [vmem:[#allocation2 + $0xc] sm:$0xf] }
 0xc36   :  { %vm3470_vm14 = vmor %vm3468_vm13, %vm3469_vm12 }
 0xc37   :  { %v3465_v41 = vsub.f32 1.0, %v3464_v19 }
 0xc39   :  { %v3466_v47 = vmul.f32 %v5104_v59, %v3465_v41 }
 0xc3b   :  { %v3467_v48 = vadd.f32 %v5104_v59, %v3466_v47 }
 0xc3d   :  { %v3471_v5 = vsel %vm3470_vm14, %v5104_v59, %v3467_v48 }
 0xc3e   :  { %v3476_v10 = vsel %vm3473_vm15, %v3475_v29, %v3471_v5 }
 0xc9c   :  { %v3442_v51 = vpop.permute.xlu1 %3441 }
 0xc9d   :  { %v3444_v37 = vadd.f32 %v3442_v51, %v3376_v34 }
 0xc9f   :  { %5105 = vtanh.f32 %v3444_v37 }
 0xca0   :  { %5107 = vpow2.f32 %v4633_v11 }
 0xca4   :  { %v3502_v42 = vpop.permute.xlu1 %3501 }
 0xca5   :  { %v5106_v16 = vpop.eup %5105  ;;  %v3504_v53 = vmul.f32 %v3502_v42, %v3476_v10 }
 0xca6   :  { %3448 = vrot.lane.b32.xlu0 %v5106_v16, %s5203_s9  ;;  %v5108_v14 = vpop.eup %5107 }
 0xca7   :  { %v3485_v15 = vadd.f32 1.0, %v5108_v14 }
 0xca9   :  { %5109 = vrcp.f32 %v3485_v15  ;;  %v3497_v25 = vand.u32 2147483648, %v3485_v15  ;;  %vm3491_vm4 = vweird.f32 %v3485_v15  ;;  %v3495_v34 = vand.u32 2147483647, %v3485_v15 }
 0xcab   :  { %v3498_v49 = vor.u32 1.1754944e-38, %v3497_v25  ;;  %vm3496_vm6 = vcmp.eq.f32.partialorder %v3495_v34, 8.507059e+37 }
 0xcae   :  { %3510 = vrot.lane.b32.xlu0 %v3504_v53, %s5201_s0 }
 0xcaf   :  { %v5110_v39 = vpop.eup %5109 }
 0xcb0   :  { %v3487_v40 = vmul.f32 %v5110_v39, %v3485_v15  ;;  %vm3492_vm1 = vweird.f32 %v5110_v39 }
 0xcb1   :  { %vm3493_vm5 = vmor %vm3491_vm4, %vm3492_vm1 }
 0xcb2   :  { %v3488_v61 = vsub.f32 1.0, %v3487_v40 }
 0xcb4   :  { %v3489_v24 = vmul.f32 %v5110_v39, %v3488_v61 }
 0xcb6   :  { %v3490_v63 = vadd.f32 %v5110_v39, %v3489_v24 }
 0xcb8   :  { %v3494_v45 = vsel %vm3493_vm5, %v5110_v39, %v3490_v63  ;;  %v3636_v63 = vrot.slane %v6820_v44, 2 }
 0xcb9   :  { %v3499_v17 = vsel %vm3496_vm6, %v3498_v49, %v3494_v45 }
 0xcba   :  { %v3515_v46 = vsub.f32 1.0, %v3499_v17  ;;  %v3517_v3 = vmul.f32 %v3499_v17, %v6784_v22 }
 0xd18   :  { %v3449_v43 = vpop.permute.xlu0 %3448 }
 0xd19   :  { %v3451_v28 = vmul.f32 %v3449_v43, %v3446_v2 }
 0xd1b   :  { %v6802_v21 = vadd.f32 %v3452_v18, %v3451_v28 }
 0xd1d   :  { %v3535_v9 = vpack.c.bf16 %v6802_v21, %v6802_v21  ;;  %3520 = vst [vmem:[#allocation1] ss:$4 sm:$0xff] %v6802_v21 }
 0xd1f   :  { %3537 = vrot.lane.b32.xlu1 %v3535_v9, %s5203_s9 }
 0xd20   :  { %v3511_v31 = vpop.permute.xlu0 %3510 }
 0xd21   :  { %v3513_v32 = vadd.f32 %v3511_v31, %v3507_v50 }
 0xd23   :  { %5111 = vtanh.f32 %v3513_v32 }
 0xd24   :  { %v6811_v0 = vld.sshfl [vmem:[#allocation1] sm:$0xff pattern:$0x73625140] }
 0xd29   :  { %v5112_v4 = vpop.eup %5111 }
 0xd2a   :  { %v3516_v38 = vmul.f32 %v5112_v4, %v3515_v46 }
 0xd2c   :  { %v6809_v56 = vadd.f32 %v3517_v3, %v3516_v38 }
 0xd2e   :  { %v3555_v23 = vpack.c.bf16 %v6809_v56, %v6809_v56  ;;  %3527 = vst [vmem:[#allocation1] ss:$4 sm:$0xff] %v6809_v56 }
 0xd30   :  { %4635 = vmatmul.msk.bf16.vlgmr.msrb.gmra.mxu2 %vm1822_vm2, %v3555_v23 }
 0xd91   :  { %v3538_v55 = vpop.permute.xlu1 %3537 }
 0xd92   :  { %4634 = vmatmul.msk.bf16.vlgmr.msrb.gmra.mxu1 %vm1822_vm2, %v3538_v55  ;;  %vm3204_vm2 = vcmask 254976  }
 0xdb3   :  { %v3568_v7 = vpop.f32.mrf.mxu2 }
 0xdb4   :  { %v3569_v58 = vadd.f32 %v6736_v13, %v3568_v7 }
 0xdb6   :  { %3612 = vrot.lane.b32.xlu0 %v3569_v58, %s5203_s9 }
 0xdbb   :  { %v3570_v22 = vpop.f32.mrf.mxu2 }
 0xdbe   :  { %3662 = vrot.lane.b32.xlu0 %v6820_v44, %s5203_s9 }
 0xdc6   :  { %3201 = vrot.lane.b32.xlu0 %v6753_v26, %s5203_s9 }
 0xdce   :  { %3371 = vrot.lane.b32.xlu0 %v3370_v8, %s5201_s0 }
 0xe0f   :  { %v3551_v57 = vpop.f32.mrf.mxu1 }
 0xe10   :  { %v3552_v6 = vadd.f32 %v6716_v36, %v3551_v57 }
 0xe12   :  { %3593 = vrot.lane.b32.xlu2 %v3552_v6, %s5202_s5  ;;  %v3572_v26 = vadd.f32 %v3552_v6, %v6833_v30 }
 0xe14   :  { %v4636_v59 = vmul.f32 -1.442695, %v3572_v26  ;;  %v3528_v26 = vld.sshfl [vmem:[#allocation1] sm:$0xff pattern:$0x73625140] }
 0xe16   :  { %5113 = vpow2.f32 %v4636_v59 }
 0xe17   :  { %v3553_v60 = vpop.f32.mrf.mxu1 }
 0xe1a   :  { %3658 = vrot.lane.b32.xlu2 %v3569_v58, %s5201_s0 }
 0xe1c   :  { %v5114_v41 = vpop.eup %5113 }
 0xe1d   :  { %v3576_v37 = vadd.f32 1.0, %v5114_v41 }
 0xe1f   :  { %v3588_v62 = vand.u32 2147483648, %v3576_v37  ;;  %vm3582_vm9 = vweird.f32 %v3576_v37  ;;  %v3586_v1 = vand.u32 2147483647, %v3576_v37 }
 0xe21   :  { %v3589_v15 = vor.u32 1.1754944e-38, %v3588_v62  ;;  %vm3587_vm11 = vcmp.eq.f32.partialorder %v3586_v1, 8.507059e+37 }
 0xe28   :  { %v3613_v13 = vpop.permute.xlu0 %3612 }
 0xe29   :  { %v3615_v36 = vadd.f32 %v3613_v13, %v6820_v44  ;;  %v3638_v50 = vadd.f32 %v3636_v63, %v3613_v13  ;;  %v5208_v63 = vmov 1987475062  }
 0xe2b   :  { %v4637_v51 = vmul.f32 -1.442695, %v3615_v36  ;;  %v4638_v25 = vmul.f32 -1.442695, %v3638_v50  ;;  %v3783_v50 = vunpack.c.l.s4 %v5208_v63  ;;  %v4870_v63 = vld [vmem:[%s7140_s19 + $0x14] sm:$0xf0] }
 0xe2d   :  { %5115 = vpow2.f32 %v4637_v51 }
 0xe2e   :  { %5117 = vrcp.f32 %v3576_v37 }
 0xe30   :  { %v6830_v12 = vpop.permute.xlu0 %3662 }
 0xe31   :  { %v3664_v3 = vrot.slane %v6830_v12, 2 }
 0xe33   :  { %v5116_v47 = vpop.eup %5115 }
 0xe34   :  { %v3619_v48 = vadd.f32 1.0, %v5116_v47  ;;  %v5118_v16 = vpop.eup %5117 }
 0xe35   :  { %v3578_v54 = vmul.f32 %v5118_v16, %v3576_v37  ;;  %vm3583_vm8 = vweird.f32 %v5118_v16 }
 0xe36   :  { %5119 = vrcp.f32 %v3619_v48  ;;  %vm3584_vm10 = vmor %vm3582_vm9, %vm3583_vm8  ;;  %v3631_v43 = vand.u32 2147483648, %v3619_v48  ;;  %vm3625_vm13 = vweird.f32 %v3619_v48  ;;  %v3629_v18 = vand.u32 2147483647, %v3619_v48 }
 0xe37   :  { %v3579_v52 = vsub.f32 1.0, %v3578_v54  ;;  %5121 = vpow2.f32 %v4638_v25  ;;  %v4865_v54 = vld [vmem:[%s7137_s3 + $0x10] sm:$0xff] }
 0xe38   :  { %v3202_v33 = vpop.permute.xlu0 %3201  ;;  %v3632_v24 = vor.u32 1.1754944e-38, %v3631_v43  ;;  %vm3630_vm15 = vcmp.eq.f32.partialorder %v3629_v18, 8.507059e+37  ;;  %v5205_v18 = vmov 269488144  }
 0xe39   :  { %3205 = vst.msk [vmem:[#allocation3] sm:$0x3] %vm3204_vm2, %v3202_v33  ;;  %v3580_v29 = vmul.f32 %v5118_v16, %v3579_v52  ;;  %v4864_v52 = vld [vmem:[%s7137_s3 + $0x8] sm:$0xff] }
 0xe3b   :  { %v3581_v10 = vadd.f32 %v5118_v16, %v3580_v29 }
 0xe3c   :  { %v5120_v5 = vpop.eup %5119 }
 0xe3d   :  { %v3621_v42 = vmul.f32 %v5120_v5, %v3619_v48  ;;  %v3585_v11 = vsel %vm3584_vm10, %v5118_v16, %v3581_v10  ;;  %vm3626_vm12 = vweird.f32 %v5120_v5  ;;  %v5122_v34 = vpop.eup %5121  ;;  %v4866_v16 = vld [vmem:[%s7137_s3 + $0x18] sm:$0xff]  ;;  %vm4283_vm10 = vcmask 9216  }
 0xe3e   :  { %v6838_v40 = vsel %vm3587_vm11, %v3589_v15, %v3585_v11  ;;  %vm3627_vm14 = vmor %vm3625_vm13, %vm3626_vm12  ;;  %v3642_v31 = vadd.f32 1.0, %v5122_v34  ;;  %3751 = vmatpush.bf16.msrb.mxu3 %v4866_v16  ;;  %v5058_v11 = vld [vmem:[%s7138_s8] ss:$0 sm:$0xff] }
 0xe3f   :  { %v3622_v53 = vsub.f32 1.0, %v3621_v42  ;;  %v3603_v59 = vsub.f32 1.0, %v6838_v40  ;;  %v3609_v36 = vmul.f32 %v6838_v40, %v6802_v21 }
 0xe40   :  { %v3372_v19 = vpop.permute.xlu0 %3371  ;;  %5123 = vrcp.f32 %v3642_v31  ;;  %v3654_v38 = vand.u32 2147483648, %v3642_v31  ;;  %vm3648_vm4 = vweird.f32 %v3642_v31 }
 0xe41   :  { %3375 = vst.msk [vmem:[#allocation3 + $0x4] sm:$0x3] %vm3213_vm7, %v3372_v19  ;;  %v3623_v14 = vmul.f32 %v5120_v5, %v3622_v53 }
 0xe42   :  { %v3655_v22 = vor.u32 1.1754944e-38, %v3654_v38  ;;  %3752 = vmatpush.bf16.msrb.mxu3 %v4865_v54 }
 0xe43   :  { %v3624_v2 = vadd.f32 %v5120_v5, %v3623_v14 }
 0xe45   :  { %v3628_v28 = vsel %vm3627_vm14, %v5120_v5, %v3624_v2  ;;  %v4863_v5 = vld [vmem:[%s7137_s3] sm:$0xff] }
 0xe46   :  { %v3633_v35 = vsel %vm3630_vm15, %v3632_v24, %v3628_v28  ;;  %v5124_v32 = vpop.eup %5123  ;;  %3753 = vmatpush.bf16.msrb.mxu3 %v4864_v52  ;;  %v3771_v28 = vunpack.c.l.s4 %v5205_v18  ;;  %v5206_v24 = vmov 842150450   ;;  %v4872_v18 = vld [vmem:[%s7140_s19 + $0x24] sm:$0xf0] }
 0xe47   :  { %v3644_v45 = vmul.f32 %v5124_v32, %v3642_v31  ;;  %vm3649_vm1 = vweird.f32 %v5124_v32 }
 0xe48   :  { %vm3650_vm5 = vmor %vm3648_vm4, %vm3649_vm1  ;;  %v6886_v25 = vunpack.c.0.s8 %v3771_v28  ;;  %v4871_v28 = vld [vmem:[%s7140_s19 + $0x24] sm:$0xf] }
 0xe49   :  { %v3645_v49 = vsub.f32 1.0, %v3644_v45 }
 0xe4a   :  { %3754 = vmatpush.bf16.msrb.mxu3 %v4863_v5 }
 0xe4b   :  { %v3646_v4 = vmul.f32 %v5124_v32, %v3645_v49 }
 0xe6c   :  { %v3594_v39 = vpop.permute.xlu2 %3593 }
 0xe6d   :  { %v3596_v61 = vmul.f32 %v3594_v39, %v6838_v40  ;;  %v5059_v39 = vld [vmem:[%s7139_s14] ss:$0 sm:$0xff] }
 0xe6f   :  { %3598 = vrot.lane.b32.xlu1 %v3596_v61, %s5202_s5 }
 0xe74   :  { %v3659_v8 = vpop.permute.xlu2 %3658 }
 0xe75   :  { %v3661_v9 = vmul.f32 %v3659_v8, %v3633_v35  ;;  %v3775_v35 = vunpack.c.l.s4 %v5206_v24  ;;  %v5207_v8 = vmov 1414812756  }
 0xe77   :  { %3667 = vrot.lane.b32.xlu1 %v3661_v9, %s5201_s0  ;;  %v3779_v9 = vunpack.c.l.s4 %v5207_v8  ;;  %v3776_v34 = vunpack.c.0.s8 %v3775_v35  ;;  %v4676_v35 = vld [vmem:[%s7140_s19 + $0x28] sm:$0xf0] }
 0xe78   :  { %v4679_v8 = vor.u32 %v4871_v28, %v4676_v35 }
 0xe7f   :  { %3209 = vrot.lane.b32.xlu1 %v6774_v27, %s5201_s0  ;;  %v3647_v27 = vadd.f32 %v5124_v32, %v3646_v4 }
 0xe81   :  { %v3651_v58 = vsel %vm3650_vm5, %v5124_v32, %v3647_v27  ;;  %v3784_v32 = vunpack.c.0.s8 %v3783_v50  ;;  %v4869_v50 = vld [vmem:[%s7140_s19 + $0x14] sm:$0xf] }
 0xe87   :  { %3522 = vrot.lane.b32.xlu1 %v6811_v0, %s5203_s9  ;;  %v3652_v0 = vand.u32 2147483647, %v3642_v31  ;;  %v3780_v31 = vunpack.c.0.s8 %v3779_v9  ;;  %v4666_v9 = vld [vmem:[%s7140_s19 + $0x10] sm:$0xf] }
 0xe89   :  { %vm3653_vm6 = vcmp.eq.f32.partialorder %v3652_v0, 8.507059e+37 }
 0xe8a   :  { %v3656_v44 = vsel %vm3653_vm6, %v3655_v22, %v3651_v58 }
 0xe8b   :  { %v3672_v57 = vsub.f32 1.0, %v3656_v44  ;;  %v3674_v13 = vmul.f32 %v3656_v44, %v6809_v56 }
 0xee1   :  { %v3599_v17 = vpop.permute.xlu1 %3598 }
 0xee2   :  { %v3601_v46 = vadd.f32 %v3599_v17, %v6833_v30 }
 0xee4   :  { %5125 = vtanh.f32 %v3601_v46 }
 0xee9   :  { %v3668_v23 = vpop.permute.xlu1 %3667 }
 0xeea   :  { %v5126_v55 = vpop.eup %5125  ;;  %v3670_v7 = vadd.f32 %v3668_v23, %v3664_v3 }
 0xeeb   :  { %3605 = vrot.lane.b32.xlu2 %v5126_v55, %s5203_s9 }
 0xeec   :  { %5127 = vtanh.f32 %v3670_v7 }
 0xef1   :  { %v3210_v6 = vpop.permute.xlu1 %3209 }
 0xef2   :  { %v5128_v60 = vpop.eup %5127  ;;  %3214 = vst.msk [vmem:[#allocation3 + $0x6] sm:$0x3] %vm3213_vm7, %v3210_v6 }
 0xef3   :  { %v3673_v12 = vmul.f32 %v5128_v60, %v3672_v57  ;;  %3363 = vrot.lane.b32.xlu2 %v6786_v20, %s5203_s9 }
 0xef5   :  { %v3675_v33 = vadd.f32 %v3674_v13, %v3673_v12 }
 0xef9   :  { %v3523_v30 = vpop.permute.xlu1 %3522 }
 0xefa   :  { %3525 = vst.msk [vmem:[#allocation3 + $0x4] sm:$0x3] %vm3204_vm2, %v3523_v30 }
 0xefb   :  { %3529 = vrot.lane.b32.xlu2 %v3528_v26, %s5201_s0 }
 0xf01   :  { %v6863_v47 = vld [vmem:[#allocation3 + $0x4] sm:$0x3] }
 0xf45   :  { %v3606_v19 = vpop.permute.xlu2 %3605 }
 0xf46   :  { %v3608_v51 = vmul.f32 %v3606_v19, %v3603_v59 }
 0xf48   :  { %v3610_v56 = vadd.f32 %v3609_v36, %v3608_v51 }
 0xf4a   :  { %3677 = vst [vmem:[#allocation1] ss:$4 sm:$0xff] %v3610_v56 }
 0xf4d   :  { %v3364_v41 = vpop.permute.xlu2 %3363 }
 0xf4e   :  { %3367 = vst.msk [vmem:[#allocation3 + $0x2] sm:$0x3] %vm3204_vm2, %v3364_v41 }
 0xf51   :  { %v3678_v20 = vld.sshfl [vmem:[#allocation1] sm:$0xff pattern:$0x73625140] }
 0xf52   :  { %3679 = vrot.lane.b32.xlu0 %v3678_v20, %s5203_s9  ;;  %3684 = vst [vmem:[#allocation1] ss:$4 sm:$0xff] %v3675_v33 }
 0xf55   :  { %v3530_v37 = vpop.permute.xlu2 %3529 }
 0xf56   :  { %3532 = vst.msk [vmem:[#allocation3 + $0x2] sm:$0x3] %vm3213_vm7, %v3530_v37 }
 0xf59   :  { %v3685_v21 = vld.sshfl [vmem:[#allocation1] sm:$0xff pattern:$0x73625140] }
 0xf5a   :  { %3686 = vrot.lane.b32.xlu1 %v3685_v21, %s5201_s0  ;;  %3702 = vst [vmem:[#allocation1 + $0x2] ss:$4 sm:$0xff] %v6863_v47 }
 0xf5d   :  { %v6867_v48 = vld [vmem:[#allocation3 + $0x2] sm:$0x3] }
 0xf5e   :  { %3700 = vst [vmem:[#allocation1 + $0x1] ss:$4 sm:$0xff] %v6867_v48 }
 0xfc4   :  { %v3680_v29 = vpop.permute.xlu0 %3679 }
 0xfc5   :  { %3682 = vst.msk [vmem:[#allocation3 + $0x6] sm:$0x3] %vm3204_vm2, %v3680_v29 }
 0xfcc   :  { %v6875_v42 = vld [vmem:[#allocation3 + $0x6] sm:$0x3]  ;;  %v3687_v10 = vpop.permute.xlu1 %3686 }
 0xfcd   :  { %3704 = vst [vmem:[#allocation1 + $0x3] ss:$4 sm:$0xff] %v6875_v42 }
 0xfce   :  { %3689 = vst.msk [vmem:[#allocation3] sm:$0x3] %vm3213_vm7, %v3687_v10 }
 0xfd5   :  { %v6879_v53 = vld [vmem:[#allocation3] sm:$0x3] }
 0xfd6   :  { %3698 = vst [vmem:[#allocation1] ss:$4 sm:$0xff] %v6879_v53 }
 0xfdd   :  { %v3705_v62 = vld.sshfl [vmem:[#allocation1] sm:$0xff pattern:$0x73625140] }
 0xfde   :  { %v3707_v1 = vpack.c.bf16 %v3705_v62, %v3705_v62 }
 0xfe0   :  { %4655 = vmatmul.msk.bf16.vlgmr.msrb.gmra.mxu3 %vm1831_vm3, %v3707_v1 }
0x1063   :  { %v3756_v14 = vpop.f32.mrf.mxu3 }
0x1064   :  { %v3757_v15 = vadd.f32 %v5058_v11, %v3756_v14  ;;  %v4682_v14 = vld [vmem:[%s7140_s19 + $0x30] sm:$0xf] }
0x1066   :  { %5129 = vtanh.f32 %v3757_v15  ;;  %v4874_v15 = vld [vmem:[%s7140_s19 + $0x34] sm:$0xf0] }
0x106b   :  { %v3758_v40 = vpop.f32.mrf.mxu3 }
0x106c   :  { %v5130_v61 = vpop.eup %5129  ;;  %v4683_v40 = vor.u32 %v4874_v15, %v4682_v14  ;;  %v4894_v14 = vld [vmem:[%s7142_s6 + $0x18] sm:$0xff]  ;;  %v3956_v15 = vld [vmem:[%s7143_s20] sm:$0x3] }
0x106d   :  { %v3765_v2 = vmul.f32 %v5130_v61, %v5059_v39  ;;  %v4873_v39 = vld [vmem:[%s7140_s19 + $0x34] sm:$0xf]  ;;  %v4684_v61 = vld [vmem:[%s7140_s19 + $0x38] sm:$0xf0] }
0x106e   :  { %3934 = vmatpush.bf16.msrb.mxu0 %v4683_v40  ;;  %v3958_v40 = vperm.slane %v3956_v15, 0 }
0x106f   :  { %v3766_v43 = vsel %vm1831_vm3, %v3765_v2, 0.0  ;;  %v4687_v2 = vor.u32 %v4873_v39, %v4684_v61  ;;  %v3964_v39 = vld [vmem:[%s7144_s7] sm:$0x3]  ;;  %v3959_v61 = vperm.slane %v3956_v15, 1 }
0x1070   :  { %3767 = vadd.xlane.f32.xlu2 %v3766_v43  ;;  %v4674_v43 = vld [vmem:[%s7140_s19 + $0x20] sm:$0xf] }
0x1071   :  { %v4675_v24 = vor.u32 %v4872_v18, %v4674_v43  ;;  %3947 = vmatpush.bf16.msra.mxu1 %v4687_v2  ;;  %v3966_v2 = vperm.slane %v3964_v39, 0  ;;  %v3967_v43 = vperm.slane %v3964_v39, 1 }
0x1073   :  { %3935 = vmatpush.bf16.msrb.mxu0 %v4675_v24 }
0x1075   :  { %3948 = vmatpush.bf16.msra.mxu1 %v4679_v8 }
0x10e3   :  { %v3768_v45 = vpop.xlane.xlu2 %3767 }
0x10e4   :  { %v3773_v49 = vperm.slane %v3768_v45, %v6886_v25  ;;  %v3777_v17 = vperm.slane %v3768_v45, %v3776_v34  ;;  %v3781_v46 = vperm.slane %v3768_v45, %v3780_v31  ;;  %v3785_v4 = vperm.slane %v3768_v45, %v3784_v32  ;;  %v4668_v31 = vld [vmem:[%s7140_s19 + $0x18] sm:$0xf0]  ;;  %v4658_v45 = vld [vmem:[%s7140_s19] sm:$0xf] }
0x10e5   :  { %v4667_v34 = vor.u32 %v4870_v63, %v4666_v9  ;;  %v4671_v32 = vor.u32 %v4869_v50, %v4668_v31 }
0x10e6   :  { %v3790_v27 = vmax.f32 %v3773_v49, %v3777_v17  ;;  %v3791_v3 = vmax.f32 %v3781_v46, %v3785_v4 }
0x10e7   :  { %3936 = vmatpush.bf16.msrb.mxu0 %v4667_v34  ;;  %3949 = vmatpush.bf16.msra.mxu1 %v4671_v32 }
0x10e8   :  { %v3792_v38 = vmax.f32 %v3790_v27, %v3791_v3  ;;  %v4882_v3 = vld [vmem:[%s7141_s24 + $0x38] sm:$0xff] }
0x10e9   :  { %4104 = vmatpush.bf16.msra.mxu2 %v4882_v3  ;;  %v5060_v3 = vld [vmem:[%s7145_s10] ss:$0 sm:$0xff] }
0x10ea   :  { %v3793_v0 = vsub.f32 %v3773_v49, %v3792_v38  ;;  %v3794_v23 = vsub.f32 %v3777_v17, %v3792_v38  ;;  %v3795_v55 = vsub.f32 %v3781_v46, %v3792_v38  ;;  %v3796_v7 = vsub.f32 %v3785_v4, %v3792_v38  ;;  %v4868_v49 = vld [vmem:[%s7140_s19 + $0x4] sm:$0xf0]  ;;  %v4867_v17 = vld [vmem:[%s7140_s19 + $0x4] sm:$0xf]  ;;  %v4660_v4 = vld [vmem:[%s7140_s19 + $0x8] sm:$0xf0] }
0x10eb   :  { %v4659_v46 = vor.u32 %v4868_v49, %v4658_v45  ;;  %v4663_v27 = vor.u32 %v4867_v17, %v4660_v4  ;;  %v4890_v38 = vld [vmem:[%s7141_s24 + $0x78] sm:$0xff]  ;;  %v4893_v49 = vld [vmem:[%s7142_s6 + $0x10] sm:$0xff]  ;;  %v4892_v17 = vld [vmem:[%s7142_s6 + $0x8] sm:$0xff] }
0x10ec   :  { %v3797_v58 = vmul.f32 1.442695, %v3793_v0  ;;  %v3799_v22 = vmul.f32 1.442695, %v3794_v23  ;;  %v3801_v44 = vmul.f32 1.442695, %v3795_v55  ;;  %4117 = vmatpush.bf16.msra.mxu3 %v4890_v38 }
0x10ed   :  { %v3803_v57 = vmul.f32 1.442695, %v3796_v7  ;;  %3937 = vmatpush.bf16.msrb.mxu0 %v4659_v46  ;;  %3950 = vmatpush.bf16.msra.mxu1 %v4663_v27  ;;  %v4881_v0 = vld [vmem:[%s7141_s24 + $0x30] sm:$0xff]  ;;  %v4880_v55 = vld [vmem:[%s7141_s24 + $0x28] sm:$0xff]  ;;  %v4891_v46 = vld [vmem:[%s7142_s6] sm:$0xff] }
0x10ee   :  { %5131 = vpow2.f32 %v3797_v58  ;;  %v4889_v23 = vld [vmem:[%s7141_s24 + $0x70] sm:$0xff]  ;;  %4105 = vmatpush.bf16.msra.mxu2 %v4881_v0  ;;  %v4888_v7 = vld [vmem:[%s7141_s24 + $0x68] sm:$0xff]  ;;  %v4879_v58 = vld [vmem:[%s7141_s24 + $0x20] sm:$0xff] }
0x10ef   :  { %5133 = vpow2.f32 %v3799_v22  ;;  %v4887_v22 = vld [vmem:[%s7141_s24 + $0x60] sm:$0xff]  ;;  %v4902_v4 = vld [vmem:[%s5373_s30 + $0x18] sm:$0xff]  ;;  %v4901_v27 = vld [vmem:[%s5373_s30 + $0x10] sm:$0xff] }
0x10f0   :  { %5135 = vpow2.f32 %v3801_v44  ;;  %4118 = vmatpush.bf16.msra.mxu3 %v4889_v23 }
0x10f1   :  { %5137 = vpow2.f32 %v3803_v57  ;;  %4274 = vmatpush.bf16.msrb.mxu1 %v4902_v4 }
0x10f2   :  { %4106 = vmatpush.bf16.msra.mxu2 %v4880_v55  ;;  %v5061_v55 = vld [vmem:[%s7146_s11] ss:$0 sm:$0xff] }
0x10f4   :  { %v5132_v6 = vpop.eup %5131  ;;  %4119 = vmatpush.bf16.msra.mxu3 %v4888_v7 }
0x10f5   :  { %v5134_v60 = vpop.eup %5133  ;;  %v3805_v13 = vsel %vm521_vm0, %v5132_v6, 0.0  ;;  %4275 = vmatpush.bf16.msrb.mxu1 %v4901_v27 }
0x10f6   :  { %v5136_v12 = vpop.eup %5135  ;;  %v3806_v33 = vsel %vm521_vm0, %v5134_v60, 0.0  ;;  %4107 = vmatpush.bf16.msra.mxu2 %v4879_v58 }
0x10f7   :  { %v5138_v30 = vpop.eup %5137  ;;  %v3807_v26 = vadd.f32 %v3806_v33, %v3805_v13  ;;  %v3808_v59 = vsel %vm521_vm0, %v5136_v12, 0.0  ;;  %v4878_v13 = vld [vmem:[%s7141_s24 + $0x18] sm:$0xff] }
0x10f8   :  { %v3810_v36 = vsel %vm521_vm0, %v5138_v30, 0.0  ;;  %4120 = vmatpush.bf16.msra.mxu3 %v4887_v22  ;;  %vm3870_vm0 = vcmask 517120  }
0x10f9   :  { %v3809_v19 = vadd.f32 %v3808_v59, %v3807_v26  ;;  %v4877_v26 = vld [vmem:[%s7141_s24 + $0x10] sm:$0xff] }
0x10fa   :  { %4108 = vmatpush.bf16.msra.mxu2 %v4878_v13  ;;  %v4885_v59 = vld [vmem:[%s7141_s24 + $0x50] sm:$0xff]  ;;  %v4899_v13 = vld [vmem:[%s5373_s30] sm:$0xff] }
0x10fb   :  { %v3811_v51 = vadd.f32 %v3810_v36, %v3809_v19 }
0x10fd   :  { %5139 = vrcp.f32 %v3811_v51  ;;  %v3823_v37 = vand.u32 2147483648, %v3811_v51  ;;  %v3821_v16 = vand.u32 2147483647, %v3811_v51  ;;  %vm3817_vm7 = vweird.f32 %v3811_v51 }
0x10fe   :  { %4109 = vmatpush.bf16.msra.mxu2 %v4877_v26 }
0x10ff   :  { %v3824_v52 = vor.u32 1.1754944e-38, %v3823_v37  ;;  %vm3822_vm9 = vcmp.eq.f32.partialorder %v3821_v16, 8.507059e+37 }
0x1103   :  { %v5140_v56 = vpop.eup %5139 }
0x1104   :  { %v3813_v41 = vmul.f32 %v5140_v56, %v3811_v51  ;;  %vm3818_vm2 = vweird.f32 %v5140_v56 }
0x1105   :  { %vm3819_vm8 = vmor %vm3817_vm7, %vm3818_vm2 }
0x1106   :  { %v3814_v20 = vsub.f32 1.0, %v3813_v41 }
0x1108   :  { %v3815_v21 = vmul.f32 %v5140_v56, %v3814_v20 }
0x110a   :  { %v3816_v54 = vadd.f32 %v5140_v56, %v3815_v21 }
0x110c   :  { %v3820_v5 = vsel %vm3819_vm8, %v5140_v56, %v3816_v54 }
0x110d   :  { %v3825_v29 = vsel %vm3822_vm9, %v3824_v52, %v3820_v5 }
0x110e   :  { %v3827_v10 = vmul.f32 %v5134_v60, %v3825_v29  ;;  %v3826_v62 = vmul.f32 %v5132_v6, %v3825_v29  ;;  %v3828_v1 = vmul.f32 %v5136_v12, %v3825_v29  ;;  %v3829_v11 = vmul.f32 %v5138_v30, %v3825_v29  ;;  %v4886_v12 = vld [vmem:[%s7141_s24 + $0x58] sm:$0xff]  ;;  %v4883_v29 = vld [vmem:[%s7141_s24 + $0x40] sm:$0xff] }
0x110f   :  { %4121 = vmatpush.bf16.msra.mxu3 %v4886_v12  ;;  %v5062_v12 = vld [vmem:[%s7147_s15] ss:$0 sm:$0xff] }
0x1110   :  { %3841 = vperm.xlu1 %5047, %v3827_v10   ;;  %3832 = vperm.xlu0 %5046, %v3826_v62   ;;  %v4898_v10 = vld [vmem:[%s7142_s6 + $0x38] sm:$0xff]  ;;  %v4897_v62 = vld [vmem:[%s7142_s6 + $0x30] sm:$0xff] }
0x1111   :  { %4206 = vmatpush.bf16.msra.mxu0 %v4898_v10 }
0x1113   :  { %4122 = vmatpush.bf16.msra.mxu3 %v4885_v59 }
0x1115   :  { %4207 = vmatpush.bf16.msra.mxu0 %v4897_v62 }
0x1118   :  { %3850 = vperm.xlu1 %5047, %v3828_v1   ;;  %3859 = vperm.xlu0 %5046, %v3829_v11   ;;  %v4896_v1 = vld [vmem:[%s7142_s6 + $0x28] sm:$0xff]  ;;  %v4895_v11 = vld [vmem:[%s7142_s6 + $0x20] sm:$0xff] }
0x1119   :  { %4208 = vmatpush.bf16.msra.mxu0 %v4896_v1 }
0x111d   :  { %4209 = vmatpush.bf16.msra.mxu0 %v4895_v11 }
0x1121   :  { %4210 = vmatpush.bf16.msra.mxu0 %v4894_v14 }
0x1125   :  { %4211 = vmatpush.bf16.msra.mxu0 %v4893_v49 }
0x1129   :  { %4212 = vmatpush.bf16.msra.mxu0 %v4892_v17 }
0x112d   :  { %4213 = vmatpush.bf16.msra.mxu0 %v4891_v46 }
0x1182   :  { %v3842_v44 = vpop.permute.xlu1 %3841  ;;  %v3833_v57 = vpop.permute.xlu0 %3832 }
0x1183   :  { %v3847_v6 = vperm.slane %v3842_v44, %v6886_v25  ;;  %v3838_v60 = vperm.slane %v3833_v57, %v6886_v25 }
0x1185   :  { %v3867_v33 = vmul.f32 %v3847_v6, %v6867_v48  ;;  %v3866_v30 = vmul.f32 %v3838_v60, %v6879_v53  ;;  %v4900_v60 = vld [vmem:[%s5373_s30 + $0x8] sm:$0xff]  ;;  %s5153_s30 = sshra.s32 %s4293_s22, 4  ;;  %s5154_s30 = int_to_ptr.hbm [resolvable:$true] %s5153_s30 }
0x1186   :  { %4276 = vmatpush.bf16.msrb.mxu1 %v4900_v60  ;;  %p5158_p1 = scmp.lt.s32.totalorder %s5154_s30, %s5383_s4 }
0x1187   :  { %v3872_v51 = vsel %vm3870_vm0, %v3867_v33, 0.0  ;;  %v3871_v56 = vsel %vm3870_vm0, %v3866_v30, 0.0  ;;  %v5063_v33 = vld [vmem:[%s5368_s12] ss:$0 sm:$0xff]  ;;  %s5155_s12 = scalar_lea.hbm %s5154_s30, 2 }
0x1188   :  { %v3873_v37 = vadd.f32 %v3872_v51, %v3871_v56  ;;  %v5064_v56 = vld [vmem:[%s5378_s27] ss:$0 sm:$0xff]  ;;  %p5156_p0 = scmp.ne.s32.totalorder %s5154_s30, %s5155_s12  ;;  %p5159_p2 = scmp.lt.s32.totalorder %s5157_s23, %s5155_s12 }
0x118a   :  { %v3851_v19 = vpop.permute.xlu1 %3850  ;;  %v3860_v36 = vpop.permute.xlu0 %3859  ;;  %4277 = vmatpush.bf16.msrb.mxu1 %v4899_v13  ;;  %p5160_p3 = por %p5159_p2, %p5158_p1 }
0x118b   :  { %v3856_v41 = vperm.slane %v3851_v19, %v6886_v25  ;;  %v3865_v20 = vperm.slane %v3860_v36, %v6886_v25  ;;  %v4876_v25 = vld [vmem:[%s7141_s24 + $0x8] sm:$0xff] }
0x118c   :  { %4110 = vmatpush.bf16.msra.mxu2 %v4876_v25  ;;  %p5161_p4 = pnand %p5160_p3, %p5156_p0 }
0x118d   :  { %v3868_v48 = vmul.f32 %v3856_v41, %v6863_v47  ;;  %v3869_v53 = vmul.f32 %v3865_v20, %v6875_v42  ;;  %v4884_v47 = vld [vmem:[%s7141_s24 + $0x48] sm:$0xff]  ;;  %v4875_v42 = vld [vmem:[%s7141_s24] sm:$0xff] }
0x118e   :  { %4123 = vmatpush.bf16.msra.mxu3 %v4884_v47 }
0x118f   :  { %v3874_v21 = vsel %vm3870_vm0, %v3868_v48, 0.0  ;;  %v3876_v54 = vsel %vm3870_vm0, %v3869_v53, 0.0 }
0x1190   :  { %v3875_v16 = vadd.f32 %v3874_v21, %v3873_v37  ;;  %4111 = vmatpush.bf16.msra.mxu2 %v4875_v42 }
0x1192   :  { %v3877_v52 = vadd.f32 %v3876_v54, %v3875_v16  ;;  %4124 = vmatpush.bf16.msra.mxu3 %v4883_v29 }
0x1194   :  { %v3878_v5 = vpack.c.bf16 %v3877_v52, %v3877_v52 }
0x1196   :  { %4688 = vmatmul.msk.bf16.vlgmr.msrb.gmra.mxu0 %vm1831_vm3, %v3878_v5  ;;  %4689 = vmatmul.msk.bf16.vlgmr.msra.gmra.mxu1 %vm1831_vm3, %v3878_v5 }
0x1213   :  { %v3939_v18 = vpop.f32.mrf.mxu0  ;;  %v3952_v28 = vpop.f32.mrf.mxu1 }
0x1214   :  { %v3962_v24 = vmul.f32 %v3958_v40, %v3939_v18  ;;  %v3963_v35 = vmul.f32 %v3959_v61, %v3952_v28 }
0x1216   :  { %v3970_v8 = vadd.f32 %v3966_v2, %v3962_v24  ;;  %v3971_v9 = vadd.f32 %v3967_v43, %v3963_v35 }
0x1218   :  { %v3972_v63 = vmax.f32 %v3970_v8, 0.0  ;;  %v3973_v50 = vmax.f32 %v3971_v9, 0.0 }
0x121a   :  { %v3974_v34 = vpack.c.bf16 %v3972_v63, %v3972_v63  ;;  %v3975_v31 = vpack.c.bf16 %v3973_v50, %v3973_v50 }
0x121b   :  { %v3941_v32 = vpop.f32.mrf.mxu0  ;;  %v3954_v45 = vpop.f32.mrf.mxu1 }
0x121c   :  { %4112 = vmatmul.bf16.vlgmr.msra.gmra.mxu2 %v3974_v34  ;;  %4125 = vmatmul.bf16.vlgmr.msra.gmra.mxu3 %v3975_v31 }
0x129f   :  { %v4113_v38 = vpop.f32.mrf.mxu2  ;;  %v4126_v0 = vpop.f32.mrf.mxu3 }
0x12a0   :  { %v4127_v23 = vadd.f32 %v4126_v0, %v4113_v38 }
0x12a2   :  { %v4134_v7 = vmul.f32 %v5060_v3, %v4127_v23 }
0x12a4   :  { %v4139_v58 = vadd.f32 %v5061_v55, %v4134_v7 }
0x12a6   :  { %v4140_v22 = vmax.f32 %v4139_v58, 0.0 }
0x12a7   :  { %v4115_v44 = vpop.f32.mrf.mxu2  ;;  %v4128_v57 = vpop.f32.mrf.mxu3 }
0x12a8   :  { %v4141_v6 = vpack.c.bf16 %v4140_v22, %v4140_v22 }
0x12aa   :  { %4214 = vmatmul.bf16.vlgmr.msra.gmra.mxu0 %v4141_v6 }
0x1327   :  { %v4215_v30 = vpop.f32.mrf.mxu0 }
0x1328   :  { %v4223_v26 = vmul.f32 %v5062_v12, %v4215_v30 }
0x132a   :  { %v4228_v59 = vadd.f32 %v5063_v33, %v4223_v26 }
0x132c   :  { %v4229_v19 = vmax.f32 %v4228_v59, 0.0 }
0x132e   :  { %v4230_v36 = vpack.c.bf16 %v4229_v19, %v4229_v19 }
0x132f   :  { %v4217_v51 = vpop.f32.mrf.mxu0 }
0x1330   :  { %4802 = vmatmul.msk.bf16.vlgmr.msrb.gmra.mxu1 %vm1831_vm3, %v4230_v36 }
0x13ad   :  { %v4279_v41 = vpop.f32.mrf.mxu1 }
0x13ae   :  { %v4280_v20 = vadd.f32 %v5064_v56, %v4279_v41 }
0x13b0   :  { %4284 = vst.msk [vmem:[#allocation4] sm:$0x3] %vm4283_vm10, %v4280_v20 }
0x13b1   :  { %5164 = shalt.err (!%p5161_p4)
}
0x13b2   :  { %4295 = dma.vmem_to_hbm [thread:$0]  %s4291_s18, 32, %s4293_s22, [#allocation5]  }
0x13b5   :  { %v4281_v48 = vpop.f32.mrf.mxu1 }
0x13b6   :  { %5165 = dma.done.wait [#allocation5], 32  }
0x13b7   :  { %5166 = vsyncadd [#allocation5], 4294967264 }
0x13b8   :  { %4300 = vsyncpa [#allocation5], 1 }

</bundles_post_ra>
